<compile_context>
chip_gen: v7x
topology: tpu7x:2x2x1
jax: 0.10.0
libtpu: 0.0.40
codegen_flags: <defaults>
</compile_context>

<pallas_src>
import jax
import jax.numpy as jnp
from jax import lax
from jax.experimental import pallas as pl
from jax.experimental.pallas import tpu as pltpu


def _cdiv(a, b):
    return -(-a // b)


# -----------------------------------------------------------------------------
# Kernels
# -----------------------------------------------------------------------------
def _single_pass_kernel(qp_ref, x_ref, o_ref):
    """All of x fits in one VMEM tile: plain softmax, no online recurrence."""
    x_blk = x_ref[...]                                   # (N, D) compute dtype
    s = lax.dot_general(                                 # (tm, N) f32 scores
        qp_ref[...], x_blk,
        dimension_numbers=(((1,), (1,)), ((), ())),
        preferred_element_type=jnp.float32)
    m = s.max(axis=-1, keepdims=True)
    p = jnp.exp(s - m)
    l = p.sum(axis=-1, keepdims=True)
    acc = jnp.dot(p.astype(x_blk.dtype), x_blk,
                  preferred_element_type=jnp.float32)
    o_ref[...] = (acc / l).astype(o_ref.dtype)           # exact division


def _make_online_softmax_kernel(n_pairs, tn, needs_mask):
    """Flash-style online softmax over the num_pairs axis (grid axis 1)."""

    def kernel(qp_ref, x_ref, o_ref, m_sc, l_sc, acc_sc):
        j = pl.program_id(1)

        @pl.when(j == 0)
        def _init():
            m_sc[...] = jnp.full_like(m_sc, -jnp.inf)
            l_sc[...] = jnp.zeros_like(l_sc)
            acc_sc[...] = jnp.zeros_like(acc_sc)

        x_blk = x_ref[...]                               # (tn, D)
        if needs_mask:
            # Ragged last tile: rows >= valid are uninitialized padding.
            valid = n_pairs - j * tn                     # >= 1 on every step
            row_ok = lax.broadcasted_iota(jnp.int32, x_blk.shape, 0) < valid
            x_blk = jnp.where(row_ok, x_blk, jnp.zeros((), x_blk.dtype))

        s = lax.dot_general(                             # (tm, tn) f32 scores
            qp_ref[...], x_blk,
            dimension_numbers=(((1,), (1,)), ((), ())),
            preferred_element_type=jnp.float32)
        if needs_mask:
            col_ok = lax.broadcasted_iota(jnp.int32, s.shape, 1) < valid
            s = jnp.where(col_ok, s, -jnp.inf)

        m_prev = m_sc[...]
        m_new = jnp.maximum(m_prev, s.max(axis=-1, keepdims=True))
        alpha = jnp.exp(m_prev - m_new)
        p = jnp.exp(s - m_new)
        l_sc[...] = alpha * l_sc[...] + p.sum(axis=-1, keepdims=True)
        acc_sc[...] = alpha * acc_sc[...] + jnp.dot(
            p.astype(x_blk.dtype), x_blk, preferred_element_type=jnp.float32)
        m_sc[...] = m_new

        @pl.when(j == pl.num_programs(1) - 1)
        def _finalize():
            # Exact division: runs once per query tile, off the hot loop.
            o_ref[...] = (acc_sc[...] / l_sc[...]).astype(o_ref.dtype)

    return kernel


# -----------------------------------------------------------------------------
# Wrapper
# -----------------------------------------------------------------------------
def attention_selector(query, x, wk, bk=None, *, tm=None, tn=None,
                       compute_dtype=jnp.bfloat16, out_dtype=None):
    """AttentionSelector forward pass.

    query: [M, D]   (nn.Parameter)
    x:     [N, D]   num_pairs inputs
    wk:    [D, D]   PyTorch nn.Linear weight (K = x @ wk.T + bk)
    bk:    [D]      accepted for API parity only: it adds a per-query-row
                    constant to the scores and exactly cancels under softmax.
    """
    del bk  # cancels under softmax over the num_pairs axis (see header)
    M, D = query.shape
    N, D2 = x.shape
    assert D == D2, (D, D2)
    if out_dtype is None:
        out_dtype = x.dtype

    # Fold the key projection into the query (exact; bias cancels).
    qp = jnp.dot(query, wk, preferred_element_type=jnp.float32)
    qp_c = qp.astype(compute_dtype)     # bf16-native MXU operand
    x_c = x.astype(compute_dtype)       # halves HBM bytes streamed per step

    # ---- query-tile size -----------------------------------------------
    if tm is None:
        # One big query tile (up to 256 rows) minimizes re-streaming of x on
        # single-TensorCore chips (v5e / v6e).
        # TODO(synk): on dual-TC v7x pick tm so that M // tm is a multiple of 2
        # (pltpu.get_tpu_info could drive this automatically).
        tm = 256
    tm = max(8, min(tm, M))
    tm = ((tm + 7) // 8) * 8            # sublane multiple
    n_mt = _cdiv(M, tm)
    m_pad = n_mt * tm
    if m_pad != M:                      # pad query rows (cheap); output sliced
        qp_c = jnp.pad(qp_c, ((0, m_pad - M), (0, 0)))

    # ---- num_pairs tile size ---------------------------------------------
    if tn is None:
        # Large tile -> few reduction steps; footprint (bf16 x tile lane-pads
        # D to 128) stays well under even v5e's 16 MiB default scoped VMEM.
        tn = 2048
    tn = min(tn, N)

    out_shape = jax.ShapeDtypeStruct((m_pad, D), out_dtype)

    if tn == N:
        # Whole x fits in one VMEM tile: specialized single-pass kernel
        # (no scratch, no alpha recurrence).  The x block index never changes,
        # so Pallas keeps it resident across query tiles.
        out = pl.pallas_call(
            _single_pass_kernel,
            out_shape=out_shape,
            grid_spec=pltpu.PrefetchScalarGridSpec(
                num_scalar_prefetch=0,
                grid=(n_mt,),
                in_specs=[
                    pl.BlockSpec((tm, D), lambda i: (i, 0)),   # Qp tile
                    pl.BlockSpec((N, D), lambda i: (0, 0)),    # whole x
                ],
                out_specs=pl.BlockSpec((tm, D), lambda i: (i, 0)),
            ),
            compiler_params=pltpu.CompilerParams(
                dimension_semantics=("parallel",)),
        )(qp_c, x_c)
    else:
        tn = max(8, (tn // 8) * 8)      # sublane multiple
        n_nt = _cdiv(N, tn)
        needs_mask = (n_nt * tn != N)   # ragged last x tile -> in-kernel mask
        out = pl.pallas_call(
            _make_online_softmax_kernel(N, tn, needs_mask),
            out_shape=out_shape,
            grid_spec=pltpu.PrefetchScalarGridSpec(
                num_scalar_prefetch=0,
                grid=(n_mt, n_nt),
                in_specs=[
                    pl.BlockSpec((tm, D), lambda i, j: (i, 0)),   # Qp tile
                    pl.BlockSpec((tn, D), lambda i, j: (j, 0)),   # x tile
                ],
                out_specs=pl.BlockSpec((tm, D), lambda i, j: (i, 0)),
                scratch_shapes=[
                    pltpu.VMEM((tm, 1), jnp.float32),   # running max  m
                    pltpu.VMEM((tm, 1), jnp.float32),   # running sum  l
                    pltpu.VMEM((tm, D), jnp.float32),   # output accumulator
                ],
            ),
            compiler_params=pltpu.CompilerParams(
                dimension_semantics=("parallel", "arbitrary")),
        )(qp_c, x_c)

    if m_pad != M:
        out = out[:M]
    return out


# -----------------------------------------------------------------------------
# References
# -----------------------------------------------------------------------------
def _torch_reference(query, x, wk, bk):
    """Exact PyTorch-module semantics in f32 (highest matmul precision)."""
    hp = jax.lax.Precision.HIGHEST
    k = jnp.dot(x, wk.T, precision=hp) + bk
    s = jnp.dot(query, k.T, precision=hp)
    p = jax.nn.softmax(s, axis=1)
    return jnp.dot(p, x, precision=hp)


def _matched_reference(qp_c, x_c, out_dtype):
    """Same math as the kernel on the same bf16 operands (tight comparison)."""
    s = jnp.dot(qp_c, x_c.T, preferred_element_type=jnp.float32)
    m = s.max(axis=1, keepdims=True)
    p = jnp.exp(s - m)
    l = p.sum(axis=1, keepdims=True)
    acc = jnp.dot(p.astype(x_c.dtype), x_c, preferred_element_type=jnp.float32)
    return (acc / l).astype(out_dtype)


if __name__ == "__main__":
    # Scaled-down shapes consistent with the module
    # (original defaults: input_dim=66, output_count=17177, num_pairs=335061).
    D, M, N = 64, 128, 2048

    key = jax.random.PRNGKey(0)
    k1, k2, k3, k4 = jax.random.split(key, 4)
    query = jax.random.normal(k1, (M, D), dtype=jnp.float32)   # nn.Parameter
    wk = jax.random.normal(k2, (D, D), dtype=jnp.float32) * 0.02  # Linear weight
    bk = jax.random.normal(k3, (D,), dtype=jnp.float32) * 0.1     # Linear bias
    x = jax.random.normal(k4, (N, D), dtype=jnp.float32)          # input pairs

    # References: one on the exact bf16 operands the kernel consumes (tight),
    # one with full f32 PyTorch semantics (loose: bf16 input quantization).
    qp_c = jnp.dot(query, wk, preferred_element_type=jnp.float32).astype(jnp.bfloat16)
    x_c = x.astype(jnp.bfloat16)
    ref_match = _matched_reference(qp_c, x_c, jnp.float32)
    ref_torch = _torch_reference(query, x, wk, bk)

    # 1) Default tiling: whole-x single-pass kernel, one query tile.
    out1 = jax.block_until_ready(attention_selector(query, x, wk, bk))
    assert out1.shape == (M, D)
    err1 = float(jnp.max(jnp.abs(out1 - ref_match)))
    assert jnp.allclose(out1, ref_match, atol=5e-3, rtol=5e-3), err1
    sem1 = float(jnp.max(jnp.abs(out1 - ref_torch)))
    assert jnp.allclose(out1, ref_torch, atol=5e-2, rtol=5e-2), sem1

    # 2) Force the multi-step online-softmax path + multiple query tiles.
    out2 = jax.block_until_ready(
        attention_selector(query, x, wk, bk, tm=64, tn=512))
    err2 = float(jnp.max(jnp.abs(out2 - ref_match)))
    assert jnp.allclose(out2, ref_match, atol=5e-3, rtol=5e-3), err2

    # 3) Ragged shapes: query-row padding + masked last num_pairs tile, D=66.
    D3, M3, N3 = 66, 100, 1000
    j1, j2, j3, j4 = jax.random.split(jax.random.PRNGKey(1), 4)
    q3 = jax.random.normal(j1, (M3, D3), dtype=jnp.float32)
    wk3 = jax.random.normal(j2, (D3, D3), dtype=jnp.float32) * 0.02
    bk3 = jax.random.normal(j3, (D3,), dtype=jnp.float32) * 0.1
    x3 = jax.random.normal(j4, (N3, D3), dtype=jnp.float32)
    out3 = jax.block_until_ready(
        attention_selector(q3, x3, wk3, bk3, tm=32, tn=256))
    qp3_c = jnp.dot(q3, wk3, preferred_element_type=jnp.float32).astype(jnp.bfloat16)
    ref3 = _matched_reference(qp3_c, x3.astype(jnp.bfloat16), jnp.float32)
    assert out3.shape == (M3, D3)
    err3 = float(jnp.max(jnp.abs(out3 - ref3)))
    assert jnp.allclose(out3, ref3, atol=5e-3, rtol=5e-3), err3

    print("KERNEL_OK")
</pallas_src>

<mosaic_0001>
module attributes {stable_mosaic.version = 11 : i64} {
  func.func @_single_pass_kernel(%arg0: i32, %arg1: memref<128x64xbf16, #tpu.memory_space<vmem>>, %arg2: memref<2048x64xbf16, #tpu.memory_space<vmem>>, %arg3: memref<128x64xf32, #tpu.memory_space<vmem>>) attributes {dimension_semantics = [#tpu.dimension_semantics<parallel>], iteration_bounds = array<i64: 1>, scalar_prefetch = 0 : i64, scratch_operands = 0 : i64, tpu.core_type = #tpu.core_type<tc>, window_params = [{transform_indices = @transform_0, window_bounds = array<i64: 128, 64>}, {pipeline_mode = #tpu.pipeline_mode<synchronous>, transform_indices = @transform_1, window_bounds = array<i64: 2048, 64>}, {transform_indices = @transform_2, window_bounds = array<i64: 128, 64>}]} {
    %c0 = arith.constant 0 : index
    %c0_0 = arith.constant 0 : index
    %0 = vector.load %arg2[%c0, %c0_0] : memref<2048x64xbf16, #tpu.memory_space<vmem>>, vector<2048x64xbf16>
    %c0_1 = arith.constant 0 : index
    %c0_2 = arith.constant 0 : index
    %1 = vector.load %arg1[%c0_1, %c0_2] : memref<128x64xbf16, #tpu.memory_space<vmem>>, vector<128x64xbf16>
    %cst = arith.constant dense<0.000000e+00> : vector<128x2048xf32>
    %2 = tpu.matmul %1, %0, %cst {dimension_numbers = #tpu.dot_dimension_numbers<[1], [1], [0], [0], [0, 0, 1, 0], [], []>} : vector<128x64xbf16>, vector<2048x64xbf16>, vector<128x2048xf32> -> vector<128x2048xf32>
    %cst_3 = arith.constant dense<0xFF800000> : vector<128xf32>
    %3 = vector.multi_reduction <maximumf>, %2, %cst_3 [1] : vector<128x2048xf32> to vector<128xf32>
    %4 = vector.shape_cast %3 : vector<128xf32> to vector<128x1xf32>
    %5 = vector.broadcast %4 : vector<128x1xf32> to vector<128x2048xf32>
    %6 = arith.subf %2, %5 : vector<128x2048xf32>
    %7 = math.exp %6 : vector<128x2048xf32>
    %cst_4 = arith.constant dense<0.000000e+00> : vector<128xf32>
    %8 = vector.multi_reduction <add>, %7, %cst_4 [1] : vector<128x2048xf32> to vector<128xf32>
    %9 = vector.shape_cast %8 : vector<128xf32> to vector<128x1xf32>
    %10 = arith.truncf %7 : vector<128x2048xf32> to vector<128x2048xbf16>
    %cst_5 = arith.constant dense<0.000000e+00> : vector<128x64xf32>
    %11 = tpu.matmul %10, %0, %cst_5 {dimension_numbers = #tpu.dot_dimension_numbers<[1], [0], [0], [1], [0, 0, 1, 1], [], []>} : vector<128x2048xbf16>, vector<2048x64xbf16>, vector<128x64xf32> -> vector<128x64xf32>
    %12 = vector.broadcast %9 : vector<128x1xf32> to vector<128x64xf32>
    %13 = arith.divf %11, %12 : vector<128x64xf32>
    %c0_6 = arith.constant 0 : index
    %c0_7 = arith.constant 0 : index
    %14 = vector.load %arg3[%c0_6, %c0_7] : memref<128x64xf32, #tpu.memory_space<vmem>>, vector<128x64xf32>
    tpu.vector_store %arg3[%c0_6, %c0_7], %13 {strides = array<i32>} : memref<128x64xf32, #tpu.memory_space<vmem>>, vector<128x64xf32>,
    return
  }
  func.func @transform_0(%arg0: i32) -> (i32, i32) {
    %c0_i32 = arith.constant 0 : i32
    %c0_i32_0 = arith.constant 0 : i32
    return %arg0, %c0_i32 : i32, i32
  }
  func.func @transform_1(%arg0: i32) -> (i32, i32) {
    %c0_i32 = arith.constant 0 : i32
    %c0_i32_0 = arith.constant 0 : i32
    %c0_i32_1 = arith.constant 0 : i32
    return %c0_i32, %c0_i32_0 : i32, i32
  }
  func.func @transform_2(%arg0: i32) -> (i32, i32) {
    %c0_i32 = arith.constant 0 : i32
    %c0_i32_0 = arith.constant 0 : i32
    return %arg0, %c0_i32 : i32, i32
  }
}

</mosaic_0001>

<bundles_post_ra>
// kernel: tpu_custom_call.1
= control target key start
LH: loop header
LB: loop body
LE: loop exit
PB: predicated region body
PF: predicated region fallthrough
CT: control target
= control target key end

     0   :  { %vm964_vm0 = vcmask 523264   ;;  %s10679_s1 = inlined_call_operand.vmem [shape: bf16[2048,64], index: 1, kind: input, shape index: {}]   ;;  %s10680_s0 = inlined_call_operand.vmem [shape: bf16[128,64], index: 0, kind: input, shape index: {}]   ;;  %s10681_s2 = inlined_call_operand.vmem [shape: f32[128,64], index: 2, kind: output, shape index: {}]  }
   0x1   :  { %v5705_v0 = vld [vmem:[%s10679_s1 + $0x40] sm:$0xff]   ;;  %v5709_v5 = vld [vmem:[%s10679_s1 + $0x48] sm:$0xff]   ;;  %v5713_v11 = vld [vmem:[%s10679_s1 + $0x50] sm:$0xff]  }
   0x2   :  { %v5706_v1 = vld [vmem:[%s10679_s1] sm:$0xff]   ;;  %5641 = vmatprep.subr.msk.bf16.mxu0 %vm964_vm0, %v5705_v0  ;;  %v5710_v7 = vld [vmem:[%s10679_s1 + $0x8] sm:$0xff]   ;;  %v5715_v13 = vld [vmem:[%s10679_s1 + $0xd0] sm:$0xff]  }
   0x3   :  { %v5707_v2 = vld [vmem:[%s10679_s1 + $0xc0] sm:$0xff]   ;;  %v990_v3 = vsel %vm964_vm0, %v5706_v1, 0  ;;  %v5711_v8 = vld [vmem:[%s10679_s1 + $0xc8] sm:$0xff]   ;;  %v993_v10 = vsel %vm964_vm0, %v5710_v7, 0  ;;  %v5714_v14 = vld [vmem:[%s10679_s1 + $0x10] sm:$0xff]  }
   0x4   :  { %v5708_v4 = vld [vmem:[%s10679_s1 + $0x80] sm:$0xff]   ;;  %4874 = vmatpush3.bf16.xpose.msra.mxu0 %v990_v3  ;;  %5649 = vmatprep.subr.msk.bf16.mxu1 %vm964_vm0, %v5707_v2  ;;  %v5712_v9 = vld [vmem:[%s10679_s1 + $0x88] sm:$0xff]   ;;  %v5716_v15 = vld [vmem:[%s10679_s1 + $0x90] sm:$0xff]   ;;  %v996_v16 = vsel %vm964_vm0, %v5714_v14, 0 }
   0x5   :  { %v1038_v6 = vsel %vm964_vm0, %v5708_v4, 0  ;;  %5642 = vmatprep.subr.msk.bf16.mxu0 %vm964_vm0, %v5709_v5  ;;  %v1041_v12 = vsel %vm964_vm0, %v5712_v9, 0  ;;  %v5717_v17 = vld [vmem:[%s10679_s1 + $0x58] sm:$0xff]   ;;  %v1044_v18 = vsel %vm964_vm0, %v5716_v15, 0  ;;  %v5721_v23 = vld [vmem:[%s10679_s1 + $0x60] sm:$0xff]   ;;  %v5725_v30 = vld [vmem:[%s10679_s1 + $0x68] sm:$0xff]  }
   0x6   :  { %4906 = vmatpush3.bf16.xpose.msra.mxu1 %v1038_v6  ;;  %v5719_v19 = vld [vmem:[%s10679_s1 + $0xd8] sm:$0xff]   ;;  %v5723_v25 = vld [vmem:[%s10679_s1 + $0xe0] sm:$0xff]   ;;  %v5727_v32 = vld [vmem:[%s10679_s1 + $0xe8] sm:$0xff]  }
   0x7   :  { %5650 = vmatprep.subr.msk.bf16.mxu1 %vm964_vm0, %v5711_v8  ;;  %v5718_v20 = vld [vmem:[%s10679_s1 + $0x18] sm:$0xff]   ;;  %v5722_v26 = vld [vmem:[%s10679_s1 + $0x20] sm:$0xff]   ;;  %v5726_v33 = vld [vmem:[%s10679_s1 + $0x28] sm:$0xff]  }
   0x8   :  { %v5720_v21 = vld [vmem:[%s10679_s1 + $0x98] sm:$0xff]   ;;  %v999_v22 = vsel %vm964_vm0, %v5718_v20, 0  ;;  %v5724_v27 = vld [vmem:[%s10679_s1 + $0xa0] sm:$0xff]   ;;  %v1002_v29 = vsel %vm964_vm0, %v5722_v26, 0  ;;  %v5728_v34 = vld [vmem:[%s10679_s1 + $0xa8] sm:$0xff]   ;;  %v1005_v35 = vsel %vm964_vm0, %v5726_v33, 0 }
   0x9   :  { %v1047_v24 = vsel %vm964_vm0, %v5720_v21, 0  ;;  %v6610_v28 = vld [vmem:[%s10680_s0] sm:$0xff]   ;;  %v1050_v31 = vsel %vm964_vm0, %v5724_v27, 0  ;;  %v5729_v36 = vld [vmem:[%s10679_s1 + $0x70] sm:$0xff]   ;;  %v1053_v37 = vsel %vm964_vm0, %v5728_v34, 0  ;;  %v5733_v42 = vld [vmem:[%s10679_s1 + $0x78] sm:$0xff]  }
   0xa   :  { %4889 = vmatprep.mubr.msk.bf16.mxu0 %vm964_vm0, %v6610_v28  ;;  %4921 = vmatprep.mubr.msk.bf16.mxu1 %vm964_vm0, %v6610_v28  ;;  %v5731_v38 = vld [vmem:[%s10679_s1 + $0xf0] sm:$0xff]   ;;  %v5735_v44 = vld [vmem:[%s10679_s1 + $0xf8] sm:$0xff]   ;;  %v5738_v48 = vld [vmem:[%s10679_s1 + $0x140] sm:$0xff]  }
   0xb   :  { %v5730_v39 = vld [vmem:[%s10679_s1 + $0x30] sm:$0xff]   ;;  %v5734_v45 = vld [vmem:[%s10679_s1 + $0x38] sm:$0xff]   ;;  %v5740_v50 = vld [vmem:[%s10679_s1 + $0x1c0] sm:$0xff]  }
   0xc   :  { %4876 = vmatpush3.bf16.xpose.msra.mxu0 %v993_v10  ;;  %v5732_v40 = vld [vmem:[%s10679_s1 + $0xb0] sm:$0xff]   ;;  %v1008_v41 = vsel %vm964_vm0, %v5730_v39, 0  ;;  %v5736_v46 = vld [vmem:[%s10679_s1 + $0xb8] sm:$0xff]   ;;  %v1011_v47 = vsel %vm964_vm0, %v5734_v45, 0  ;;  %v5739_v51 = vld [vmem:[%s10679_s1 + $0x100] sm:$0xff]  }
   0xd   :  { %5643 = vmatprep.subr.msk.bf16.mxu0 %vm964_vm0, %v5713_v11  ;;  %v1056_v43 = vsel %vm964_vm0, %v5732_v40, 0  ;;  %v1059_v49 = vsel %vm964_vm0, %v5736_v46, 0  ;;  %v5741_v52 = vld [vmem:[%s10679_s1 + $0x180] sm:$0xff]   ;;  %v6683_v53 = vld [vmem:[%s10680_s0 + $0x8] sm:$0xff]   ;;  %v1086_v54 = vsel %vm964_vm0, %v5739_v51, 0  ;;  %v6712_v60 = vld [vmem:[%s10680_s0 + $0x10] sm:$0xff]  }
   0xe   :  { %4908 = vmatpush3.bf16.xpose.msra.mxu1 %v1041_v12  ;;  %v5743_v55 = vld [vmem:[%s10679_s1 + $0x148] sm:$0xff]   ;;  %v1134_v56 = vsel %vm964_vm0, %v5741_v52, 0  ;;  %v5748_v62 = vld [vmem:[%s10679_s1 + $0x150] sm:$0xff]   ;;  %v6741_v3 = vld [vmem:[%s10680_s0 + $0x18] sm:$0xff]  }
   0xf   :  { %5651 = vmatprep.subr.msk.bf16.mxu1 %vm964_vm0, %v5715_v13  ;;  %v5745_v57 = vld [vmem:[%s10679_s1 + $0x1c8] sm:$0xff]   ;;  %v5750_v0 = vld [vmem:[%s10679_s1 + $0x1d0] sm:$0xff]   ;;  %v5753_v5 = vld [vmem:[%s10679_s1 + $0x158] sm:$0xff]  }
  0x10   :  { %v5744_v58 = vld [vmem:[%s10679_s1 + $0x108] sm:$0xff]   ;;  %v5749_v1 = vld [vmem:[%s10679_s1 + $0x110] sm:$0xff]   ;;  %v5755_v7 = vld [vmem:[%s10679_s1 + $0x1d8] sm:$0xff]  }
  0x11   :  { %v5746_v59 = vld [vmem:[%s10679_s1 + $0x188] sm:$0xff]   ;;  %v1089_v61 = vsel %vm964_vm0, %v5744_v58, 0  ;;  %v5751_v2 = vld [vmem:[%s10679_s1 + $0x190] sm:$0xff]   ;;  %v1092_v4 = vsel %vm964_vm0, %v5749_v1, 0  ;;  %v5754_v8 = vld [vmem:[%s10679_s1 + $0x118] sm:$0xff]  }
  0x12   :  { %v1137_v63 = vsel %vm964_vm0, %v5746_v59, 0  ;;  %v1140_v6 = vsel %vm964_vm0, %v5751_v2, 0  ;;  %v5756_v9 = vld [vmem:[%s10679_s1 + $0x198] sm:$0xff]   ;;  %v6770_v10 = vld [vmem:[%s10680_s0 + $0x20] sm:$0xff]   ;;  %v1095_v11 = vsel %vm964_vm0, %v5754_v8, 0  ;;  %v5765_v21 = vld [vmem:[%s10679_s1 + $0x1e8] sm:$0xff]  }
  0x13   :  { %v5758_v12 = vld [vmem:[%s10679_s1 + $0x160] sm:$0xff]   ;;  %v1143_v13 = vsel %vm964_vm0, %v5756_v9, 0  ;;  %v5768_v26 = vld [vmem:[%s10679_s1 + $0x170] sm:$0xff]   ;;  %v5773_v34 = vld [vmem:[%s10679_s1 + $0x178] sm:$0xff]  }
  0x14   :  { %4878 = vmatpush3.bf16.xpose.msra.mxu0 %v996_v16  ;;  %v5760_v14 = vld [vmem:[%s10679_s1 + $0x1e0] sm:$0xff]   ;;  %v5781_v46 = vld [vmem:[%s10679_s1 + $0x248] sm:$0xff]   ;;  %v5785_v52 = vld [vmem:[%s10679_s1 + $0x250] sm:$0xff]  }
  0x15   :  { %5644 = vmatprep.subr.msk.bf16.mxu0 %vm964_vm0, %v5717_v17  ;;  %v5759_v15 = vld [vmem:[%s10679_s1 + $0x120] sm:$0xff]   ;;  %v6799_v17 = vld [vmem:[%s10680_s0 + $0x28] sm:$0xff]   ;;  %v5789_v59 = vld [vmem:[%s10679_s1 + $0x258] sm:$0xff]  }
  0x16   :  { %4910 = vmatpush3.bf16.xpose.msra.mxu1 %v1044_v18  ;;  %v5761_v16 = vld [vmem:[%s10679_s1 + $0x1a0] sm:$0xff]   ;;  %v1098_v18 = vsel %vm964_vm0, %v5759_v15, 0  ;;  %v5797_v9 = vld [vmem:[%s10679_s1 + $0x268] sm:$0xff]  }
  0x17   :  { %5652 = vmatprep.subr.msk.bf16.mxu1 %vm964_vm0, %v5719_v19  ;;  %v5763_v19 = vld [vmem:[%s10679_s1 + $0x168] sm:$0xff]   ;;  %v1146_v20 = vsel %vm964_vm0, %v5761_v16, 0  ;;  %v5777_v40 = vld [vmem:[%s10679_s1 + $0x240] sm:$0xff]   ;;  %v5801_v16 = vld [vmem:[%s10679_s1 + $0x270] sm:$0xff]  }
  0x18   :  { %v5793_v2 = vld [vmem:[%s10679_s1 + $0x260] sm:$0xff]  }
  0x1c   :  { %4880 = vmatpush3.bf16.xpose.msra.mxu0 %v999_v22  ;;  %v5764_v22 = vld [vmem:[%s10679_s1 + $0x128] sm:$0xff]  }
  0x1d   :  { %5645 = vmatprep.subr.msk.bf16.mxu0 %vm964_vm0, %v5721_v23  ;;  %v5766_v23 = vld [vmem:[%s10679_s1 + $0x1a8] sm:$0xff]  }
  0x1e   :  { %4912 = vmatpush3.bf16.xpose.msra.mxu1 %v1047_v24  ;;  %v6828_v24 = vld [vmem:[%s10680_s0 + $0x30] sm:$0xff]   ;;  %v1149_v27 = vsel %vm964_vm0, %v5766_v23, 0  ;;  %v5805_v23 = vld [vmem:[%s10679_s1 + $0x278] sm:$0xff]  }
  0x1f   :  { %5653 = vmatprep.subr.msk.bf16.mxu1 %vm964_vm0, %v5723_v25  ;;  %v1101_v25 = vsel %vm964_vm0, %v5764_v22, 0 }
  0x24   :  { %4882 = vmatpush3.bf16.xpose.msra.mxu0 %v1002_v29  ;;  %v5770_v29 = vld [vmem:[%s10679_s1 + $0x1f0] sm:$0xff]  }
  0x25   :  { %5646 = vmatprep.subr.msk.bf16.mxu0 %vm964_vm0, %v5725_v30  ;;  %v5769_v30 = vld [vmem:[%s10679_s1 + $0x130] sm:$0xff]  }
  0x26   :  { %4914 = vmatpush3.bf16.xpose.msra.mxu1 %v1050_v31  ;;  %v5771_v31 = vld [vmem:[%s10679_s1 + $0x1b0] sm:$0xff]   ;;  %v1104_v33 = vsel %vm964_vm0, %v5769_v30, 0 }
  0x27   :  { %5654 = vmatprep.subr.msk.bf16.mxu1 %vm964_vm0, %v5727_v32  ;;  %v6857_v32 = vld [vmem:[%s10680_s0 + $0x38] sm:$0xff]  }
  0x2c   :  { %4884 = vmatpush3.bf16.xpose.msra.mxu0 %v1005_v35  ;;  %v1152_v35 = vsel %vm964_vm0, %v5771_v31, 0  ;;  %v5809_v31 = vld [vmem:[%s10679_s1 + $0x340] sm:$0xff]  }
  0x2d   :  { %5647 = vmatprep.subr.msk.bf16.mxu0 %vm964_vm0, %v5729_v36  ;;  %v5775_v36 = vld [vmem:[%s10679_s1 + $0x1f8] sm:$0xff]  }
  0x2e   :  { %4916 = vmatpush3.bf16.xpose.msra.mxu1 %v1053_v37  ;;  %v5774_v37 = vld [vmem:[%s10679_s1 + $0x138] sm:$0xff]  }
  0x2f   :  { %5655 = vmatprep.subr.msk.bf16.mxu1 %vm964_vm0, %v5731_v38  ;;  %v5776_v38 = vld [vmem:[%s10679_s1 + $0x1b8] sm:$0xff]   ;;  %v1107_v39 = vsel %vm964_vm0, %v5774_v37, 0 }
  0x34   :  { %4886 = vmatpush3.bf16.xpose.msra.mxu0 %v1008_v41  ;;  %v1155_v41 = vsel %vm964_vm0, %v5776_v38, 0  ;;  %v5813_v38 = vld [vmem:[%s10679_s1 + $0x348] sm:$0xff]  }
  0x35   :  { %5648 = vmatprep.subr.msk.bf16.mxu0 %vm964_vm0, %v5733_v42  ;;  %v5779_v42 = vld [vmem:[%s10679_s1 + $0x2c0] sm:$0xff]  }
  0x36   :  { %4918 = vmatpush3.bf16.xpose.msra.mxu1 %v1056_v43  ;;  %v5778_v43 = vld [vmem:[%s10679_s1 + $0x200] sm:$0xff]  }
  0x37   :  { %5656 = vmatprep.subr.msk.bf16.mxu1 %vm964_vm0, %v5735_v44  ;;  %v5780_v44 = vld [vmem:[%s10679_s1 + $0x280] sm:$0xff]   ;;  %v1182_v45 = vsel %vm964_vm0, %v5778_v43, 0 }
  0x3c   :  { %4888 = vmatpush3.bf16.xpose.msra.mxu0 %v1011_v47  ;;  %v1230_v47 = vsel %vm964_vm0, %v5780_v44, 0 }
  0x3d   :  { %5657 = vmatprep.subr.msk.bf16.mxu0 %vm964_vm0, %v5738_v48  ;;  %v5783_v48 = vld [vmem:[%s10679_s1 + $0x2c8] sm:$0xff]  }
  0x3e   :  { %4920 = vmatpush3.bf16.xpose.msra.mxu1 %v1059_v49  ;;  %v5782_v49 = vld [vmem:[%s10679_s1 + $0x208] sm:$0xff]  }
  0x3f   :  { %5665 = vmatprep.subr.msk.bf16.mxu1 %vm964_vm0, %v5740_v50  ;;  %v5784_v50 = vld [vmem:[%s10679_s1 + $0x288] sm:$0xff]   ;;  %v1185_v51 = vsel %vm964_vm0, %v5782_v49, 0  ;;  %v5821_v49 = vld [vmem:[%s10679_s1 + $0x358] sm:$0xff]  }
  0x43   :  { %4890 = vmatmul.mubr.msk.bf16.vlgmr.msra.gmra.mrb[0].mxu0 %vm964_vm0, %v6610_v28 }
  0x44   :  { %4938 = vmatpush3.bf16.xpose.msra.mxu0 %v1086_v54  ;;  %4891 = vmatprep.mubr.msk.bf16.mxu0 %vm964_vm0, %v6683_v53  ;;  %v1233_v54 = vsel %vm964_vm0, %v5784_v50, 0 }
  0x45   :  { %4922 = vmatmul.mubr.msk.bf16.vlgmr.msra.gmra.mrb[0].mxu1 %vm964_vm0, %v6610_v28  ;;  %5658 = vmatprep.subr.msk.bf16.mxu0 %vm964_vm0, %v5743_v55  ;;  %v5787_v55 = vld [vmem:[%s10679_s1 + $0x2d0] sm:$0xff]  }
  0x46   :  { %4970 = vmatpush3.bf16.xpose.msra.mxu1 %v1134_v56  ;;  %4923 = vmatprep.mubr.msk.bf16.mxu1 %vm964_vm0, %v6683_v53  ;;  %v5786_v56 = vld [vmem:[%s10679_s1 + $0x210] sm:$0xff]  }
  0x47   :  { %5666 = vmatprep.subr.msk.bf16.mxu1 %vm964_vm0, %v5745_v57  ;;  %v5788_v57 = vld [vmem:[%s10679_s1 + $0x290] sm:$0xff]   ;;  %v1188_v58 = vsel %vm964_vm0, %v5786_v56, 0  ;;  %v5825_v56 = vld [vmem:[%s10679_s1 + $0x360] sm:$0xff]  }
  0x4b   :  { %4892 = vmatmul.mubr.msk.bf16.gmra.mrb[4].mxu0 %vm964_vm0, %v6683_v53 }
  0x4c   :  { %4940 = vmatpush3.bf16.xpose.msra.mxu0 %v1089_v61  ;;  %4893 = vmatprep.mubr.msk.bf16.mxu0 %vm964_vm0, %v6712_v60  ;;  %v1236_v61 = vsel %vm964_vm0, %v5788_v57, 0 }
  0x4d   :  { %4924 = vmatmul.mubr.msk.bf16.gmra.mrb[4].mxu1 %vm964_vm0, %v6683_v53  ;;  %5659 = vmatprep.subr.msk.bf16.mxu0 %vm964_vm0, %v5748_v62  ;;  %v5791_v62 = vld [vmem:[%s10679_s1 + $0x2d8] sm:$0xff]  }
  0x4e   :  { %4972 = vmatpush3.bf16.xpose.msra.mxu1 %v1137_v63  ;;  %4925 = vmatprep.mubr.msk.bf16.mxu1 %vm964_vm0, %v6712_v60  ;;  %v5790_v63 = vld [vmem:[%s10679_s1 + $0x218] sm:$0xff]  }
  0x4f   :  { %5667 = vmatprep.subr.msk.bf16.mxu1 %vm964_vm0, %v5750_v0  ;;  %v5792_v0 = vld [vmem:[%s10679_s1 + $0x298] sm:$0xff]   ;;  %v1191_v1 = vsel %vm964_vm0, %v5790_v63, 0  ;;  %v5829_v63 = vld [vmem:[%s10679_s1 + $0x368] sm:$0xff]  }
  0x53   :  { %4894 = vmatmul.mubr.msk.bf16.gmra.mrb[8].mxu0 %vm964_vm0, %v6712_v60 }
  0x54   :  { %4942 = vmatpush3.bf16.xpose.msra.mxu0 %v1092_v4  ;;  %4895 = vmatprep.mubr.msk.bf16.mxu0 %vm964_vm0, %v6741_v3  ;;  %v1239_v4 = vsel %vm964_vm0, %v5792_v0, 0 }
  0x55   :  { %4926 = vmatmul.mubr.msk.bf16.gmra.mrb[8].mxu1 %vm964_vm0, %v6712_v60  ;;  %5660 = vmatprep.subr.msk.bf16.mxu0 %vm964_vm0, %v5753_v5  ;;  %v5795_v5 = vld [vmem:[%s10679_s1 + $0x2e0] sm:$0xff]  }
  0x56   :  { %4974 = vmatpush3.bf16.xpose.msra.mxu1 %v1140_v6  ;;  %4927 = vmatprep.mubr.msk.bf16.mxu1 %vm964_vm0, %v6741_v3  ;;  %v5794_v6 = vld [vmem:[%s10679_s1 + $0x220] sm:$0xff]  }
  0x57   :  { %5668 = vmatprep.subr.msk.bf16.mxu1 %vm964_vm0, %v5755_v7  ;;  %v5796_v7 = vld [vmem:[%s10679_s1 + $0x2a0] sm:$0xff]   ;;  %v1194_v8 = vsel %vm964_vm0, %v5794_v6, 0  ;;  %v5833_v6 = vld [vmem:[%s10679_s1 + $0x370] sm:$0xff]  }
  0x5b   :  { %4896 = vmatmul.mubr.msk.bf16.gmra.mrb[12].mxu0 %vm964_vm0, %v6741_v3 }
  0x5c   :  { %4944 = vmatpush3.bf16.xpose.msra.mxu0 %v1095_v11  ;;  %4897 = vmatprep.mubr.msk.bf16.mxu0 %vm964_vm0, %v6770_v10  ;;  %v1242_v11 = vsel %vm964_vm0, %v5796_v7, 0 }
  0x5d   :  { %4928 = vmatmul.mubr.msk.bf16.gmra.mrb[12].mxu1 %vm964_vm0, %v6741_v3  ;;  %5661 = vmatprep.subr.msk.bf16.mxu0 %vm964_vm0, %v5758_v12  ;;  %v5799_v12 = vld [vmem:[%s10679_s1 + $0x2e8] sm:$0xff]  }
  0x5e   :  { %4976 = vmatpush3.bf16.xpose.msra.mxu1 %v1143_v13  ;;  %4929 = vmatprep.mubr.msk.bf16.mxu1 %vm964_vm0, %v6770_v10  ;;  %v5798_v13 = vld [vmem:[%s10679_s1 + $0x228] sm:$0xff]  }
  0x5f   :  { %5669 = vmatprep.subr.msk.bf16.mxu1 %vm964_vm0, %v5760_v14  ;;  %v5800_v14 = vld [vmem:[%s10679_s1 + $0x2a8] sm:$0xff]   ;;  %v1197_v15 = vsel %vm964_vm0, %v5798_v13, 0  ;;  %v5837_v13 = vld [vmem:[%s10679_s1 + $0x378] sm:$0xff]  }
  0x63   :  { %4898 = vmatmul.mubr.msk.bf16.gmra.mrb[16].mxu0 %vm964_vm0, %v6770_v10 }
  0x64   :  { %4946 = vmatpush3.bf16.xpose.msra.mxu0 %v1098_v18  ;;  %4899 = vmatprep.mubr.msk.bf16.mxu0 %vm964_vm0, %v6799_v17  ;;  %v1245_v18 = vsel %vm964_vm0, %v5800_v14, 0 }
  0x65   :  { %4930 = vmatmul.mubr.msk.bf16.gmra.mrb[16].mxu1 %vm964_vm0, %v6770_v10  ;;  %5662 = vmatprep.subr.msk.bf16.mxu0 %vm964_vm0, %v5763_v19  ;;  %v5803_v19 = vld [vmem:[%s10679_s1 + $0x2f0] sm:$0xff]  }
  0x66   :  { %4978 = vmatpush3.bf16.xpose.msra.mxu1 %v1146_v20  ;;  %4931 = vmatprep.mubr.msk.bf16.mxu1 %vm964_vm0, %v6799_v17  ;;  %v5802_v20 = vld [vmem:[%s10679_s1 + $0x230] sm:$0xff]  }
  0x67   :  { %5670 = vmatprep.subr.msk.bf16.mxu1 %vm964_vm0, %v5765_v21  ;;  %v5804_v21 = vld [vmem:[%s10679_s1 + $0x2b0] sm:$0xff]   ;;  %v1200_v22 = vsel %vm964_vm0, %v5802_v20, 0 }
  0x6b   :  { %4900 = vmatmul.mubr.msk.bf16.gmra.mrb[20].mxu0 %vm964_vm0, %v6799_v17 }
  0x6c   :  { %4948 = vmatpush3.bf16.xpose.msra.mxu0 %v1101_v25  ;;  %4901 = vmatprep.mubr.msk.bf16.mxu0 %vm964_vm0, %v6828_v24  ;;  %v1248_v25 = vsel %vm964_vm0, %v5804_v21, 0  ;;  %v6385_v21 = vld [vmem:[%s10680_s0] sm:$0xff]  }
  0x6d   :  { %4932 = vmatmul.mubr.msk.bf16.gmra.mrb[20].mxu1 %vm964_vm0, %v6799_v17  ;;  %5663 = vmatprep.subr.msk.bf16.mxu0 %vm964_vm0, %v5768_v26  ;;  %v5807_v26 = vld [vmem:[%s10679_s1 + $0x2f8] sm:$0xff]  }
  0x6e   :  { %4980 = vmatpush3.bf16.xpose.msra.mxu1 %v1149_v27  ;;  %4933 = vmatprep.mubr.msk.bf16.mxu1 %vm964_vm0, %v6828_v24  ;;  %v5806_v27 = vld [vmem:[%s10679_s1 + $0x238] sm:$0xff]  }
  0x6f   :  { %5671 = vmatprep.subr.msk.bf16.mxu1 %vm964_vm0, %v5770_v29  ;;  %v5808_v29 = vld [vmem:[%s10679_s1 + $0x2b8] sm:$0xff]   ;;  %v1203_v30 = vsel %vm964_vm0, %v5806_v27, 0  ;;  %v6390_v27 = vld [vmem:[%s10679_s1 + $0x80] sm:$0xff]  }
  0x73   :  { %4902 = vmatmul.mubr.msk.bf16.gmra.mrb[24].mxu0 %vm964_vm0, %v6828_v24 }
  0x74   :  { %4950 = vmatpush3.bf16.xpose.msra.mxu0 %v1104_v33  ;;  %4903 = vmatprep.mubr.msk.bf16.mxu0 %vm964_vm0, %v6857_v32  ;;  %v1251_v33 = vsel %vm964_vm0, %v5808_v29, 0  ;;  %v6391_v29 = vld [vmem:[%s10679_s1 + $0xc8] sm:$0xff]  }
  0x75   :  { %4934 = vmatmul.mubr.msk.bf16.gmra.mrb[24].mxu1 %vm964_vm0, %v6828_v24  ;;  %5664 = vmatprep.subr.msk.bf16.mxu0 %vm964_vm0, %v5773_v34  ;;  %v5811_v34 = vld [vmem:[%s10679_s1 + $0x3c0] sm:$0xff]  }
  0x76   :  { %4982 = vmatpush3.bf16.xpose.msra.mxu1 %v1152_v35  ;;  %4935 = vmatprep.mubr.msk.bf16.mxu1 %vm964_vm0, %v6857_v32  ;;  %v5810_v35 = vld [vmem:[%s10679_s1 + $0x300] sm:$0xff]  }
  0x77   :  { %5672 = vmatprep.subr.msk.bf16.mxu1 %vm964_vm0, %v5775_v36  ;;  %v5812_v36 = vld [vmem:[%s10679_s1 + $0x380] sm:$0xff]   ;;  %v1278_v37 = vsel %vm964_vm0, %v5810_v35, 0  ;;  %v6396_v35 = vld [vmem:[%s10679_s1 + $0x10] sm:$0xff]  }
  0x7b   :  { %4904 = vmatmul.mubr.msk.bf16.gmra.mrb[28].mxu0 %vm964_vm0, %v6857_v32 }
  0x7c   :  { %4952 = vmatpush3.bf16.xpose.msra.mxu0 %v1107_v39  ;;  %4953 = vmatprep.mubr.msk.bf16.mxu0 %vm964_vm0, %v6610_v28  ;;  %v1326_v39 = vsel %vm964_vm0, %v5812_v36, 0  ;;  %v6397_v36 = vld [vmem:[%s10679_s1 + $0x58] sm:$0xff]  }
  0x7d   :  { %4936 = vmatmul.mubr.msk.bf16.gmra.mrb[28].mxu1 %vm964_vm0, %v6857_v32  ;;  %5673 = vmatprep.subr.msk.bf16.mxu0 %vm964_vm0, %v5777_v40  ;;  %v5815_v40 = vld [vmem:[%s10679_s1 + $0x3c8] sm:$0xff]  }
  0x7e   :  { %4984 = vmatpush3.bf16.xpose.msra.mxu1 %v1155_v41  ;;  %4985 = vmatprep.mubr.msk.bf16.mxu1 %vm964_vm0, %v6610_v28  ;;  %v5814_v41 = vld [vmem:[%s10679_s1 + $0x308] sm:$0xff]  }
  0x7f   :  { %5681 = vmatprep.subr.msk.bf16.mxu1 %vm964_vm0, %v5779_v42  ;;  %v5816_v42 = vld [vmem:[%s10679_s1 + $0x388] sm:$0xff]   ;;  %v1281_v43 = vsel %vm964_vm0, %v5814_v41, 0  ;;  %v6403_v41 = vld [vmem:[%s10679_s1 + $0xe0] sm:$0xff]  }
  0x80   :  { %v1329_v44 = vsel %vm964_vm0, %v5816_v42, 0  ;;  %v6404_v42 = vld [vmem:[%s10679_s1 + $0x20] sm:$0xff]  }
  0x83   :  { %4954 = vmatmul.mubr.msk.bf16.vlgmr.msra.gmra.mrb[32].mxu0 %vm964_vm0, %v6610_v28 }
  0x84   :  { %5002 = vmatpush3.bf16.xpose.msra.mxu0 %v1182_v45  ;;  %4955 = vmatprep.mubr.msk.bf16.mxu0 %vm964_vm0, %v6683_v53  ;;  %v5819_v45 = vld [vmem:[%s10679_s1 + $0x3d0] sm:$0xff]  }
  0x85   :  { %4986 = vmatmul.mubr.msk.bf16.vlgmr.msra.gmra.mrb[32].mxu1 %vm964_vm0, %v6610_v28  ;;  %5674 = vmatprep.subr.msk.bf16.mxu0 %vm964_vm0, %v5781_v46  ;;  %v5818_v46 = vld [vmem:[%s10679_s1 + $0x310] sm:$0xff]  }
  0x86   :  { %5034 = vmatpush3.bf16.xpose.msra.mxu1 %v1230_v47  ;;  %4987 = vmatprep.mubr.msk.bf16.mxu1 %vm964_vm0, %v6683_v53  ;;  %v5820_v47 = vld [vmem:[%s10679_s1 + $0x390] sm:$0xff]  }
  0x87   :  { %5682 = vmatprep.subr.msk.bf16.mxu1 %vm964_vm0, %v5783_v48  ;;  %v1284_v48 = vsel %vm964_vm0, %v5818_v46, 0  ;;  %v1332_v50 = vsel %vm964_vm0, %v5820_v47, 0 }
  0x8b   :  { %4956 = vmatmul.mubr.msk.bf16.gmra.mrb[36].mxu0 %vm964_vm0, %v6683_v53 }
  0x8c   :  { %5004 = vmatpush3.bf16.xpose.msra.mxu0 %v1185_v51  ;;  %4957 = vmatprep.mubr.msk.bf16.mxu0 %vm964_vm0, %v6712_v60  ;;  %v5823_v51 = vld [vmem:[%s10679_s1 + $0x3d8] sm:$0xff]  }
  0x8d   :  { %4988 = vmatmul.mubr.msk.bf16.gmra.mrb[36].mxu1 %vm964_vm0, %v6683_v53  ;;  %5675 = vmatprep.subr.msk.bf16.mxu0 %vm964_vm0, %v5785_v52  ;;  %v5822_v52 = vld [vmem:[%s10679_s1 + $0x318] sm:$0xff]  }
  0x8e   :  { %5036 = vmatpush3.bf16.xpose.msra.mxu1 %v1233_v54  ;;  %4989 = vmatprep.mubr.msk.bf16.mxu1 %vm964_vm0, %v6712_v60  ;;  %v5824_v54 = vld [vmem:[%s10679_s1 + $0x398] sm:$0xff]  }
  0x8f   :  { %5683 = vmatprep.subr.msk.bf16.mxu1 %vm964_vm0, %v5787_v55  ;;  %v1287_v55 = vsel %vm964_vm0, %v5822_v52, 0  ;;  %v1335_v57 = vsel %vm964_vm0, %v5824_v54, 0  ;;  %v6409_v52 = vld [vmem:[%s10679_s1 + $0x70] sm:$0xff]  }
  0x93   :  { %4958 = vmatmul.mubr.msk.bf16.gmra.mrb[40].mxu0 %vm964_vm0, %v6712_v60 }
  0x94   :  { %5006 = vmatpush3.bf16.xpose.msra.mxu0 %v1188_v58  ;;  %4959 = vmatprep.mubr.msk.bf16.mxu0 %vm964_vm0, %v6741_v3  ;;  %v5827_v58 = vld [vmem:[%s10679_s1 + $0x3e0] sm:$0xff]  }
  0x95   :  { %4990 = vmatmul.mubr.msk.bf16.gmra.mrb[40].mxu1 %vm964_vm0, %v6712_v60  ;;  %5676 = vmatprep.subr.msk.bf16.mxu0 %vm964_vm0, %v5789_v59  ;;  %v5826_v59 = vld [vmem:[%s10679_s1 + $0x320] sm:$0xff]  }
  0x96   :  { %5038 = vmatpush3.bf16.xpose.msra.mxu1 %v1236_v61  ;;  %4991 = vmatprep.mubr.msk.bf16.mxu1 %vm964_vm0, %v6741_v3  ;;  %v5828_v61 = vld [vmem:[%s10679_s1 + $0x3a0] sm:$0xff]  }
  0x97   :  { %5684 = vmatprep.subr.msk.bf16.mxu1 %vm964_vm0, %v5791_v62  ;;  %v1290_v62 = vsel %vm964_vm0, %v5826_v59, 0  ;;  %v1338_v0 = vsel %vm964_vm0, %v5828_v61, 0  ;;  %v6411_v59 = vld [vmem:[%s10679_s1 + $0xf0] sm:$0xff]  }
  0x9b   :  { %4960 = vmatmul.mubr.msk.bf16.gmra.mrb[44].mxu0 %vm964_vm0, %v6741_v3 }
  0x9c   :  { %5008 = vmatpush3.bf16.xpose.msra.mxu0 %v1191_v1  ;;  %4961 = vmatprep.mubr.msk.bf16.mxu0 %vm964_vm0, %v6770_v10  ;;  %v5831_v1 = vld [vmem:[%s10679_s1 + $0x3e8] sm:$0xff]  }
  0x9d   :  { %4992 = vmatmul.mubr.msk.bf16.gmra.mrb[44].mxu1 %vm964_vm0, %v6741_v3  ;;  %5677 = vmatprep.subr.msk.bf16.mxu0 %vm964_vm0, %v5793_v2  ;;  %v5830_v2 = vld [vmem:[%s10679_s1 + $0x328] sm:$0xff]  }
  0x9e   :  { %5040 = vmatpush3.bf16.xpose.msra.mxu1 %v1239_v4  ;;  %4993 = vmatprep.mubr.msk.bf16.mxu1 %vm964_vm0, %v6770_v10  ;;  %v5832_v4 = vld [vmem:[%s10679_s1 + $0x3a8] sm:$0xff]  }
  0x9f   :  { %5685 = vmatprep.subr.msk.bf16.mxu1 %vm964_vm0, %v5795_v5  ;;  %v1293_v5 = vsel %vm964_vm0, %v5830_v2, 0  ;;  %v1341_v7 = vsel %vm964_vm0, %v5832_v4, 0  ;;  %v6414_v4 = vld [vmem:[%s10679_s1 + $0xb0] sm:$0xff]  }
  0xa3   :  { %4962 = vmatmul.mubr.msk.bf16.gmra.mrb[48].mxu0 %vm964_vm0, %v6770_v10 }
  0xa4   :  { %5010 = vmatpush3.bf16.xpose.msra.mxu0 %v1194_v8  ;;  %4963 = vmatprep.mubr.msk.bf16.mxu0 %vm964_vm0, %v6799_v17  ;;  %v5835_v8 = vld [vmem:[%s10679_s1 + $0x3f0] sm:$0xff]  }
  0xa5   :  { %4994 = vmatmul.mubr.msk.bf16.gmra.mrb[48].mxu1 %vm964_vm0, %v6770_v10  ;;  %5678 = vmatprep.subr.msk.bf16.mxu0 %vm964_vm0, %v5797_v9  ;;  %v5834_v9 = vld [vmem:[%s10679_s1 + $0x330] sm:$0xff]  }
  0xa6   :  { %5042 = vmatpush3.bf16.xpose.msra.mxu1 %v1242_v11  ;;  %4995 = vmatprep.mubr.msk.bf16.mxu1 %vm964_vm0, %v6799_v17  ;;  %v5836_v11 = vld [vmem:[%s10679_s1 + $0x3b0] sm:$0xff]  }
  0xa7   :  { %5686 = vmatprep.subr.msk.bf16.mxu1 %vm964_vm0, %v5799_v12  ;;  %v1296_v12 = vsel %vm964_vm0, %v5834_v9, 0  ;;  %v1344_v14 = vsel %vm964_vm0, %v5836_v11, 0  ;;  %v6416_v9 = vld [vmem:[%s10679_s1 + $0x38] sm:$0xff]  }
  0xab   :  { %4964 = vmatmul.mubr.msk.bf16.gmra.mrb[52].mxu0 %vm964_vm0, %v6799_v17 }
  0xac   :  { %5012 = vmatpush3.bf16.xpose.msra.mxu0 %v1197_v15  ;;  %4965 = vmatprep.mubr.msk.bf16.mxu0 %vm964_vm0, %v6828_v24  ;;  %v5839_v15 = vld [vmem:[%s10679_s1 + $0x3f8] sm:$0xff]  }
  0xad   :  { %4996 = vmatmul.mubr.msk.bf16.gmra.mrb[52].mxu1 %vm964_vm0, %v6799_v17  ;;  %5679 = vmatprep.subr.msk.bf16.mxu0 %vm964_vm0, %v5801_v16  ;;  %v5838_v16 = vld [vmem:[%s10679_s1 + $0x338] sm:$0xff]  }
  0xae   :  { %5044 = vmatpush3.bf16.xpose.msra.mxu1 %v1245_v18  ;;  %4997 = vmatprep.mubr.msk.bf16.mxu1 %vm964_vm0, %v6828_v24  ;;  %v5840_v18 = vld [vmem:[%s10679_s1 + $0x3b8] sm:$0xff]  }
  0xaf   :  { %5687 = vmatprep.subr.msk.bf16.mxu1 %vm964_vm0, %v5803_v19  ;;  %v1299_v19 = vsel %vm964_vm0, %v5838_v16, 0  ;;  %v1347_v20 = vsel %vm964_vm0, %v5840_v18, 0  ;;  %v6418_v18 = vld [vmem:[%s10679_s1 + $0xb8] sm:$0xff]  }
  0xb3   :  { %4966 = vmatmul.mubr.msk.bf16.gmra.mrb[56].mxu0 %vm964_vm0, %v6828_v24 }
  0xb4   :  { %5014 = vmatpush3.bf16.xpose.msra.mxu0 %v1200_v22  ;;  %4967 = vmatprep.mubr.msk.bf16.mxu0 %vm964_vm0, %v6857_v32  ;;  %v6386_v22 = vld [vmem:[%s10679_s1 + $0x40] sm:$0xff]  }
  0xb5   :  { %4998 = vmatmul.mubr.msk.bf16.gmra.mrb[56].mxu1 %vm964_vm0, %v6828_v24  ;;  %5680 = vmatprep.subr.msk.bf16.mxu0 %vm964_vm0, %v5805_v23  ;;  %v6387_v23 = vld [vmem:[%s10679_s1 + $0xc0] sm:$0xff]  }
  0xb6   :  { %5046 = vmatpush3.bf16.xpose.msra.mxu1 %v1248_v25  ;;  %4999 = vmatprep.mubr.msk.bf16.mxu1 %vm964_vm0, %v6857_v32  ;;  %v6388_v25 = vld [vmem:[%s10679_s1] sm:$0xff]  }
  0xb7   :  { %5688 = vmatprep.subr.msk.bf16.mxu1 %vm964_vm0, %v5807_v26  ;;  %v6389_v26 = vld [vmem:[%s10679_s1 + $0x48] sm:$0xff]  }
  0xbb   :  { %4968 = vmatmul.mubr.msk.bf16.gmra.mrb[60].mxu0 %vm964_vm0, %v6857_v32 }
  0xbc   :  { %5016 = vmatpush3.bf16.xpose.msra.mxu0 %v1203_v30  ;;  %5017 = vmatprep.mubr.msk.bf16.mxu0 %vm964_vm0, %v6610_v28  ;;  %v6392_v30 = vld [vmem:[%s10679_s1 + $0x8] sm:$0xff]  }
  0xbd   :  { %5000 = vmatmul.mubr.msk.bf16.gmra.mrb[60].mxu1 %vm964_vm0, %v6857_v32  ;;  %5689 = vmatprep.subr.msk.bf16.mxu0 %vm964_vm0, %v5809_v31  ;;  %v6393_v31 = vld [vmem:[%s10679_s1 + $0x50] sm:$0xff]  }
  0xbe   :  { %5048 = vmatpush3.bf16.xpose.msra.mxu1 %v1251_v33  ;;  %5049 = vmatprep.mubr.msk.bf16.mxu1 %vm964_vm0, %v6610_v28  ;;  %v6394_v33 = vld [vmem:[%s10679_s1 + $0x88] sm:$0xff]  }
  0xbf   :  { %5697 = vmatprep.subr.msk.bf16.mxu1 %vm964_vm0, %v5811_v34  ;;  %v6395_v34 = vld [vmem:[%s10679_s1 + $0xd0] sm:$0xff]  }
  0xc3   :  { %5018 = vmatmul.mubr.msk.bf16.vlgmr.msra.gmra.mrb[64].mxu0 %vm964_vm0, %v6610_v28 }
  0xc4   :  { %5066 = vmatpush3.bf16.xpose.msra.mxu0 %v1278_v37  ;;  %5019 = vmatprep.mubr.msk.bf16.mxu0 %vm964_vm0, %v6683_v53  ;;  %v6398_v37 = vld [vmem:[%s10679_s1 + $0x90] sm:$0xff]  }
  0xc5   :  { %5050 = vmatmul.mubr.msk.bf16.vlgmr.msra.gmra.mrb[64].mxu1 %vm964_vm0, %v6610_v28  ;;  %5690 = vmatprep.subr.msk.bf16.mxu0 %vm964_vm0, %v5813_v38  ;;  %v5817_v28 = vld [vmem:[%s10679_s1 + $0x350] sm:$0xff]   ;;  %v6399_v38 = vld [vmem:[%s10679_s1 + $0xd8] sm:$0xff]  }
  0xc6   :  { %5098 = vmatpush3.bf16.xpose.msra.mxu1 %v1326_v39  ;;  %5051 = vmatprep.mubr.msk.bf16.mxu1 %vm964_vm0, %v6683_v53  ;;  %v6401_v39 = vld [vmem:[%s10679_s1 + $0x60] sm:$0xff]  }
  0xc7   :  { %5698 = vmatprep.subr.msk.bf16.mxu1 %vm964_vm0, %v5815_v40  ;;  %v6402_v40 = vld [vmem:[%s10679_s1 + $0x98] sm:$0xff]  }
  0xcb   :  { %5020 = vmatmul.mubr.msk.bf16.gmra.mrb[68].mxu0 %vm964_vm0, %v6683_v53 }
  0xcc   :  { %5068 = vmatpush3.bf16.xpose.msra.mxu0 %v1281_v43  ;;  %5021 = vmatprep.mubr.msk.bf16.mxu0 %vm964_vm0, %v6712_v60  ;;  %v6405_v43 = vld [vmem:[%s10679_s1 + $0x68] sm:$0xff]  }
  0xcd   :  { %5052 = vmatmul.mubr.msk.bf16.gmra.mrb[68].mxu1 %vm964_vm0, %v6683_v53  ;;  %5691 = vmatprep.subr.msk.bf16.mxu0 %vm964_vm0, %v5817_v28 }
  0xce   :  { %5100 = vmatpush3.bf16.xpose.msra.mxu1 %v1329_v44  ;;  %5053 = vmatprep.mubr.msk.bf16.mxu1 %vm964_vm0, %v6712_v60  ;;  %v6406_v44 = vld [vmem:[%s10679_s1 + $0xa0] sm:$0xff]  }
  0xcf   :  { %5699 = vmatprep.subr.msk.bf16.mxu1 %vm964_vm0, %v5819_v45 }
  0xd3   :  { %5022 = vmatmul.mubr.msk.bf16.gmra.mrb[72].mxu0 %vm964_vm0, %v6712_v60 }
  0xd4   :  { %5070 = vmatpush3.bf16.xpose.msra.mxu0 %v1284_v48  ;;  %5023 = vmatprep.mubr.msk.bf16.mxu0 %vm964_vm0, %v6741_v3 }
  0xd5   :  { %5054 = vmatmul.mubr.msk.bf16.gmra.mrb[72].mxu1 %vm964_vm0, %v6712_v60  ;;  %5692 = vmatprep.subr.msk.bf16.mxu0 %vm964_vm0, %v5821_v49  ;;  %v6408_v49 = vld [vmem:[%s10679_s1 + $0x28] sm:$0xff]  }
  0xd6   :  { %5102 = vmatpush3.bf16.xpose.msra.mxu1 %v1332_v50  ;;  %5055 = vmatprep.mubr.msk.bf16.mxu1 %vm964_vm0, %v6741_v3 }
  0xd7   :  { %5700 = vmatprep.subr.msk.bf16.mxu1 %vm964_vm0, %v5823_v51 }
  0xdb   :  { %5024 = vmatmul.mubr.msk.bf16.gmra.mrb[76].mxu0 %vm964_vm0, %v6741_v3 }
  0xdc   :  { %5072 = vmatpush3.bf16.xpose.msra.mxu0 %v1287_v55  ;;  %5025 = vmatprep.mubr.msk.bf16.mxu0 %vm964_vm0, %v6770_v10 }
  0xdd   :  { %5056 = vmatmul.mubr.msk.bf16.gmra.mrb[76].mxu1 %vm964_vm0, %v6741_v3  ;;  %5693 = vmatprep.subr.msk.bf16.mxu0 %vm964_vm0, %v5825_v56 }
  0xde   :  { %5104 = vmatpush3.bf16.xpose.msra.mxu1 %v1335_v57  ;;  %5057 = vmatprep.mubr.msk.bf16.mxu1 %vm964_vm0, %v6770_v10  ;;  %v6410_v57 = vld [vmem:[%s10679_s1 + $0xa8] sm:$0xff]  }
  0xdf   :  { %5701 = vmatprep.subr.msk.bf16.mxu1 %vm964_vm0, %v5827_v58 }
  0xe3   :  { %5026 = vmatmul.mubr.msk.bf16.gmra.mrb[80].mxu0 %vm964_vm0, %v6770_v10 }
  0xe4   :  { %5074 = vmatpush3.bf16.xpose.msra.mxu0 %v1290_v62  ;;  %5027 = vmatprep.mubr.msk.bf16.mxu0 %vm964_vm0, %v6799_v17 }
  0xe5   :  { %5058 = vmatmul.mubr.msk.bf16.gmra.mrb[80].mxu1 %vm964_vm0, %v6770_v10  ;;  %5694 = vmatprep.subr.msk.bf16.mxu0 %vm964_vm0, %v5829_v63  ;;  %v6412_v63 = vld [vmem:[%s10679_s1 + $0x30] sm:$0xff]  }
  0xe6   :  { %5106 = vmatpush3.bf16.xpose.msra.mxu1 %v1338_v0  ;;  %5059 = vmatprep.mubr.msk.bf16.mxu1 %vm964_vm0, %v6799_v17  ;;  %v6413_v0 = vld [vmem:[%s10679_s1 + $0x78] sm:$0xff]  }
  0xe7   :  { %5702 = vmatprep.subr.msk.bf16.mxu1 %vm964_vm0, %v5831_v1 }
  0xeb   :  { %5028 = vmatmul.mubr.msk.bf16.gmra.mrb[84].mxu0 %vm964_vm0, %v6799_v17 }
  0xec   :  { %5076 = vmatpush3.bf16.xpose.msra.mxu0 %v1293_v5  ;;  %5029 = vmatprep.mubr.msk.bf16.mxu0 %vm964_vm0, %v6828_v24 }
  0xed   :  { %5060 = vmatmul.mubr.msk.bf16.gmra.mrb[84].mxu1 %vm964_vm0, %v6799_v17  ;;  %5695 = vmatprep.subr.msk.bf16.mxu0 %vm964_vm0, %v5833_v6 }
  0xee   :  { %5108 = vmatpush3.bf16.xpose.msra.mxu1 %v1341_v7  ;;  %5061 = vmatprep.mubr.msk.bf16.mxu1 %vm964_vm0, %v6828_v24 }
  0xef   :  { %5703 = vmatprep.subr.msk.bf16.mxu1 %vm964_vm0, %v5835_v8 }
  0xf3   :  { %5030 = vmatmul.mubr.msk.bf16.gmra.mrb[88].mxu0 %vm964_vm0, %v6828_v24 }
  0xf4   :  { %5078 = vmatpush3.bf16.xpose.msra.mxu0 %v1296_v12  ;;  %5031 = vmatprep.mubr.msk.bf16.mxu0 %vm964_vm0, %v6857_v32 }
  0xf5   :  { %5062 = vmatmul.mubr.msk.bf16.gmra.mrb[88].mxu1 %vm964_vm0, %v6828_v24  ;;  %5696 = vmatprep.subr.msk.bf16.mxu0 %vm964_vm0, %v5837_v13  ;;  %v6417_v13 = vld [vmem:[%s10679_s1 + $0x140] sm:$0xff]  }
  0xf6   :  { %5110 = vmatpush3.bf16.xpose.msra.mxu1 %v1344_v14  ;;  %5063 = vmatprep.mubr.msk.bf16.mxu1 %vm964_vm0, %v6857_v32 }
  0xf7   :  { %5704 = vmatprep.subr.msk.bf16.mxu1 %vm964_vm0, %v5839_v15 }
  0xfb   :  { %5032 = vmatmul.mubr.msk.bf16.gmra.mrb[92].mxu0 %vm964_vm0, %v6857_v32 }
  0xfc   :  { %5080 = vmatpush3.bf16.xpose.msra.mxu0 %v1299_v19  ;;  %5081 = vmatprep.mubr.msk.bf16.mxu0 %vm964_vm0, %v6385_v21 }
  0xfd   :  { %5064 = vmatmul.mubr.msk.bf16.gmra.mrb[92].mxu1 %vm964_vm0, %v6857_v32  ;;  %5129 = vmatprep.subr.bf16.mxu0 %v6386_v22 }
  0xfe   :  { %5112 = vmatpush3.bf16.xpose.msra.mxu1 %v1347_v20  ;;  %5113 = vmatprep.mubr.msk.bf16.mxu1 %vm964_vm0, %v6385_v21  ;;  %v6419_v20 = vld [vmem:[%s10679_s1 + $0x1c0] sm:$0xff]  }
  0xff   :  { %5193 = vmatprep.subr.bf16.mxu1 %v6387_v23 }
 0x103   :  { %5082 = vmatmul.mubr.msk.bf16.vlgmr.msra.gmra.mrb[96].mxu0 %vm964_vm0, %v6385_v21 }
 0x104   :  { %5083 = vmatprep.mubr.msk.bf16.mxu0 %vm964_vm0, %v6683_v53  ;;  %5130 = vmatpush3.bf16.msra.mxu0 %v6388_v25 }
 0x105   :  { %5114 = vmatmul.mubr.msk.bf16.vlgmr.msra.gmra.mrb[96].mxu1 %vm964_vm0, %v6385_v21  ;;  %5131 = vmatprep.subr.bf16.mxu0 %v6389_v26 }
 0x106   :  { %5115 = vmatprep.mubr.msk.bf16.mxu1 %vm964_vm0, %v6683_v53  ;;  %5194 = vmatpush3.bf16.msra.mxu1 %v6390_v27 }
 0x107   :  { %5195 = vmatprep.subr.bf16.mxu1 %v6391_v29 }
 0x108   :  { %5132 = vmatpush3.bf16.msra.mxu0 %v6392_v30 }
 0x109   :  { %5133 = vmatprep.subr.bf16.mxu0 %v6393_v31 }
 0x10a   :  { %5196 = vmatpush3.bf16.msra.mxu1 %v6394_v33 }
 0x10b   :  { %5084 = vmatmul.mubr.msk.bf16.gmra.mrb[100].mxu0 %vm964_vm0, %v6683_v53  ;;  %5197 = vmatprep.subr.bf16.mxu1 %v6395_v34 }
 0x10c   :  { %5085 = vmatprep.mubr.msk.bf16.mxu0 %vm964_vm0, %v6712_v60  ;;  %5134 = vmatpush3.bf16.msra.mxu0 %v6396_v35 }
 0x10d   :  { %5116 = vmatmul.mubr.msk.bf16.gmra.mrb[100].mxu1 %vm964_vm0, %v6683_v53  ;;  %5135 = vmatprep.subr.bf16.mxu0 %v6397_v36  ;;  %v6400_v53 = vld [vmem:[%s10679_s1 + $0x18] sm:$0xff]  }
 0x10e   :  { %5117 = vmatprep.mubr.msk.bf16.mxu1 %vm964_vm0, %v6712_v60  ;;  %5198 = vmatpush3.bf16.msra.mxu1 %v6398_v37 }
 0x10f   :  { %5199 = vmatprep.subr.bf16.mxu1 %v6399_v38 }
 0x110   :  { %5136 = vmatpush3.bf16.msra.mxu0 %v6400_v53 }
 0x111   :  { %5137 = vmatprep.subr.bf16.mxu0 %v6401_v39 }
 0x112   :  { %5200 = vmatpush3.bf16.msra.mxu1 %v6402_v40 }
 0x113   :  { %5086 = vmatmul.mubr.msk.bf16.gmra.mrb[104].mxu0 %vm964_vm0, %v6712_v60  ;;  %5201 = vmatprep.subr.bf16.mxu1 %v6403_v41 }
 0x114   :  { %5087 = vmatprep.mubr.msk.bf16.mxu0 %vm964_vm0, %v6741_v3  ;;  %5138 = vmatpush3.bf16.msra.mxu0 %v6404_v42 }
 0x115   :  { %5118 = vmatmul.mubr.msk.bf16.gmra.mrb[104].mxu1 %vm964_vm0, %v6712_v60  ;;  %5139 = vmatprep.subr.bf16.mxu0 %v6405_v43  ;;  %v6407_v60 = vld [vmem:[%s10679_s1 + $0xe8] sm:$0xff]  }
 0x116   :  { %v7358_v28 = vpop.f32.mrb[0].mxu0  ;;  %5119 = vmatprep.mubr.msk.bf16.mxu1 %vm964_vm0, %v6741_v3  ;;  %5202 = vmatpush3.bf16.msra.mxu1 %v6406_v44 }
 0x117   :  { %v7365_v45 = vpop.f32.mrb[1].mxu0  ;;  %5203 = vmatprep.subr.bf16.mxu1 %v6407_v60 }
 0x118   :  { %v2277_v46 = vmax.f32 %v7358_v28, %v7365_v45  ;;  %v7372_v47 = vpop.f32.mrb[2].mxu0  ;;  %v7374_v48 = vpop.f32.mrb[0].mxu1  ;;  %5140 = vmatpush3.bf16.msra.mxu0 %v6408_v49 }
 0x119   :  { %v7379_v50 = vpop.f32.mrb[3].mxu0  ;;  %v7381_v51 = vpop.f32.mrb[1].mxu1  ;;  %5141 = vmatprep.subr.bf16.mxu0 %v6409_v52 }
 0x11a   :  { %v7387_v54 = vmax.f32 %v2277_v46, %v7374_v48  ;;  %v2294_v55 = vmax.f32 %v7372_v47, %v7379_v50  ;;  %v7391_v56 = vpop.f32.mrb[2].mxu1  ;;  %5204 = vmatpush3.bf16.msra.mxu1 %v6410_v57 }
 0x11b   :  { %v7396_v58 = vpop.f32.mrb[3].mxu1  ;;  %5088 = vmatmul.mubr.msk.bf16.gmra.mrb[108].mxu0 %vm964_vm0, %v6741_v3  ;;  %5205 = vmatprep.subr.bf16.mxu1 %v6411_v59 }
 0x11c   :  { %v7406_v62 = vmax.f32 %v2294_v55, %v7391_v56  ;;  %5089 = vmatprep.mubr.msk.bf16.mxu0 %vm964_vm0, %v6770_v10  ;;  %5142 = vmatpush3.bf16.msra.mxu0 %v6412_v63 }
 0x11d   :  { %5120 = vmatmul.mubr.msk.bf16.gmra.mrb[108].mxu1 %vm964_vm0, %v6741_v3  ;;  %5143 = vmatprep.subr.bf16.mxu0 %v6413_v0  ;;  %v6415_v3 = vld [vmem:[%s10679_s1 + $0xf8] sm:$0xff]  }
 0x11e   :  { %v7420_v2 = vpop.f32.mrb[4].mxu0  ;;  %5121 = vmatprep.mubr.msk.bf16.mxu1 %vm964_vm0, %v6770_v10  ;;  %5206 = vmatpush3.bf16.msra.mxu1 %v6414_v4 }
 0x11f   :  { %v7427_v5 = vpop.f32.mrb[5].mxu0  ;;  %5207 = vmatprep.subr.bf16.mxu1 %v6415_v3 }
 0x120   :  { %v2311_v6 = vmax.f32 %v7420_v2, %v7427_v5  ;;  %v7434_v7 = vpop.f32.mrb[6].mxu0  ;;  %v7436_v8 = vpop.f32.mrb[4].mxu1  ;;  %5144 = vmatpush3.bf16.msra.mxu0 %v6416_v9 }
 0x121   :  { %11056 = vst [vmem:[#allocation2_spill] sm:$0xff] %v7434_v7  ;;  %v7441_v11 = vpop.f32.mrb[7].mxu0  ;;  %v7443_v12 = vpop.f32.mrb[5].mxu1  ;;  %5257 = vmatprep.subr.bf16.mxu0 %v6417_v13 }
 0x122   :  { %11057 = vst [vmem:[#allocation3_spill] sm:$0xff] %v7441_v11  ;;  %v7449_v14 = vmax.f32 %v2311_v6, %v7436_v8  ;;  %v2328_v15 = vmax.f32 %v7434_v7, %v7441_v11  ;;  %v7453_v16 = vpop.f32.mrb[6].mxu1  ;;  %5208 = vmatpush3.bf16.msra.mxu1 %v6418_v18 }
 0x123   :  { %11058 = vst [vmem:[#allocation4_spill] sm:$0xff] %v7453_v16  ;;  %v7458_v19 = vpop.f32.mrb[7].mxu1  ;;  %5090 = vmatmul.mubr.msk.bf16.gmra.mrb[112].mxu0 %vm964_vm0, %v6770_v10  ;;  %5321 = vmatprep.subr.bf16.mxu1 %v6419_v20 }
 0x124   :  { %11059 = vst [vmem:[#allocation5_spill] sm:$0xff] %v7458_v19  ;;  %v7468_v22 = vmax.f32 %v2328_v15, %v7453_v16  ;;  %5091 = vmatprep.mubr.msk.bf16.mxu0 %vm964_vm0, %v6799_v17 }
 0x125   :  { %5122 = vmatmul.mubr.msk.bf16.gmra.mrb[112].mxu1 %vm964_vm0, %v6770_v10 }
 0x126   :  { %v7476_v25 = vpop.f32.mrb[8].mxu0  ;;  %5123 = vmatprep.mubr.msk.bf16.mxu1 %vm964_vm0, %v6799_v17 }
 0x127   :  { %11060 = vst [vmem:[#allocation6_spill] sm:$0xff] %v7476_v25  ;;  %v7480_v26 = vpop.f32.mrb[9].mxu0 }
 0x128   :  { %11061 = vst [vmem:[#allocation7_spill] sm:$0xff] %v7480_v26  ;;  %v2345_v27 = vmax.f32 %v7476_v25, %v7480_v26  ;;  %v7484_v29 = vpop.f32.mrb[10].mxu0  ;;  %v7486_v30 = vpop.f32.mrb[8].mxu1 }
 0x129   :  { %11062 = vst [vmem:[#allocation8_spill] sm:$0xff] %v7484_v29  ;;  %11063 = vst [vmem:[#allocation9_spill] sm:$0xff] %v7486_v30  ;;  %v7488_v31 = vpop.f32.mrb[11].mxu0  ;;  %v7490_v10 = vpop.f32.mrb[9].mxu1 }
 0x12a   :  { %11064 = vst [vmem:[#allocation10_spill] sm:$0xff] %v7488_v31  ;;  %11065 = vst [vmem:[#allocation11_spill] sm:$0xff] %v7490_v10  ;;  %v7493_v33 = vmax.f32 %v2345_v27, %v7486_v30  ;;  %v2362_v34 = vmax.f32 %v7484_v29, %v7488_v31  ;;  %v7497_v35 = vpop.f32.mrb[10].mxu1 }
 0x12b   :  { %11066 = vst [vmem:[#allocation12_spill] sm:$0xff] %v7497_v35  ;;  %v7499_v36 = vpop.f32.mrb[11].mxu1  ;;  %5092 = vmatmul.mubr.msk.bf16.gmra.mrb[116].mxu0 %vm964_vm0, %v6799_v17 }
 0x12c   :  { %11067 = vst [vmem:[#allocation13_spill] sm:$0xff] %v7499_v36  ;;  %v7506_v38 = vmax.f32 %v2362_v34, %v7497_v35  ;;  %5093 = vmatprep.mubr.msk.bf16.mxu0 %vm964_vm0, %v6828_v24 }
 0x12d   :  { %5124 = vmatmul.mubr.msk.bf16.gmra.mrb[116].mxu1 %vm964_vm0, %v6799_v17 }
 0x12e   :  { %v7514_v39 = vpop.f32.mrb[12].mxu0  ;;  %5125 = vmatprep.mubr.msk.bf16.mxu1 %vm964_vm0, %v6828_v24 }
 0x12f   :  { %11068 = vst [vmem:[#allocation14_spill] sm:$0xff] %v7514_v39  ;;  %v7518_v40 = vpop.f32.mrb[13].mxu0 }
 0x130   :  { %11069 = vst [vmem:[#allocation15_spill] sm:$0xff] %v7518_v40  ;;  %v2379_v41 = vmax.f32 %v7514_v39, %v7518_v40  ;;  %v7522_v42 = vpop.f32.mrb[14].mxu0  ;;  %v7524_v43 = vpop.f32.mrb[12].mxu1 }
 0x131   :  { %11070 = vst [vmem:[#allocation16_spill] sm:$0xff] %v7522_v42  ;;  %11071 = vst [vmem:[#allocation17_spill] sm:$0xff] %v7524_v43  ;;  %v7526_v44 = vpop.f32.mrb[15].mxu0  ;;  %v7528_v17 = vpop.f32.mrb[13].mxu1 }
 0x132   :  { %11072 = vst [vmem:[#allocation18_spill] sm:$0xff] %v7526_v44  ;;  %11073 = vst [vmem:[#allocation19_spill] sm:$0xff] %v7528_v17  ;;  %v7531_v60 = vmax.f32 %v2379_v41, %v7524_v43  ;;  %v2396_v46 = vmax.f32 %v7522_v42, %v7526_v44  ;;  %v7535_v49 = vpop.f32.mrb[14].mxu1 }
 0x133   :  { %11074 = vst [vmem:[#allocation20_spill] sm:$0xff] %v7535_v49  ;;  %v7537_v52 = vpop.f32.mrb[15].mxu1  ;;  %5094 = vmatmul.mubr.msk.bf16.gmra.mrb[120].mxu0 %vm964_vm0, %v6828_v24 }
 0x134   :  { %11075 = vst [vmem:[#allocation21_spill] sm:$0xff] %v7537_v52  ;;  %v7544_v57 = vmax.f32 %v2396_v46, %v7535_v49  ;;  %5095 = vmatprep.mubr.msk.bf16.mxu0 %vm964_vm0, %v6857_v32 }
 0x135   :  { %5126 = vmatmul.mubr.msk.bf16.gmra.mrb[120].mxu1 %vm964_vm0, %v6828_v24 }
 0x136   :  { %v7552_v63 = vpop.f32.mrb[16].mxu0  ;;  %5127 = vmatprep.mubr.msk.bf16.mxu1 %vm964_vm0, %v6857_v32 }
 0x137   :  { %11076 = vst [vmem:[#allocation22_spill] sm:$0xff] %v7552_v63  ;;  %v7556_v0 = vpop.f32.mrb[17].mxu0 }
 0x138   :  { %11077 = vst [vmem:[#allocation23_spill] sm:$0xff] %v7556_v0  ;;  %v2413_v4 = vmax.f32 %v7552_v63, %v7556_v0  ;;  %v7560_v3 = vpop.f32.mrb[18].mxu0  ;;  %v7562_v6 = vpop.f32.mrb[16].mxu1 }
 0x139   :  { %11078 = vst [vmem:[#allocation24_spill] sm:$0xff] %v7560_v3  ;;  %11079 = vst [vmem:[#allocation25_spill] sm:$0xff] %v7562_v6  ;;  %v7564_v9 = vpop.f32.mrb[19].mxu0  ;;  %v7566_v24 = vpop.f32.mrb[17].mxu1 }
 0x13a   :  { %11080 = vst [vmem:[#allocation26_spill] sm:$0xff] %v7564_v9  ;;  %11081 = vst [vmem:[#allocation27_spill] sm:$0xff] %v7566_v24  ;;  %v7569_v13 = vmax.f32 %v2413_v4, %v7562_v6  ;;  %v2430_v15 = vmax.f32 %v7560_v3, %v7564_v9  ;;  %v7573_v18 = vpop.f32.mrb[18].mxu1 }
 0x13b   :  { %11082 = vst [vmem:[#allocation28_spill] sm:$0xff] %v7573_v18  ;;  %v7575_v20 = vpop.f32.mrb[19].mxu1  ;;  %5096 = vmatmul.mubr.msk.bf16.gmra.mrb[124].mxu0 %vm964_vm0, %v6857_v32 }
 0x13c   :  { %11083 = vst [vmem:[#allocation29_spill] sm:$0xff] %v7575_v20  ;;  %v7582_v34 = vmax.f32 %v2430_v15, %v7573_v18 }
 0x13d   :  { %5128 = vmatmul.mubr.msk.bf16.gmra.mrb[124].mxu1 %vm964_vm0, %v6857_v32 }
 0x13e   :  { %v7588_v46 = vpop.f32.mrb[20].mxu0 }
 0x13f   :  { %11084 = vst [vmem:[#allocation30_spill] sm:$0xff] %v7588_v46  ;;  %v7590_v4 = vpop.f32.mrb[21].mxu0 }
 0x140   :  { %11085 = vst [vmem:[#allocation31_spill] sm:$0xff] %v7590_v4  ;;  %v2447_v59 = vmax.f32 %v7588_v46, %v7590_v4  ;;  %v7594_v55 = vpop.f32.mrb[22].mxu0  ;;  %v7596_v53 = vpop.f32.mrb[20].mxu1 }
 0x141   :  { %11086 = vst [vmem:[#allocation32_spill] sm:$0xff] %v7594_v55  ;;  %11087 = vst [vmem:[#allocation33_spill] sm:$0xff] %v7596_v53  ;;  %v7598_v27 = vpop.f32.mrb[23].mxu0  ;;  %v7600_v15 = vpop.f32.mrb[21].mxu1 }
 0x142   :  { %11088 = vst [vmem:[#allocation34_spill] sm:$0xff] %v7598_v27  ;;  %11089 = vst [vmem:[#allocation35_spill] sm:$0xff] %v7600_v15  ;;  %v7603_v32 = vmax.f32 %v2447_v59, %v7596_v53  ;;  %v2464_v41 = vmax.f32 %v7594_v55, %v7598_v27  ;;  %v7607_v37 = vpop.f32.mrb[22].mxu1 }
 0x143   :  { %11090 = vst [vmem:[#allocation36_spill] sm:$0xff] %v7607_v37  ;;  %v7609_v23 = vpop.f32.mrb[23].mxu1 }
 0x144   :  { %11091 = vst [vmem:[#allocation37_spill] sm:$0xff] %v7609_v23  ;;  %v7614_v1 = vmax.f32 %v2464_v41, %v7607_v37 }
 0x146   :  { %v7618_v46 = vpop.f32.mrb[24].mxu0 }
 0x147   :  { %11092 = vst [vmem:[#allocation38_spill] sm:$0xff] %v7618_v46  ;;  %v7620_v59 = vpop.f32.mrb[25].mxu0 }
 0x148   :  { %11093 = vst [vmem:[#allocation39_spill] sm:$0xff] %v7620_v59  ;;  %v2481_v53 = vmax.f32 %v7618_v46, %v7620_v59  ;;  %v7624_v55 = vpop.f32.mrb[26].mxu0  ;;  %v7626_v27 = vpop.f32.mrb[24].mxu1 }
 0x149   :  { %11094 = vst [vmem:[#allocation40_spill] sm:$0xff] %v7624_v55  ;;  %11095 = vst [vmem:[#allocation41_spill] sm:$0xff] %v7626_v27  ;;  %v7628_v4 = vpop.f32.mrb[27].mxu0  ;;  %v7630_v21 = vpop.f32.mrb[25].mxu1 }
 0x14a   :  { %11096 = vst [vmem:[#allocation42_spill] sm:$0xff] %v7628_v4  ;;  %11097 = vst [vmem:[#allocation43_spill] sm:$0xff] %v7630_v21  ;;  %v7633_v41 = vmax.f32 %v2481_v53, %v7626_v27  ;;  %v2498_v61 = vmax.f32 %v7624_v55, %v7628_v4  ;;  %v7637_v37 = vpop.f32.mrb[26].mxu1 }
 0x14b   :  { %11098 = vst [vmem:[#allocation44_spill] sm:$0xff] %v7637_v37  ;;  %v7639_v18 = vpop.f32.mrb[27].mxu1 }
 0x14c   :  { %11099 = vst [vmem:[#allocation45_spill] sm:$0xff] %v7639_v18  ;;  %v7644_v59 = vmax.f32 %v2498_v61, %v7637_v37 }
 0x14e   :  { %v7648_v3 = vpop.f32.mrb[28].mxu0 }
 0x14f   :  { %11100 = vst [vmem:[#allocation46_spill] sm:$0xff] %v7648_v3  ;;  %v7650_v53 = vpop.f32.mrb[29].mxu0 }
 0x150   :  { %11101 = vst [vmem:[#allocation47_spill] sm:$0xff] %v7650_v53  ;;  %v2515_v27 = vmax.f32 %v7648_v3, %v7650_v53  ;;  %v7654_v55 = vpop.f32.mrb[30].mxu0  ;;  %v7656_v4 = vpop.f32.mrb[28].mxu1 }
 0x151   :  { %11102 = vst [vmem:[#allocation48_spill] sm:$0xff] %v7654_v55  ;;  %11103 = vst [vmem:[#allocation49_spill] sm:$0xff] %v7656_v4  ;;  %v7658_v63 = vpop.f32.mrb[31].mxu0  ;;  %v7660_v46 = vpop.f32.mrb[29].mxu1 }
 0x152   :  { %11104 = vst [vmem:[#allocation50_spill] sm:$0xff] %v7658_v63  ;;  %11105 = vst [vmem:[#allocation51_spill] sm:$0xff] %v7660_v46  ;;  %v7663_v61 = vmax.f32 %v2515_v27, %v7656_v4  ;;  %v2532_v6 = vmax.f32 %v7654_v55, %v7658_v63  ;;  %v7667_v37 = vpop.f32.mrb[30].mxu1  ;;  %v11108_v27 = vmax.f32 %v7387_v54, %v7381_v51 }
 0x153   :  { %11106 = vst [vmem:[#allocation52_spill] sm:$0xff] %v7667_v37  ;;  %v7669_v9 = vpop.f32.mrb[31].mxu1 }
 0x154   :  { %11107 = vst [vmem:[#allocation53_spill] sm:$0xff] %v7669_v9  ;;  %v7674_v53 = vmax.f32 %v2532_v6, %v7667_v37  ;;  %v11110_v6 = vmax.f32 %v7406_v62, %v7396_v58 }
 0x156   :  { %v7678_v49 = vpop.f32.mrb[32].mxu0 }
 0x157   :  { %v2280_v4 = vmax.f32 %v11108_v27, %v7678_v49  ;;  %v7684_v55 = vpop.f32.mrb[33].mxu0 }
 0x158   :  { %v7686_v63 = vpop.f32.mrb[34].mxu0  ;;  %v7688_v43 = vpop.f32.mrb[32].mxu1 }
 0x159   :  { %11109 = vst [vmem:[#allocation54_spill] sm:$0xff] %v7686_v63  ;;  %v2281_v3 = vmax.f32 %v2280_v4, %v7684_v55  ;;  %v2297_v0 = vmax.f32 %v11110_v6, %v7686_v63  ;;  %v7695_v37 = vpop.f32.mrb[35].mxu0  ;;  %v7697_v42 = vpop.f32.mrb[33].mxu1 }
 0x15a   :  { %11111 = vst [vmem:[#allocation55_spill] sm:$0xff] %v7695_v37  ;;  %v7699_v44 = vpop.f32.mrb[34].mxu1 }
 0x15b   :  { %11112 = vst [vmem:[#allocation56_spill] sm:$0xff] %v7699_v44  ;;  %v7702_v54 = vmax.f32 %v2281_v3, %v7688_v43  ;;  %v2298_v27 = vmax.f32 %v2297_v0, %v7695_v37  ;;  %v7705_v39 = vpop.f32.mrb[35].mxu1  ;;  %v11115_v3 = vmax.f32 %v7449_v14, %v7443_v12 }
 0x15c   :  { %11113 = vst [vmem:[#allocation57_spill] sm:$0xff] %v7705_v39 }
 0x15d   :  { %v7710_v40 = vmax.f32 %v2298_v27, %v7699_v44  ;;  %v11119_v27 = vmax.f32 %v7468_v22, %v7458_v19 }
 0x15e   :  { %v7712_v62 = vpop.f32.mrb[36].mxu0 }
 0x15f   :  { %11114 = vst [vmem:[#allocation58_spill] sm:$0xff] %v7712_v62  ;;  %v2314_v63 = vmax.f32 %v11115_v3, %v7712_v62  ;;  %v7720_v35 = vpop.f32.mrb[37].mxu0 }
 0x160   :  { %11116 = vst [vmem:[#allocation59_spill] sm:$0xff] %v7720_v35  ;;  %v7722_v0 = vpop.f32.mrb[38].mxu0  ;;  %v7724_v37 = vpop.f32.mrb[36].mxu1 }
 0x161   :  { %11117 = vst [vmem:[#allocation60_spill] sm:$0xff] %v7722_v0  ;;  %11118 = vst [vmem:[#allocation61_spill] sm:$0xff] %v7724_v37  ;;  %v2315_v4 = vmax.f32 %v2314_v63, %v7720_v35  ;;  %v2331_v44 = vmax.f32 %v11119_v27, %v7722_v0  ;;  %v7731_v29 = vpop.f32.mrb[39].mxu0  ;;  %v7733_v6 = vpop.f32.mrb[37].mxu1 }
 0x162   :  { %11120 = vst [vmem:[#allocation62_spill] sm:$0xff] %v7731_v29  ;;  %11121 = vst [vmem:[#allocation63_spill] sm:$0xff] %v7733_v6  ;;  %v7735_v31 = vpop.f32.mrb[38].mxu1 }
 0x163   :  { %11122 = vst [vmem:[#allocation64_spill] sm:$0xff] %v7735_v31  ;;  %v7738_v14 = vmax.f32 %v2315_v4, %v7724_v37  ;;  %v2332_v3 = vmax.f32 %v2331_v44, %v7731_v29  ;;  %v7741_v62 = vpop.f32.mrb[39].mxu1  ;;  %v11125_v4 = vmax.f32 %v7493_v33, %v7490_v10 }
 0x164   :  { %11123 = vst [vmem:[#allocation65_spill] sm:$0xff] %v7741_v62 }
 0x165   :  { %v7746_v35 = vmax.f32 %v2332_v3, %v7735_v31  ;;  %v11129_v3 = vmax.f32 %v7506_v38, %v7499_v36 }
 0x166   :  { %v7748_v22 = vpop.f32.mrb[40].mxu0 }
 0x167   :  { %11124 = vst [vmem:[#allocation66_spill] sm:$0xff] %v7748_v22  ;;  %v2348_v0 = vmax.f32 %v11125_v4, %v7748_v22  ;;  %v7756_v37 = vpop.f32.mrb[41].mxu0 }
 0x168   :  { %11126 = vst [vmem:[#allocation67_spill] sm:$0xff] %v7756_v37  ;;  %v7758_v44 = vpop.f32.mrb[42].mxu0  ;;  %v7760_v29 = vpop.f32.mrb[40].mxu1 }
 0x169   :  { %11127 = vst [vmem:[#allocation68_spill] sm:$0xff] %v7758_v44  ;;  %11128 = vst [vmem:[#allocation69_spill] sm:$0xff] %v7760_v29  ;;  %v2349_v63 = vmax.f32 %v2348_v0, %v7756_v37  ;;  %v2365_v31 = vmax.f32 %v11129_v3, %v7758_v44  ;;  %v7767_v30 = vpop.f32.mrb[43].mxu0  ;;  %v7769_v27 = vpop.f32.mrb[41].mxu1 }
 0x16a   :  { %11130 = vst [vmem:[#allocation70_spill] sm:$0xff] %v7767_v30  ;;  %11131 = vst [vmem:[#allocation71_spill] sm:$0xff] %v7769_v27  ;;  %v7771_v25 = vpop.f32.mrb[42].mxu1 }
 0x16b   :  { %11132 = vst [vmem:[#allocation72_spill] sm:$0xff] %v7771_v25  ;;  %v7774_v33 = vmax.f32 %v2349_v63, %v7760_v29  ;;  %v2366_v4 = vmax.f32 %v2365_v31, %v7767_v30  ;;  %v7777_v22 = vpop.f32.mrb[43].mxu1  ;;  %v11135_v63 = vmax.f32 %v7531_v60, %v7528_v17 }
 0x16c   :  { %11133 = vst [vmem:[#allocation73_spill] sm:$0xff] %v7777_v22 }
 0x16d   :  { %v7782_v37 = vmax.f32 %v2366_v4, %v7771_v25  ;;  %v11139_v4 = vmax.f32 %v7544_v57, %v7537_v52 }
 0x16e   :  { %v7784_v38 = vpop.f32.mrb[44].mxu0 }
 0x16f   :  { %11134 = vst [vmem:[#allocation74_spill] sm:$0xff] %v7784_v38  ;;  %v2382_v44 = vmax.f32 %v11135_v63, %v7784_v38  ;;  %v7792_v29 = vpop.f32.mrb[45].mxu0 }
 0x170   :  { %11136 = vst [vmem:[#allocation75_spill] sm:$0xff] %v7792_v29  ;;  %v7794_v31 = vpop.f32.mrb[46].mxu0  ;;  %v7796_v30 = vpop.f32.mrb[44].mxu1 }
 0x171   :  { %11137 = vst [vmem:[#allocation76_spill] sm:$0xff] %v7794_v31  ;;  %11138 = vst [vmem:[#allocation77_spill] sm:$0xff] %v7796_v30  ;;  %v2383_v0 = vmax.f32 %v2382_v44, %v7792_v29  ;;  %v2399_v25 = vmax.f32 %v11139_v4, %v7794_v31  ;;  %v7803_v36 = vpop.f32.mrb[47].mxu0  ;;  %v7805_v3 = vpop.f32.mrb[45].mxu1 }
 0x172   :  { %11140 = vst [vmem:[#allocation78_spill] sm:$0xff] %v7803_v36  ;;  %11141 = vst [vmem:[#allocation79_spill] sm:$0xff] %v7805_v3  ;;  %v7807_v10 = vpop.f32.mrb[46].mxu1 }
 0x173   :  { %11142 = vst [vmem:[#allocation80_spill] sm:$0xff] %v7807_v10  ;;  %v7810_v60 = vmax.f32 %v2383_v0, %v7796_v30  ;;  %v2400_v63 = vmax.f32 %v2399_v25, %v7803_v36  ;;  %v7813_v38 = vpop.f32.mrb[47].mxu1  ;;  %v11145_v0 = vmax.f32 %v7569_v13, %v7566_v24 }
 0x174   :  { %11143 = vst [vmem:[#allocation81_spill] sm:$0xff] %v7813_v38 }
 0x175   :  { %v7818_v29 = vmax.f32 %v2400_v63, %v7807_v10  ;;  %v11149_v63 = vmax.f32 %v7582_v34, %v7575_v20 }
 0x176   :  { %v7820_v57 = vpop.f32.mrb[48].mxu0 }
 0x177   :  { %11144 = vst [vmem:[#allocation82_spill] sm:$0xff] %v7820_v57  ;;  %v2416_v31 = vmax.f32 %v11145_v0, %v7820_v57  ;;  %v7828_v30 = vpop.f32.mrb[49].mxu0 }
 0x178   :  { %11146 = vst [vmem:[#allocation83_spill] sm:$0xff] %v7828_v30  ;;  %v7830_v25 = vpop.f32.mrb[50].mxu0  ;;  %v7832_v36 = vpop.f32.mrb[48].mxu1 }
 0x179   :  { %11147 = vst [vmem:[#allocation84_spill] sm:$0xff] %v7830_v25  ;;  %11148 = vst [vmem:[#allocation85_spill] sm:$0xff] %v7832_v36  ;;  %v2417_v44 = vmax.f32 %v2416_v31, %v7828_v30  ;;  %v2433_v10 = vmax.f32 %v11149_v63, %v7830_v25  ;;  %v7839_v52 = vpop.f32.mrb[51].mxu0  ;;  %v7841_v4 = vpop.f32.mrb[49].mxu1 }
 0x17a   :  { %11150 = vst [vmem:[#allocation86_spill] sm:$0xff] %v7839_v52  ;;  %11151 = vst [vmem:[#allocation87_spill] sm:$0xff] %v7841_v4  ;;  %v7843_v17 = vpop.f32.mrb[50].mxu1 }
 0x17b   :  { %11152 = vst [vmem:[#allocation88_spill] sm:$0xff] %v7843_v17  ;;  %v7846_v13 = vmax.f32 %v2417_v44, %v7832_v36  ;;  %v2434_v0 = vmax.f32 %v2433_v10, %v7839_v52  ;;  %v7849_v57 = vpop.f32.mrb[51].mxu1  ;;  %v11155_v44 = vmax.f32 %v7603_v32, %v7600_v15 }
 0x17c   :  { %11153 = vst [vmem:[#allocation89_spill] sm:$0xff] %v7849_v57 }
 0x17d   :  { %v7854_v30 = vmax.f32 %v2434_v0, %v7843_v17  ;;  %v11159_v0 = vmax.f32 %v7614_v1, %v7609_v23 }
 0x17e   :  { %v7856_v34 = vpop.f32.mrb[52].mxu0 }
 0x17f   :  { %11154 = vst [vmem:[#allocation90_spill] sm:$0xff] %v7856_v34  ;;  %v2450_v25 = vmax.f32 %v11155_v44, %v7856_v34  ;;  %v7864_v36 = vpop.f32.mrb[53].mxu0 }
 0x180   :  { %11156 = vst [vmem:[#allocation91_spill] sm:$0xff] %v7864_v36  ;;  %v7866_v10 = vpop.f32.mrb[54].mxu0  ;;  %v7868_v52 = vpop.f32.mrb[52].mxu1 }
 0x181   :  { %11157 = vst [vmem:[#allocation92_spill] sm:$0xff] %v7866_v10  ;;  %11158 = vst [vmem:[#allocation93_spill] sm:$0xff] %v7868_v52  ;;  %v2451_v31 = vmax.f32 %v2450_v25, %v7864_v36  ;;  %v2467_v17 = vmax.f32 %v11159_v0, %v7866_v10  ;;  %v7875_v20 = vpop.f32.mrb[55].mxu0  ;;  %v7877_v63 = vpop.f32.mrb[53].mxu1 }
 0x182   :  { %11160 = vst [vmem:[#allocation94_spill] sm:$0xff] %v7875_v20  ;;  %11161 = vst [vmem:[#allocation95_spill] sm:$0xff] %v7877_v63  ;;  %v7879_v24 = vpop.f32.mrb[54].mxu1 }
 0x183   :  { %11162 = vst [vmem:[#allocation96_spill] sm:$0xff] %v7879_v24  ;;  %v7882_v32 = vmax.f32 %v2451_v31, %v7868_v52  ;;  %v2468_v44 = vmax.f32 %v2467_v17, %v7875_v20  ;;  %v7885_v34 = vpop.f32.mrb[55].mxu1  ;;  %v11165_v31 = vmax.f32 %v7633_v41, %v7630_v21 }
 0x184   :  { %11163 = vst [vmem:[#allocation97_spill] sm:$0xff] %v7885_v34 }
 0x185   :  { %v7890_v36 = vmax.f32 %v2468_v44, %v7879_v24  ;;  %v11169_v44 = vmax.f32 %v7644_v59, %v7639_v18 }
 0x186   :  { %v7892_v1 = vpop.f32.mrb[56].mxu0 }
 0x187   :  { %11164 = vst [vmem:[#allocation98_spill] sm:$0xff] %v7892_v1  ;;  %v2484_v10 = vmax.f32 %v11165_v31, %v7892_v1  ;;  %v7900_v52 = vpop.f32.mrb[57].mxu0 }
 0x188   :  { %11166 = vst [vmem:[#allocation99_spill] sm:$0xff] %v7900_v52  ;;  %v7902_v17 = vpop.f32.mrb[58].mxu0  ;;  %v7904_v20 = vpop.f32.mrb[56].mxu1 }
 0x189   :  { %11167 = vst [vmem:[#allocation100_spill] sm:$0xff] %v7902_v17  ;;  %11168 = vst [vmem:[#allocation101_spill] sm:$0xff] %v7904_v20  ;;  %v2485_v25 = vmax.f32 %v2484_v10, %v7900_v52  ;;  %v2501_v24 = vmax.f32 %v11169_v44, %v7902_v17  ;;  %v7911_v23 = vpop.f32.mrb[59].mxu0  ;;  %v7913_v0 = vpop.f32.mrb[57].mxu1 }
 0x18a   :  { %11170 = vst [vmem:[#allocation102_spill] sm:$0xff] %v7911_v23  ;;  %11171 = vst [vmem:[#allocation103_spill] sm:$0xff] %v7913_v0  ;;  %v7915_v15 = vpop.f32.mrb[58].mxu1 }
 0x18b   :  { %11172 = vst [vmem:[#allocation104_spill] sm:$0xff] %v7915_v15  ;;  %v7918_v41 = vmax.f32 %v2485_v25, %v7904_v20  ;;  %v2502_v31 = vmax.f32 %v2501_v24, %v7911_v23  ;;  %v7921_v1 = vpop.f32.mrb[59].mxu1  ;;  %v11175_v25 = vmax.f32 %v7663_v61, %v7660_v46 }
 0x18c   :  { %11173 = vst [vmem:[#allocation105_spill] sm:$0xff] %v7921_v1 }
 0x18d   :  { %v7926_v52 = vmax.f32 %v2502_v31, %v7915_v15  ;;  %v11179_v31 = vmax.f32 %v7674_v53, %v7669_v9 }
 0x18e   :  { %v7928_v59 = vpop.f32.mrb[60].mxu0 }
 0x18f   :  { %11174 = vst [vmem:[#allocation106_spill] sm:$0xff] %v7928_v59  ;;  %v2518_v17 = vmax.f32 %v11175_v25, %v7928_v59  ;;  %v7936_v20 = vpop.f32.mrb[61].mxu0 }
 0x190   :  { %11176 = vst [vmem:[#allocation107_spill] sm:$0xff] %v7936_v20  ;;  %v7938_v24 = vpop.f32.mrb[62].mxu0  ;;  %v7940_v23 = vpop.f32.mrb[60].mxu1 }
 0x191   :  { %11177 = vst [vmem:[#allocation108_spill] sm:$0xff] %v7938_v24  ;;  %11178 = vst [vmem:[#allocation109_spill] sm:$0xff] %v7940_v23  ;;  %v2519_v10 = vmax.f32 %v2518_v17, %v7936_v20  ;;  %v2535_v15 = vmax.f32 %v11179_v31, %v7938_v24  ;;  %v7947_v18 = vpop.f32.mrb[63].mxu0  ;;  %v7949_v44 = vpop.f32.mrb[61].mxu1 }
 0x192   :  { %11180 = vst [vmem:[#allocation110_spill] sm:$0xff] %v7947_v18  ;;  %11181 = vst [vmem:[#allocation111_spill] sm:$0xff] %v7949_v44  ;;  %v7951_v21 = vpop.f32.mrb[62].mxu1 }
 0x193   :  { %11182 = vst [vmem:[#allocation112_spill] sm:$0xff] %v7951_v21  ;;  %v7954_v61 = vmax.f32 %v2519_v10, %v7940_v23  ;;  %v2536_v25 = vmax.f32 %v2535_v15, %v7947_v18  ;;  %v7957_v59 = vpop.f32.mrb[63].mxu1  ;;  %v11184_v10 = vmax.f32 %v7702_v54, %v7697_v42 }
 0x194   :  { %11183 = vst [vmem:[#allocation113_spill] sm:$0xff] %v7957_v59 }
 0x195   :  { %v7962_v20 = vmax.f32 %v2536_v25, %v7951_v21  ;;  %v11186_v25 = vmax.f32 %v7710_v40, %v7705_v39 }
 0x196   :  { %v7964_v53 = vpop.f32.mrb[64].mxu0 }
 0x197   :  { %v2284_v24 = vmax.f32 %v11184_v10, %v7964_v53  ;;  %v7972_v23 = vpop.f32.mrb[65].mxu0 }
 0x198   :  { %v7974_v15 = vpop.f32.mrb[66].mxu0  ;;  %v7976_v18 = vpop.f32.mrb[64].mxu1 }
 0x199   :  { %11185 = vst [vmem:[#allocation114_spill] sm:$0xff] %v7974_v15  ;;  %v2285_v17 = vmax.f32 %v2284_v24, %v7972_v23  ;;  %v2301_v21 = vmax.f32 %v11186_v25, %v7974_v15  ;;  %v7983_v9 = vpop.f32.mrb[67].mxu0  ;;  %v7985_v31 = vpop.f32.mrb[65].mxu1 }
 0x19a   :  { %11187 = vst [vmem:[#allocation115_spill] sm:$0xff] %v7983_v9  ;;  %v7987_v46 = vpop.f32.mrb[66].mxu1 }
 0x19b   :  { %11188 = vst [vmem:[#allocation116_spill] sm:$0xff] %v7987_v46  ;;  %v7990_v54 = vmax.f32 %v2285_v17, %v7976_v18  ;;  %v2302_v10 = vmax.f32 %v2301_v21, %v7983_v9  ;;  %v7993_v26 = vpop.f32.mrb[67].mxu1  ;;  %v11191_v17 = vmax.f32 %v7738_v14, %v7733_v6 }
 0x19c   :  { %11189 = vst [vmem:[#allocation117_spill] sm:$0xff] %v7993_v26 }
 0x19d   :  { %v7998_v16 = vmax.f32 %v2302_v10, %v7987_v46  ;;  %v11195_v10 = vmax.f32 %v7746_v35, %v7741_v62 }
 0x19e   :  { %v8000_v40 = vpop.f32.mrb[68].mxu0 }
 0x19f   :  { %11190 = vst [vmem:[#allocation118_spill] sm:$0xff] %v8000_v40  ;;  %v2318_v15 = vmax.f32 %v11191_v17, %v8000_v40  ;;  %v8008_v39 = vpop.f32.mrb[69].mxu0 }
 0x1a0   :  { %11192 = vst [vmem:[#allocation119_spill] sm:$0xff] %v8008_v39  ;;  %v8010_v21 = vpop.f32.mrb[70].mxu0  ;;  %v8012_v9 = vpop.f32.mrb[68].mxu1 }
 0x1a1   :  { %11193 = vst [vmem:[#allocation120_spill] sm:$0xff] %v8010_v21  ;;  %11194 = vst [vmem:[#allocation121_spill] sm:$0xff] %v8012_v9  ;;  %v2319_v24 = vmax.f32 %v2318_v15, %v8008_v39  ;;  %v2335_v46 = vmax.f32 %v11195_v10, %v8010_v21  ;;  %v8019_v7 = vpop.f32.mrb[71].mxu0  ;;  %v8021_v25 = vpop.f32.mrb[69].mxu1 }
 0x1a2   :  { %11196 = vst [vmem:[#allocation122_spill] sm:$0xff] %v8019_v7  ;;  %11197 = vst [vmem:[#allocation123_spill] sm:$0xff] %v8021_v25  ;;  %v8023_v19 = vpop.f32.mrb[70].mxu1 }
 0x1a3   :  { %11198 = vst [vmem:[#allocation124_spill] sm:$0xff] %v8023_v19  ;;  %v8026_v14 = vmax.f32 %v2319_v24, %v8012_v9  ;;  %v2336_v17 = vmax.f32 %v2335_v46, %v8019_v7  ;;  %v8029_v40 = vpop.f32.mrb[71].mxu1  ;;  %v11200_v24 = vmax.f32 %v7774_v33, %v7769_v27 }
 0x1a5   :  { %v8034_v39 = vmax.f32 %v2336_v17, %v8023_v19  ;;  %v11204_v17 = vmax.f32 %v7782_v37, %v7777_v22 }
 0x1a6   :  { %v8036_v35 = vpop.f32.mrb[72].mxu0 }
 0x1a7   :  { %11199 = vst [vmem:[#allocation125_spill] sm:$0xff] %v8036_v35  ;;  %v2352_v21 = vmax.f32 %v11200_v24, %v8036_v35  ;;  %v8044_v62 = vpop.f32.mrb[73].mxu0 }
 0x1a8   :  { %11201 = vst [vmem:[#allocation126_spill] sm:$0xff] %v8044_v62  ;;  %v8046_v46 = vpop.f32.mrb[74].mxu0  ;;  %v8048_v7 = vpop.f32.mrb[72].mxu1 }
 0x1a9   :  { %11202 = vst [vmem:[#allocation127_spill] sm:$0xff] %v8046_v46  ;;  %11203 = vst [vmem:[#allocation128_spill] sm:$0xff] %v8048_v7  ;;  %v2353_v15 = vmax.f32 %v2352_v21, %v8044_v62  ;;  %v2369_v19 = vmax.f32 %v11204_v17, %v8046_v46  ;;  %v8055_v6 = vpop.f32.mrb[75].mxu0  ;;  %v8057_v10 = vpop.f32.mrb[73].mxu1 }
 0x1aa   :  { %11205 = vst [vmem:[#allocation129_spill] sm:$0xff] %v8055_v6  ;;  %11206 = vst [vmem:[#allocation130_spill] sm:$0xff] %v8057_v10  ;;  %v8059_v9 = vpop.f32.mrb[74].mxu1 }
 0x1ab   :  { %11207 = vst [vmem:[#allocation131_spill] sm:$0xff] %v8059_v9  ;;  %v8062_v33 = vmax.f32 %v2353_v15, %v8048_v7  ;;  %v2370_v24 = vmax.f32 %v2369_v19, %v8055_v6  ;;  %v8065_v35 = vpop.f32.mrb[75].mxu1  ;;  %v11209_v15 = vmax.f32 %v7810_v60, %v7805_v3 }
 0x1ad   :  { %v8070_v62 = vmax.f32 %v2370_v24, %v8059_v9  ;;  %v11213_v24 = vmax.f32 %v7818_v29, %v7813_v38 }
 0x1ae   :  { %v8072_v37 = vpop.f32.mrb[76].mxu0 }
 0x1af   :  { %11208 = vst [vmem:[#allocation132_spill] sm:$0xff] %v8072_v37  ;;  %v2386_v46 = vmax.f32 %v11209_v15, %v8072_v37  ;;  %v8080_v22 = vpop.f32.mrb[77].mxu0 }
 0x1b0   :  { %11210 = vst [vmem:[#allocation133_spill] sm:$0xff] %v8080_v22  ;;  %v8082_v19 = vpop.f32.mrb[78].mxu0  ;;  %v8084_v6 = vpop.f32.mrb[76].mxu1 }
 0x1b1   :  { %11211 = vst [vmem:[#allocation134_spill] sm:$0xff] %v8082_v19  ;;  %11212 = vst [vmem:[#allocation135_spill] sm:$0xff] %v8084_v6  ;;  %v2387_v21 = vmax.f32 %v2386_v46, %v8080_v22  ;;  %v2403_v9 = vmax.f32 %v11213_v24, %v8082_v19  ;;  %v8091_v7 = vpop.f32.mrb[79].mxu0  ;;  %v8093_v17 = vpop.f32.mrb[77].mxu1 }
 0x1b2   :  { %11214 = vst [vmem:[#allocation136_spill] sm:$0xff] %v8091_v7  ;;  %11215 = vst [vmem:[#allocation137_spill] sm:$0xff] %v8093_v17  ;;  %v8095_v27 = vpop.f32.mrb[78].mxu1 }
 0x1b3   :  { %11216 = vst [vmem:[#allocation138_spill] sm:$0xff] %v8095_v27  ;;  %v8098_v60 = vmax.f32 %v2387_v21, %v8084_v6  ;;  %v2404_v15 = vmax.f32 %v2403_v9, %v8091_v7  ;;  %v8101_v37 = vpop.f32.mrb[79].mxu1  ;;  %v11219_v21 = vmax.f32 %v7846_v13, %v7841_v4 }
 0x1b4   :  { %11217 = vst [vmem:[#allocation139_spill] sm:$0xff] %v8101_v37 }
 0x1b5   :  { %v8106_v22 = vmax.f32 %v2404_v15, %v8095_v27  ;;  %v11223_v15 = vmax.f32 %v7854_v30, %v7849_v57 }
 0x1b6   :  { %v8108_v29 = vpop.f32.mrb[80].mxu0 }
 0x1b7   :  { %11218 = vst [vmem:[#allocation140_spill] sm:$0xff] %v8108_v29  ;;  %v2420_v19 = vmax.f32 %v11219_v21, %v8108_v29  ;;  %v8116_v38 = vpop.f32.mrb[81].mxu0 }
 0x1b8   :  { %11220 = vst [vmem:[#allocation141_spill] sm:$0xff] %v8116_v38  ;;  %v8118_v9 = vpop.f32.mrb[82].mxu0  ;;  %v8120_v7 = vpop.f32.mrb[80].mxu1 }
 0x1b9   :  { %11221 = vst [vmem:[#allocation142_spill] sm:$0xff] %v8118_v9  ;;  %11222 = vst [vmem:[#allocation143_spill] sm:$0xff] %v8120_v7  ;;  %v2421_v46 = vmax.f32 %v2420_v19, %v8116_v38  ;;  %v2437_v27 = vmax.f32 %v11223_v15, %v8118_v9  ;;  %v8127_v6 = vpop.f32.mrb[83].mxu0  ;;  %v8129_v24 = vpop.f32.mrb[81].mxu1 }
 0x1ba   :  { %11224 = vst [vmem:[#allocation144_spill] sm:$0xff] %v8127_v6  ;;  %11225 = vst [vmem:[#allocation145_spill] sm:$0xff] %v8129_v24  ;;  %v8131_v3 = vpop.f32.mrb[82].mxu1 }
 0x1bb   :  { %11226 = vst [vmem:[#allocation146_spill] sm:$0xff] %v8131_v3  ;;  %v8134_v13 = vmax.f32 %v2421_v46, %v8120_v7  ;;  %v2438_v21 = vmax.f32 %v2437_v27, %v8127_v6  ;;  %v8137_v29 = vpop.f32.mrb[83].mxu1  ;;  %v11229_v46 = vmax.f32 %v7882_v32, %v7877_v63 }
 0x1bc   :  { %11227 = vst [vmem:[#allocation147_spill] sm:$0xff] %v8137_v29 }
 0x1bd   :  { %v8142_v38 = vmax.f32 %v2438_v21, %v8131_v3  ;;  %v11233_v21 = vmax.f32 %v7890_v36, %v7885_v34 }
 0x1be   :  { %v8144_v30 = vpop.f32.mrb[84].mxu0 }
 0x1bf   :  { %11228 = vst [vmem:[#allocation148_spill] sm:$0xff] %v8144_v30  ;;  %v2454_v9 = vmax.f32 %v11229_v46, %v8144_v30  ;;  %v8152_v57 = vpop.f32.mrb[85].mxu0 }
 0x1c0   :  { %11230 = vst [vmem:[#allocation149_spill] sm:$0xff] %v8152_v57  ;;  %v8154_v27 = vpop.f32.mrb[86].mxu0  ;;  %v8156_v6 = vpop.f32.mrb[84].mxu1 }
 0x1c1   :  { %11231 = vst [vmem:[#allocation150_spill] sm:$0xff] %v8154_v27  ;;  %11232 = vst [vmem:[#allocation151_spill] sm:$0xff] %v8156_v6  ;;  %v2455_v19 = vmax.f32 %v2454_v9, %v8152_v57  ;;  %v2471_v3 = vmax.f32 %v11233_v21, %v8154_v27  ;;  %v8163_v7 = vpop.f32.mrb[87].mxu0  ;;  %v8165_v15 = vpop.f32.mrb[85].mxu1 }
 0x1c2   :  { %11234 = vst [vmem:[#allocation152_spill] sm:$0xff] %v8163_v7  ;;  %11235 = vst [vmem:[#allocation153_spill] sm:$0xff] %v8165_v15  ;;  %v8167_v4 = vpop.f32.mrb[86].mxu1 }
 0x1c3   :  { %11236 = vst [vmem:[#allocation154_spill] sm:$0xff] %v8167_v4  ;;  %v8170_v32 = vmax.f32 %v2455_v19, %v8156_v6  ;;  %v2472_v46 = vmax.f32 %v2471_v3, %v8163_v7  ;;  %v8173_v30 = vpop.f32.mrb[87].mxu1  ;;  %v11239_v19 = vmax.f32 %v7918_v41, %v7913_v0 }
 0x1c4   :  { %11237 = vst [vmem:[#allocation155_spill] sm:$0xff] %v8173_v30 }
 0x1c5   :  { %v8178_v57 = vmax.f32 %v2472_v46, %v8167_v4  ;;  %v11243_v46 = vmax.f32 %v7926_v52, %v7921_v1 }
 0x1c6   :  { %v8180_v36 = vpop.f32.mrb[88].mxu0 }
 0x1c7   :  { %11238 = vst [vmem:[#allocation156_spill] sm:$0xff] %v8180_v36  ;;  %v2488_v27 = vmax.f32 %v11239_v19, %v8180_v36  ;;  %v8188_v34 = vpop.f32.mrb[89].mxu0 }
 0x1c8   :  { %11240 = vst [vmem:[#allocation157_spill] sm:$0xff] %v8188_v34  ;;  %v8190_v3 = vpop.f32.mrb[90].mxu0  ;;  %v8192_v7 = vpop.f32.mrb[88].mxu1 }
 0x1c9   :  { %11241 = vst [vmem:[#allocation158_spill] sm:$0xff] %v8190_v3  ;;  %11242 = vst [vmem:[#allocation159_spill] sm:$0xff] %v8192_v7  ;;  %v2489_v9 = vmax.f32 %v2488_v27, %v8188_v34  ;;  %v2505_v4 = vmax.f32 %v11243_v46, %v8190_v3  ;;  %v8199_v6 = vpop.f32.mrb[91].mxu0  ;;  %v8201_v21 = vpop.f32.mrb[89].mxu1 }
 0x1ca   :  { %11244 = vst [vmem:[#allocation160_spill] sm:$0xff] %v8199_v6  ;;  %11245 = vst [vmem:[#allocation161_spill] sm:$0xff] %v8201_v21  ;;  %v8203_v63 = vpop.f32.mrb[90].mxu1 }
 0x1cb   :  { %11246 = vst [vmem:[#allocation162_spill] sm:$0xff] %v8203_v63  ;;  %v8206_v41 = vmax.f32 %v2489_v9, %v8192_v7  ;;  %v2506_v19 = vmax.f32 %v2505_v4, %v8199_v6  ;;  %v8209_v36 = vpop.f32.mrb[91].mxu1  ;;  %v11249_v9 = vmax.f32 %v7954_v61, %v7949_v44 }
 0x1cc   :  { %11247 = vst [vmem:[#allocation163_spill] sm:$0xff] %v8209_v36 }
 0x1cd   :  { %v8214_v34 = vmax.f32 %v2506_v19, %v8203_v63  ;;  %v11253_v19 = vmax.f32 %v7962_v20, %v7957_v59 }
 0x1ce   :  { %v8216_v52 = vpop.f32.mrb[92].mxu0 }
 0x1cf   :  { %11248 = vst [vmem:[#allocation164_spill] sm:$0xff] %v8216_v52  ;;  %v2522_v3 = vmax.f32 %v11249_v9, %v8216_v52  ;;  %v8224_v1 = vpop.f32.mrb[93].mxu0 }
 0x1d0   :  { %11250 = vst [vmem:[#allocation165_spill] sm:$0xff] %v8224_v1  ;;  %v8226_v4 = vpop.f32.mrb[94].mxu0  ;;  %v8228_v6 = vpop.f32.mrb[92].mxu1 }
 0x1d1   :  { %11251 = vst [vmem:[#allocation166_spill] sm:$0xff] %v8226_v4  ;;  %11252 = vst [vmem:[#allocation167_spill] sm:$0xff] %v8228_v6  ;;  %v2523_v27 = vmax.f32 %v2522_v3, %v8224_v1  ;;  %v2539_v63 = vmax.f32 %v11253_v19, %v8226_v4  ;;  %v8235_v7 = vpop.f32.mrb[95].mxu0  ;;  %v8237_v46 = vpop.f32.mrb[93].mxu1 }
 0x1d2   :  { %11254 = vst [vmem:[#allocation168_spill] sm:$0xff] %v8235_v7  ;;  %11255 = vst [vmem:[#allocation169_spill] sm:$0xff] %v8237_v46  ;;  %v8239_v0 = vpop.f32.mrb[94].mxu1 }
 0x1d3   :  { %11256 = vst [vmem:[#allocation170_spill] sm:$0xff] %v8239_v0  ;;  %v8242_v61 = vmax.f32 %v2523_v27, %v8228_v6  ;;  %v2540_v9 = vmax.f32 %v2539_v63, %v8235_v7  ;;  %v8245_v52 = vpop.f32.mrb[95].mxu1  ;;  %v11259_v27 = vmax.f32 %v7990_v54, %v7985_v31 }
 0x1d4   :  { %11257 = vst [vmem:[#allocation171_spill] sm:$0xff] %v8245_v52 }
 0x1d5   :  { %v8250_v1 = vmax.f32 %v2540_v9, %v8239_v0  ;;  %v11262_v9 = vmax.f32 %v7998_v16, %v7993_v26  ;;  %v11266_v16 = vmax.f32 %v8026_v14, %v8021_v25 }
 0x1d6   :  { %v8252_v20 = vpop.f32.mrb[96].mxu0 }
 0x1d7   :  { %11258 = vst [vmem:[#allocation172_spill] sm:$0xff] %v8252_v20  ;;  %v2288_v4 = vmax.f32 %v11259_v27, %v8252_v20  ;;  %v8260_v59 = vpop.f32.mrb[97].mxu0 }
 0x1d8   :  { %11260 = vst [vmem:[#allocation173_spill] sm:$0xff] %v8260_v59  ;;  %v8262_v63 = vpop.f32.mrb[98].mxu0  ;;  %v8264_v7 = vpop.f32.mrb[96].mxu1 }
 0x1d9   :  { %11261 = vst [vmem:[#allocation174_spill] sm:$0xff] %v8262_v63  ;;  %v2289_v3 = vmax.f32 %v2288_v4, %v8260_v59  ;;  %v2305_v0 = vmax.f32 %v11262_v9, %v8262_v63  ;;  %v8271_v6 = vpop.f32.mrb[99].mxu0  ;;  %v8273_v19 = vpop.f32.mrb[97].mxu1 }
 0x1da   :  { %11263 = vst [vmem:[#allocation175_spill] sm:$0xff] %v8271_v6  ;;  %v8275_v44 = vpop.f32.mrb[98].mxu1 }
 0x1db   :  { %11264 = vst [vmem:[#allocation176_spill] sm:$0xff] %v8275_v44  ;;  %v2290_v54 = vmax.f32 %v2289_v3, %v8264_v7  ;;  %v2306_v27 = vmax.f32 %v2305_v0, %v8271_v6  ;;  %v8279_v11 = vpop.f32.mrb[99].mxu1 }
 0x1dd   :  { %v2307_v20 = vmax.f32 %v2306_v27, %v8275_v44  ;;  %v2291_v4 = vmax.f32 %v2290_v54, %v8273_v19  ;;  %v11269_v54 = vmax.f32 %v8034_v39, %v8029_v40  ;;  %v11273_v39 = vmax.f32 %v8062_v33, %v8057_v10 }
 0x1de   :  { %v8283_v59 = vpop.f32.mrb[100].mxu0 }
 0x1df   :  { %11265 = vst [vmem:[#allocation177_spill] sm:$0xff] %v8283_v59  ;;  %v2322_v9 = vmax.f32 %v11266_v16, %v8283_v59  ;;  %2292 = vmax.xlane.f32.xlu0 %v2291_v4  ;;  %v8289_v63 = vpop.f32.mrb[101].mxu0  ;;  %v2308_v3 = vmax.f32 %v2307_v20, %v8279_v11 }
 0x1e0   :  { %11267 = vst [vmem:[#allocation178_spill] sm:$0xff] %v8289_v63  ;;  %v8292_v26 = vpop.f32.mrb[102].mxu0  ;;  %v8294_v0 = vpop.f32.mrb[100].mxu1 }
 0x1e1   :  { %11268 = vst [vmem:[#allocation179_spill] sm:$0xff] %v8292_v26  ;;  %v2323_v27 = vmax.f32 %v2322_v9, %v8289_v63  ;;  %v2339_v44 = vmax.f32 %v11269_v54, %v8292_v26  ;;  %v8301_v6 = vpop.f32.mrb[103].mxu0  ;;  %v8303_v14 = vpop.f32.mrb[101].mxu1 }
 0x1e2   :  { %11270 = vst [vmem:[#allocation180_spill] sm:$0xff] %v8301_v6  ;;  %v8305_v4 = vpop.f32.mrb[102].mxu1 }
 0x1e3   :  { %11271 = vst [vmem:[#allocation181_spill] sm:$0xff] %v8305_v4  ;;  %v2324_v16 = vmax.f32 %v2323_v27, %v8294_v0  ;;  %v2340_v20 = vmax.f32 %v2339_v44, %v8301_v6  ;;  %v8309_v59 = vpop.f32.mrb[103].mxu1  ;;  %2309 = vmax.xlane.f32.xlu0 %v2308_v3 }
 0x1e5   :  { %v2341_v9 = vmax.f32 %v2340_v20, %v8305_v4  ;;  %v2325_v63 = vmax.f32 %v2324_v16, %v8303_v14  ;;  %v11276_v16 = vmax.f32 %v8070_v62, %v8065_v35  ;;  %v11280_v62 = vmax.f32 %v8098_v60, %v8093_v17 }
 0x1e6   :  { %v8313_v25 = vpop.f32.mrb[104].mxu0 }
 0x1e7   :  { %11272 = vst [vmem:[#allocation182_spill] sm:$0xff] %v8313_v25  ;;  %v2356_v54 = vmax.f32 %v11273_v39, %v8313_v25  ;;  %2326 = vmax.xlane.f32.xlu1 %v2325_v63  ;;  %v8319_v26 = vpop.f32.mrb[105].mxu0  ;;  %v2342_v27 = vmax.f32 %v2341_v9, %v8309_v59 }
 0x1e8   :  { %11274 = vst [vmem:[#allocation183_spill] sm:$0xff] %v8319_v26  ;;  %v8322_v44 = vpop.f32.mrb[106].mxu0  ;;  %v8324_v6 = vpop.f32.mrb[104].mxu1 }
 0x1e9   :  { %11275 = vst [vmem:[#allocation184_spill] sm:$0xff] %v8322_v44  ;;  %v2357_v3 = vmax.f32 %v2356_v54, %v8319_v26  ;;  %v2373_v20 = vmax.f32 %v11276_v16, %v8322_v44  ;;  %v8331_v4 = vpop.f32.mrb[107].mxu0  ;;  %v8333_v33 = vpop.f32.mrb[105].mxu1 }
 0x1ea   :  { %11277 = vst [vmem:[#allocation185_spill] sm:$0xff] %v8331_v4  ;;  %v8335_v63 = vpop.f32.mrb[106].mxu1 }
 0x1eb   :  { %11278 = vst [vmem:[#allocation186_spill] sm:$0xff] %v8335_v63  ;;  %v2374_v39 = vmax.f32 %v2373_v20, %v8331_v4  ;;  %v2358_v9 = vmax.f32 %v2357_v3, %v8324_v6  ;;  %2343 = vmax.xlane.f32.xlu1 %v2342_v27  ;;  %v8339_v25 = vpop.f32.mrb[107].mxu1 }
 0x1ed   :  { %v2375_v54 = vmax.f32 %v2374_v39, %v8335_v63  ;;  %v2359_v26 = vmax.f32 %v2358_v9, %v8333_v33  ;;  %v11284_v9 = vmax.f32 %v8106_v22, %v8101_v37  ;;  %v11290_v22 = vmax.f32 %v8134_v13, %v8129_v24 }
 0x1ee   :  { %v8343_v10 = vpop.f32.mrb[108].mxu0 }
 0x1ef   :  { %11279 = vst [vmem:[#allocation187_spill] sm:$0xff] %v8343_v10  ;;  %v2390_v16 = vmax.f32 %v11280_v62, %v8343_v10  ;;  %2360 = vmax.xlane.f32.xlu0 %v2359_v26  ;;  %v8349_v44 = vpop.f32.mrb[109].mxu0  ;;  %v2376_v20 = vmax.f32 %v2375_v54, %v8339_v25 }
 0x1f0   :  { %11281 = vst [vmem:[#allocation188_spill] sm:$0xff] %v8349_v44  ;;  %v8352_v3 = vpop.f32.mrb[110].mxu0  ;;  %v8354_v27 = vpop.f32.mrb[108].mxu1 }
 0x1f1   :  { %11282 = vst [vmem:[#allocation189_spill] sm:$0xff] %v8352_v3  ;;  %11283 = vst [vmem:[#allocation190_spill] sm:$0xff] %v8354_v27  ;;  %v2391_v39 = vmax.f32 %v2390_v16, %v8349_v44  ;;  %v2407_v63 = vmax.f32 %v11284_v9, %v8352_v3  ;;  %2377 = vmax.xlane.f32.xlu1 %v2376_v20  ;;  %v8361_v4 = vpop.f32.mrb[111].mxu0  ;;  %v8363_v60 = vpop.f32.mrb[109].mxu1 }
 0x1f2   :  { %11285 = vst [vmem:[#allocation191_spill] sm:$0xff] %v8361_v4  ;;  %11286 = vst [vmem:[#allocation192_spill] sm:$0xff] %v8363_v60  ;;  %v8365_v26 = vpop.f32.mrb[110].mxu1 }
 0x1f3   :  { %11287 = vst [vmem:[#allocation193_spill] sm:$0xff] %v8365_v26  ;;  %v2408_v54 = vmax.f32 %v2407_v63, %v8361_v4  ;;  %v2392_v62 = vmax.f32 %v2391_v39, %v8354_v27  ;;  %v8369_v10 = vpop.f32.mrb[111].mxu1 }
 0x1f4   :  { %11288 = vst [vmem:[#allocation194_spill] sm:$0xff] %v8369_v10 }
 0x1f5   :  { %v2409_v16 = vmax.f32 %v2408_v54, %v8365_v26  ;;  %v2393_v44 = vmax.f32 %v2392_v62, %v8363_v60  ;;  %v11294_v62 = vmax.f32 %v8142_v38, %v8137_v29  ;;  %v11300_v38 = vmax.f32 %v8170_v32, %v8165_v15 }
 0x1f6   :  { %v8373_v17 = vpop.f32.mrb[112].mxu0 }
 0x1f7   :  { %11289 = vst [vmem:[#allocation195_spill] sm:$0xff] %v8373_v17  ;;  %v2424_v20 = vmax.f32 %v11290_v22, %v8373_v17  ;;  %2394 = vmax.xlane.f32.xlu0 %v2393_v44  ;;  %v8379_v9 = vpop.f32.mrb[113].mxu0  ;;  %v2410_v63 = vmax.f32 %v2409_v16, %v8369_v10 }
 0x1f8   :  { %11291 = vst [vmem:[#allocation196_spill] sm:$0xff] %v8379_v9  ;;  %v8382_v4 = vpop.f32.mrb[114].mxu0  ;;  %v8384_v39 = vpop.f32.mrb[112].mxu1 }
 0x1f9   :  { %11292 = vst [vmem:[#allocation197_spill] sm:$0xff] %v8382_v4  ;;  %11293 = vst [vmem:[#allocation198_spill] sm:$0xff] %v8384_v39  ;;  %v2425_v54 = vmax.f32 %v2424_v20, %v8379_v9  ;;  %v2441_v26 = vmax.f32 %v11294_v62, %v8382_v4  ;;  %2411 = vmax.xlane.f32.xlu1 %v2410_v63  ;;  %v8391_v3 = vpop.f32.mrb[115].mxu0  ;;  %v8393_v13 = vpop.f32.mrb[113].mxu1 }
 0x1fa   :  { %11295 = vst [vmem:[#allocation199_spill] sm:$0xff] %v8391_v3  ;;  %11296 = vst [vmem:[#allocation200_spill] sm:$0xff] %v8393_v13  ;;  %v8395_v44 = vpop.f32.mrb[114].mxu1 }
 0x1fb   :  { %11297 = vst [vmem:[#allocation201_spill] sm:$0xff] %v8395_v44  ;;  %v2442_v16 = vmax.f32 %v2441_v26, %v8391_v3  ;;  %v2426_v22 = vmax.f32 %v2425_v54, %v8384_v39  ;;  %v8399_v17 = vpop.f32.mrb[115].mxu1 }
 0x1fc   :  { %11298 = vst [vmem:[#allocation202_spill] sm:$0xff] %v8399_v17 }
 0x1fd   :  { %v2443_v20 = vmax.f32 %v2442_v16, %v8395_v44  ;;  %v2427_v9 = vmax.f32 %v2426_v22, %v8393_v13  ;;  %v11304_v22 = vmax.f32 %v8178_v57, %v8173_v30  ;;  %v11310_v57 = vmax.f32 %v8206_v41, %v8201_v21 }
 0x1fe   :  { %v8403_v24 = vpop.f32.mrb[116].mxu0 }
 0x1ff   :  { %11299 = vst [vmem:[#allocation203_spill] sm:$0xff] %v8403_v24  ;;  %v2458_v63 = vmax.f32 %v11300_v38, %v8403_v24  ;;  %2428 = vmax.xlane.f32.xlu0 %v2427_v9  ;;  %v8409_v62 = vpop.f32.mrb[117].mxu0  ;;  %v2444_v26 = vmax.f32 %v2443_v20, %v8399_v17 }
 0x200   :  { %11301 = vst [vmem:[#allocation204_spill] sm:$0xff] %v8409_v62  ;;  %v8412_v3 = vpop.f32.mrb[118].mxu0  ;;  %v8414_v54 = vpop.f32.mrb[116].mxu1 }
 0x201   :  { %11302 = vst [vmem:[#allocation205_spill] sm:$0xff] %v8412_v3  ;;  %11303 = vst [vmem:[#allocation206_spill] sm:$0xff] %v8414_v54  ;;  %v2459_v16 = vmax.f32 %v2458_v63, %v8409_v62  ;;  %v2475_v44 = vmax.f32 %v11304_v22, %v8412_v3  ;;  %2445 = vmax.xlane.f32.xlu1 %v2444_v26  ;;  %v8421_v4 = vpop.f32.mrb[119].mxu0  ;;  %v8423_v32 = vpop.f32.mrb[117].mxu1 }
 0x202   :  { %11305 = vst [vmem:[#allocation207_spill] sm:$0xff] %v8421_v4  ;;  %11306 = vst [vmem:[#allocation208_spill] sm:$0xff] %v8423_v32  ;;  %v8425_v9 = vpop.f32.mrb[118].mxu1 }
 0x203   :  { %11307 = vst [vmem:[#allocation209_spill] sm:$0xff] %v8425_v9  ;;  %v2476_v20 = vmax.f32 %v2475_v44, %v8421_v4  ;;  %v2460_v38 = vmax.f32 %v2459_v16, %v8414_v54  ;;  %v8429_v24 = vpop.f32.mrb[119].mxu1  ;;  %v11350_v54 = vld [vmem:[#allocation21_spill] sm:$0xff] }
 0x204   :  { %11308 = vst [vmem:[#allocation210_spill] sm:$0xff] %v8429_v24 }
 0x205   :  { %v2477_v63 = vmax.f32 %v2476_v20, %v8425_v9  ;;  %v2461_v62 = vmax.f32 %v2460_v38, %v8423_v32  ;;  %v11314_v38 = vmax.f32 %v8214_v34, %v8209_v36  ;;  %v11320_v34 = vmax.f32 %v8242_v61, %v8237_v46 }
 0x206   :  { %v8433_v15 = vpop.f32.mrb[120].mxu0 }
 0x207   :  { %11309 = vst [vmem:[#allocation211_spill] sm:$0xff] %v8433_v15  ;;  %v2492_v26 = vmax.f32 %v11310_v57, %v8433_v15  ;;  %2462 = vmax.xlane.f32.xlu0 %v2461_v62  ;;  %v8439_v22 = vpop.f32.mrb[121].mxu0  ;;  %v2478_v44 = vmax.f32 %v2477_v63, %v8429_v24 }
 0x208   :  { %11311 = vst [vmem:[#allocation212_spill] sm:$0xff] %v8439_v22  ;;  %v8442_v4 = vpop.f32.mrb[122].mxu0  ;;  %v8444_v16 = vpop.f32.mrb[120].mxu1 }
 0x209   :  { %11312 = vst [vmem:[#allocation213_spill] sm:$0xff] %v8442_v4  ;;  %11313 = vst [vmem:[#allocation214_spill] sm:$0xff] %v8444_v16  ;;  %v2493_v20 = vmax.f32 %v2492_v26, %v8439_v22  ;;  %v2509_v9 = vmax.f32 %v11314_v38, %v8442_v4  ;;  %2479 = vmax.xlane.f32.xlu1 %v2478_v44  ;;  %v8451_v3 = vpop.f32.mrb[123].mxu0  ;;  %v8453_v41 = vpop.f32.mrb[121].mxu1 }
 0x20a   :  { %11315 = vst [vmem:[#allocation215_spill] sm:$0xff] %v8451_v3  ;;  %11316 = vst [vmem:[#allocation216_spill] sm:$0xff] %v8453_v41  ;;  %v8455_v62 = vpop.f32.mrb[122].mxu1 }
 0x20b   :  { %11317 = vst [vmem:[#allocation217_spill] sm:$0xff] %v8455_v62  ;;  %v2510_v63 = vmax.f32 %v2509_v9, %v8451_v3  ;;  %v2494_v57 = vmax.f32 %v2493_v20, %v8444_v16  ;;  %v8459_v15 = vpop.f32.mrb[123].mxu1  ;;  %v11342_v16 = vld [vmem:[#allocation12_spill] sm:$0xff] }
 0x20c   :  { %11318 = vst [vmem:[#allocation218_spill] sm:$0xff] %v8459_v15 }
 0x20d   :  { %v2511_v26 = vmax.f32 %v2510_v63, %v8455_v62  ;;  %v2495_v22 = vmax.f32 %v2494_v57, %v8453_v41  ;;  %v11324_v57 = vmax.f32 %v8250_v1, %v8245_v52 }
 0x20e   :  { %v8463_v21 = vpop.f32.mrb[124].mxu0 }
 0x20f   :  { %11319 = vst [vmem:[#allocation219_spill] sm:$0xff] %v8463_v21  ;;  %v2526_v44 = vmax.f32 %v11320_v34, %v8463_v21  ;;  %2496 = vmax.xlane.f32.xlu0 %v2495_v22  ;;  %v8469_v38 = vpop.f32.mrb[125].mxu0  ;;  %v2512_v9 = vmax.f32 %v2511_v26, %v8459_v15 }
 0x210   :  { %11321 = vst [vmem:[#allocation220_spill] sm:$0xff] %v8469_v38  ;;  %v8472_v3 = vpop.f32.mrb[126].mxu0  ;;  %v8474_v20 = vpop.f32.mrb[124].mxu1 }
 0x211   :  { %11322 = vst [vmem:[#allocation221_spill] sm:$0xff] %v8472_v3  ;;  %11323 = vst [vmem:[#allocation222_spill] sm:$0xff] %v8474_v20  ;;  %v2527_v63 = vmax.f32 %v2526_v44, %v8469_v38  ;;  %v2543_v62 = vmax.f32 %v11324_v57, %v8472_v3  ;;  %2513 = vmax.xlane.f32.xlu1 %v2512_v9  ;;  %v8481_v4 = vpop.f32.mrb[127].mxu0  ;;  %v8483_v61 = vpop.f32.mrb[125].mxu1 }
 0x212   :  { %11325 = vst [vmem:[#allocation223_spill] sm:$0xff] %v8481_v4  ;;  %11326 = vst [vmem:[#allocation224_spill] sm:$0xff] %v8483_v61  ;;  %v8485_v22 = vpop.f32.mrb[126].mxu1 }
 0x213   :  { %11327 = vst [vmem:[#allocation225_spill] sm:$0xff] %v8485_v22  ;;  %v2544_v26 = vmax.f32 %v2543_v62, %v8481_v4  ;;  %v2528_v34 = vmax.f32 %v2527_v63, %v8474_v20  ;;  %v8489_v21 = vpop.f32.mrb[127].mxu1 }
 0x214   :  { %11328 = vst [vmem:[#allocation226_spill] sm:$0xff] %v8489_v21 }
 0x215   :  { %v2545_v44 = vmax.f32 %v2544_v26, %v8485_v22  ;;  %v2529_v38 = vmax.f32 %v2528_v34, %v8483_v61  ;;  %v11340_v61 = vld [vmem:[#allocation13_spill] sm:$0xff] }
 0x217   :  { %2530 = vmax.xlane.f32.xlu0 %v2529_v38  ;;  %v2546_v1 = vmax.f32 %v2545_v44, %v8489_v21 }
 0x219   :  { %2547 = vmax.xlane.f32.xlu1 %v2546_v1 }
 0x26c   :  { %v8494_v9 = vpop.xlane.xlu0 %2292 }
 0x26d   :  { %v2550_v57 = vsub.f32 %v7365_v45, %v8494_v9  ;;  %v2552_v62 = vsub.f32 %v7381_v51, %v8494_v9  ;;  %v2549_v63 = vsub.f32 %v7358_v28, %v8494_v9  ;;  %v2551_v26 = vsub.f32 %v7374_v48, %v8494_v9 }
 0x26e   :  { %v2553_v1 = vsub.f32 %v7678_v49, %v8494_v9  ;;  %v2554_v45 = vsub.f32 %v7684_v55, %v8494_v9  ;;  %v2555_v51 = vsub.f32 %v7688_v43, %v8494_v9  ;;  %v2556_v55 = vsub.f32 %v7697_v42, %v8494_v9 }
 0x26f   :  { %v2807_v22 = vmul.f32 1.442695, %v2550_v57  ;;  %v2811_v34 = vmul.f32 1.442695, %v2552_v62  ;;  %v2805_v38 = vmul.f32 1.442695, %v2549_v63  ;;  %v2557_v43 = vsub.f32 %v7964_v53, %v8494_v9 }
 0x270   :  { %v8504_v4 = vpop.xlane.xlu0 %2309  ;;  %v2809_v44 = vmul.f32 1.442695, %v2551_v26  ;;  %v8566_v21 = vmul.f32 1.442695, %v2555_v51  ;;  %v11338_v51 = vld [vmem:[#allocation9_spill] sm:$0xff] }
 0x271   :  { %v2566_v28 = vsub.f32 %v7379_v50, %v8504_v4  ;;  %5841 = vpow2.f32 %v2807_v22  ;;  %v2568_v48 = vsub.f32 %v7396_v58, %v8504_v4  ;;  %v2565_v57 = vsub.f32 %v7372_v47, %v8504_v4 }
 0x272   :  { %5843 = vpow2.f32 %v2811_v34  ;;  %v2567_v49 = vsub.f32 %v7391_v56, %v8504_v4  ;;  %v8580_v52 = vmul.f32 1.442695, %v2557_v43 }
 0x273   :  { %v2839_v62 = vmul.f32 1.442695, %v2566_v28  ;;  %v2843_v63 = vmul.f32 1.442695, %v2568_v48  ;;  %5845 = vpow2.f32 %v2805_v38  ;;  %v2837_v50 = vmul.f32 1.442695, %v2565_v57 }
 0x274   :  { %v8524_v22 = vpop.xlane.xlu1 %2326  ;;  %5847 = vpow2.f32 %v2809_v44  ;;  %v2841_v58 = vmul.f32 1.442695, %v2567_v49  ;;  %v11329_v44 = vld [vmem:[#allocation172_spill] sm:$0xff]  ;;  %v11332_v28 = vld [vmem:[#allocation5_spill] sm:$0xff] }
 0x275   :  { %5849 = vpow2.f32 %v2839_v62  ;;  %v2582_v42 = vsub.f32 %v7427_v5, %v8524_v22  ;;  %v2584_v53 = vsub.f32 %v7443_v12, %v8524_v22  ;;  %v2581_v26 = vsub.f32 %v7420_v2, %v8524_v22  ;;  %v11330_v2 = vld [vmem:[#allocation173_spill] sm:$0xff] }
 0x276   :  { %5851 = vpow2.f32 %v2843_v63  ;;  %v2583_v34 = vsub.f32 %v7436_v8, %v8524_v22  ;;  %v11331_v63 = vld [vmem:[#allocation3_spill] sm:$0xff]  ;;  %v8558_v62 = vmul.f32 1.442695, %v2553_v1 }
 0x277   :  { %5853 = vpow2.f32 %v2837_v50  ;;  %v2871_v48 = vmul.f32 1.442695, %v2582_v42  ;;  %v2875_v57 = vmul.f32 1.442695, %v2584_v53  ;;  %v2869_v5 = vmul.f32 1.442695, %v2581_v26 }
 0x278   :  { %v8542_v49 = vpop.xlane.xlu1 %2343  ;;  %5855 = vpow2.f32 %v2841_v58  ;;  %v2873_v12 = vmul.f32 1.442695, %v2583_v34  ;;  %v11333_v42 = vld [vmem:[#allocation2_spill] sm:$0xff]  ;;  %v11334_v58 = vld [vmem:[#allocation4_spill] sm:$0xff]  ;;  %v11335_v1 = vld [vmem:[#allocation7_spill] sm:$0xff] }
 0x279   :  { %v2598_v38 = vsub.f32 %v11331_v63, %v8542_v49  ;;  %5857 = vpow2.f32 %v2871_v48  ;;  %v2600_v50 = vsub.f32 %v11332_v28, %v8542_v49  ;;  %v2597_v53 = vsub.f32 %v11333_v42, %v8542_v49 }
 0x27a   :  { %5859 = vpow2.f32 %v2875_v57  ;;  %v2599_v26 = vsub.f32 %v11334_v58, %v8542_v49  ;;  %v8564_v57 = vmul.f32 1.442695, %v2554_v45 }
 0x27b   :  { %v5842_v8 = vpop.eup %5841  ;;  %v2903_v56 = vmul.f32 1.442695, %v2598_v38  ;;  %v2907_v47 = vmul.f32 1.442695, %v2600_v50  ;;  %5861 = vpow2.f32 %v2869_v5  ;;  %v2901_v48 = vmul.f32 1.442695, %v2597_v53 }
 0x27c   :  { %v8560_v63 = vpop.eup %5843  ;;  %v8562_v28 = vpop.xlane.xlu0 %2360  ;;  %5863 = vpow2.f32 %v2873_v12  ;;  %v2905_v42 = vmul.f32 1.442695, %v2599_v26  ;;  %v11336_v38 = vld [vmem:[#allocation11_spill] sm:$0xff]  ;;  %v8572_v5 = vmul.f32 1.442695, %v2556_v55  ;;  %v11337_v12 = vld [vmem:[#allocation6_spill] sm:$0xff] }
 0x27d   :  { %v5846_v58 = vpop.eup %5845  ;;  %5865 = vpow2.f32 %v2903_v56  ;;  %v2614_v34 = vsub.f32 %v11335_v1, %v8562_v28  ;;  %v2616_v50 = vsub.f32 %v11336_v38, %v8562_v28  ;;  %v2613_v45 = vsub.f32 %v11337_v12, %v8562_v28  ;;  %v11339_v1 = vld [vmem:[#allocation10_spill] sm:$0xff] }
 0x27e   :  { %v5848_v53 = vpop.eup %5847  ;;  %v8574_v3 = vpop.xlane.xlu1 %2377  ;;  %5867 = vpow2.f32 %v2907_v47  ;;  %v2615_v26 = vsub.f32 %v11338_v51, %v8562_v28  ;;  %v11341_v51 = vld [vmem:[#allocation8_spill] sm:$0xff] }
 0x27f   :  { %v8582_v56 = vpop.eup %5849  ;;  %5869 = vpow2.f32 %v2901_v48  ;;  %v2630_v38 = vsub.f32 %v11339_v1, %v8574_v3  ;;  %v2935_v55 = vmul.f32 1.442695, %v2614_v34  ;;  %v2632_v20 = vsub.f32 %v11340_v61, %v8574_v3 }
 0x280   :  { %v8588_v46 = vpop.eup %5851  ;;  %v3590_v47 = vpack.c.bf16 %v8582_v56, %v5842_v8  ;;  %5871 = vpow2.f32 %v2905_v42  ;;  %v2939_v12 = vmul.f32 1.442695, %v2616_v50  ;;  %v2629_v43 = vsub.f32 %v11341_v51, %v8574_v3 }
 0x281   :  { %v8593_v15 = vpop.eup %5853  ;;  %v3592_v48 = vpack.c.bf16 %v8588_v46, %v8560_v63  ;;  %5873 = vpow2.f32 %v2935_v55  ;;  %v2967_v1 = vmul.f32 1.442695, %v2630_v38  ;;  %v2971_v34 = vmul.f32 1.442695, %v2632_v20 }
 0x282   :  { %v8597_v36 = vpop.eup %5855  ;;  %3877 = vmatprep.mubr.bf16.mxu0 %v3590_v47  ;;  %v3589_v61 = vpack.c.bf16 %v8593_v15, %v5846_v58  ;;  %5875 = vpow2.f32 %v2939_v12  ;;  %v2933_v41 = vmul.f32 1.442695, %v2613_v45  ;;  %v2965_v42 = vmul.f32 1.442695, %v2629_v43 }
 0x283   :  { %v5858_v50 = vpop.eup %5857  ;;  %3974 = vmatprep.mubr.bf16.mxu1 %v3592_v48  ;;  %v3591_v51 = vpack.c.bf16 %v8597_v36, %v5848_v53  ;;  %5877 = vpow2.f32 %v2967_v1  ;;  %v2631_v24 = vsub.f32 %v11342_v16, %v8574_v3  ;;  %v2937_v30 = vmul.f32 1.442695, %v2615_v26  ;;  %v6420_v16 = vld [vmem:[%s10679_s1 + $0x100] sm:$0xff]   ;;  %v11345_v1 = vld [vmem:[#allocation15_spill] sm:$0xff] }
 0x284   :  { %v8603_v55 = vpop.eup %5859  ;;  %3878 = vmatmul.mubr.bf16.vlgmr.msra.gmra.mrb[128].mxu0 %v3589_v61  ;;  %v8605_v20 = vpop.xlane.xlu0 %2394  ;;  %5879 = vpow2.f32 %v2971_v34  ;;  %v11343_v38 = vsub.f32 %v7972_v23, %v8494_v9  ;;  %v11344_v47 = vsub.f32 %v7976_v18, %v8494_v9  ;;  %v3317_v43 = vadd.f32 %v5846_v58, %v5842_v8  ;;  %v11346_v34 = vld [vmem:[#allocation19_spill] sm:$0xff]  ;;  %v6421_v18 = vld [vmem:[%s10679_s1 + $0x180] sm:$0xff]  }
 0x285   :  { %v5862_v48 = vpop.eup %5861  ;;  %3975 = vmatmul.mubr.bf16.vlgmr.msra.gmra.mrb[128].mxu1 %v3591_v51  ;;  %5258 = vmatpush3.bf16.msra.mxu0 %v6420_v16  ;;  %5881 = vpow2.f32 %v2933_v41  ;;  %v2969_v26 = vmul.f32 1.442695, %v2631_v24  ;;  %v2646_v23 = vsub.f32 %v11345_v1, %v8605_v20  ;;  %v2648_v61 = vsub.f32 %v11346_v34, %v8605_v20  ;;  %v6422_v41 = vld [vmem:[%s10679_s1 + $0x148] sm:$0xff]   ;;  %v11348_v51 = vld [vmem:[#allocation14_spill] sm:$0xff] }
 0x286   :  { %v8610_v45 = vmul.f32 1.442695, %v11343_v38  ;;  %v8615_v12 = vmul.f32 1.442695, %v11344_v47  ;;  %v5864_v38 = vpop.eup %5863  ;;  %5322 = vmatpush3.bf16.msra.mxu1 %v6421_v18  ;;  %v8627_v8 = vpop.xlane.xlu1 %2411  ;;  %v3351_v58 = vadd.f32 %v5862_v48, %v5858_v50  ;;  %5259 = vmatprep.subr.bf16.mxu0 %v6422_v41  ;;  %5883 = vpow2.f32 %v2965_v42  ;;  %v6423_v1 = vld [vmem:[%s10679_s1 + $0x1c8] sm:$0xff]   ;;  %v11349_v34 = vld [vmem:[#allocation18_spill] sm:$0xff] }
 0x287   :  { %11347 = vst [vmem:[#allocation172_spill] sm:$0xff] %v8627_v8  ;;  %v3318_v24 = vadd.f32 %v5848_v53, %v3317_v43  ;;  %v2645_v47 = vsub.f32 %v11348_v51, %v8605_v20  ;;  %v5866_v16 = vpop.eup %5865  ;;  %5323 = vmatprep.subr.bf16.mxu1 %v6423_v1  ;;  %5885 = vpow2.f32 %v2937_v30  ;;  %v2662_v18 = vsub.f32 %v11349_v34, %v8627_v8  ;;  %v6424_v30 = vld [vmem:[%s10679_s1 + $0x108] sm:$0xff]  }
 0x288   :  { %v2999_v32 = vmul.f32 1.442695, %v2646_v23  ;;  %v2664_v17 = vsub.f32 %v11350_v54, %v8627_v8  ;;  %v8641_v41 = vpop.eup %5867  ;;  %v3606_v53 = vpack.c.bf16 %v5866_v16, %v5858_v50  ;;  %v8643_v42 = vadd.f32 %v5864_v38, %v3351_v58 }
 0x289   :  { %5887 = vpow2.f32 %v2969_v26  ;;  %v3003_v43 = vmul.f32 1.442695, %v2648_v61  ;;  %v5870_v51 = vpop.eup %5869  ;;  %v3608_v29 = vpack.c.bf16 %v8641_v41, %v8603_v55  ;;  %5260 = vmatpush3.bf16.msra.mxu0 %v6424_v30  ;;  %v3031_v23 = vmul.f32 1.442695, %v2662_v18  ;;  %v6425_v26 = vld [vmem:[%s10679_s1 + $0x188] sm:$0xff]   ;;  %v6428_v30 = vld [vmem:[%s10679_s1 + $0x110] sm:$0xff]  }
 0x28a   :  { %5889 = vpow2.f32 %v2999_v32  ;;  %v3035_v1 = vmul.f32 1.442695, %v2664_v17  ;;  %v5872_v54 = vpop.eup %5871  ;;  %3885 = vmatprep.mubr.bf16.mxu0 %v3606_v53  ;;  %v3368_v34 = vadd.f32 %v5870_v51, %v5866_v16  ;;  %v3605_v50 = vpack.c.bf16 %v5870_v51, %v5862_v48  ;;  %5324 = vmatpush3.bf16.msra.mxu1 %v6425_v26  ;;  %v6426_v17 = vld [vmem:[%s10679_s1 + $0x150] sm:$0xff]  }
 0x28b   :  { %5891 = vpow2.f32 %v3003_v43  ;;  %v8654_v61 = vadd.f32 %v8560_v63, %v3318_v24  ;;  %v5874_v58 = vpop.eup %5873  ;;  %3982 = vmatprep.mubr.bf16.mxu1 %v3608_v29  ;;  %v3607_v13 = vpack.c.bf16 %v5872_v54, %v5864_v38  ;;  %5261 = vmatprep.subr.bf16.mxu0 %v6426_v17  ;;  %v11351_v32 = vsub.f32 %v7985_v31, %v8494_v9  ;;  %v11352_v16 = vld [vmem:[#allocation16_spill] sm:$0xff]  ;;  %v11354_v24 = vld [vmem:[#allocation17_spill] sm:$0xff] }
 0x28c   :  { %5893 = vpow2.f32 %v3031_v23  ;;  %v2661_v18 = vsub.f32 %v11352_v16, %v8627_v8  ;;  %v8666_v53 = vpop.eup %5875  ;;  %3886 = vmatmul.mubr.bf16.gmra.mrb[132].mxu0 %v3605_v50  ;;  %v8668_v63 = vadd.f32 %v5872_v54, %v3368_v34  ;;  %v6427_v29 = vld [vmem:[%s10679_s1 + $0x1d0] sm:$0xff]   ;;  %v11353_v38 = vsub.f32 %v11329_v44, %v8494_v9 }
 0x28d   :  { %v8662_v48 = vmul.f32 1.442695, %v11351_v32  ;;  %5325 = vmatprep.subr.bf16.mxu1 %v6427_v29  ;;  %5895 = vpow2.f32 %v3035_v1  ;;  %v2647_v43 = vsub.f32 %v11354_v24, %v8605_v20  ;;  %v5878_v51 = vpop.eup %5877  ;;  %3983 = vmatmul.mubr.bf16.gmra.mrb[132].mxu1 %v3607_v13  ;;  %v11355_v23 = vsub.f32 %v11330_v2, %v8494_v9  ;;  %v11357_v34 = vld [vmem:[#allocation20_spill] sm:$0xff]  ;;  %v6430_v32 = vld [vmem:[%s10679_s1 + $0x158] sm:$0xff]  }
 0x28e   :  { %v8676_v31 = vmul.f32 1.442695, %v11353_v38  ;;  %5262 = vmatpush3.bf16.msra.mxu0 %v6428_v30  ;;  %5897 = vpow2.f32 %v8558_v62  ;;  %v11356_v44 = vsub.f32 %v8264_v7, %v8494_v9  ;;  %v2663_v13 = vsub.f32 %v11357_v34, %v8627_v8  ;;  %v8696_v50 = vpop.eup %5879  ;;  %v6429_v62 = vld [vmem:[%s10679_s1 + $0x190] sm:$0xff]  }
 0x28f   :  { %v8687_v1 = vmul.f32 1.442695, %v11355_v23  ;;  %v3622_v26 = vpack.c.bf16 %v5878_v51, %v5874_v58  ;;  %5326 = vmatpush3.bf16.msra.mxu1 %v6429_v62  ;;  %5899 = vpow2.f32 %v8564_v57  ;;  %v11358_v2 = vsub.f32 %v8273_v19, %v8494_v9  ;;  %5263 = vmatprep.subr.bf16.mxu0 %v6430_v32  ;;  %v5882_v16 = vpop.eup %5881  ;;  %v6431_v19 = vld [vmem:[%s10679_s1 + $0x1d8] sm:$0xff]   ;;  %v11359_v9 = vld [vmem:[#allocation54_spill] sm:$0xff]  ;;  %v11360_v23 = vld [vmem:[#allocation55_spill] sm:$0xff] }
 0x290   :  { %v8692_v54 = vmul.f32 1.442695, %v11356_v44  ;;  %v8707_v7 = vmul.f32 1.442695, %v2645_v47  ;;  %v3624_v29 = vpack.c.bf16 %v8696_v50, %v8666_v53  ;;  %5901 = vpow2.f32 %v8566_v21  ;;  %5327 = vmatprep.subr.bf16.mxu1 %v6431_v19  ;;  %v5884_v47 = vpop.eup %5883  ;;  %v6434_v32 = vld [vmem:[%s10679_s1 + $0x160] sm:$0xff]  }
 0x291   :  { %v8705_v17 = vmul.f32 1.442695, %v11358_v2  ;;  %v8715_v38 = vmul.f32 1.442695, %v2661_v18  ;;  %v2569_v57 = vsub.f32 %v11359_v9, %v8504_v4  ;;  %3893 = vmatprep.mubr.bf16.mxu0 %v3622_v26  ;;  %v3385_v24 = vadd.f32 %v5882_v16, %v5874_v58  ;;  %v5886_v18 = vpop.eup %5885  ;;  %v6432_v26 = vld [vmem:[%s10679_s1 + $0x118] sm:$0xff]   ;;  %v11363_v19 = vld [vmem:[#allocation114_spill] sm:$0xff] }
 0x292   :  { %5903 = vpow2.f32 %v8572_v5  ;;  %v8723_v30 = vmul.f32 1.442695, %v2647_v43  ;;  %v2570_v21 = vsub.f32 %v11360_v23, %v8504_v4  ;;  %3990 = vmatprep.mubr.bf16.mxu1 %v3624_v29  ;;  %v3402_v44 = vadd.f32 %v5884_v47, %v5878_v51  ;;  %5264 = vmatpush3.bf16.msra.mxu0 %v6432_v26  ;;  %v6433_v43 = vld [vmem:[%s10679_s1 + $0x198] sm:$0xff]   ;;  %v11361_v51 = vld [vmem:[#allocation56_spill] sm:$0xff]  ;;  %v11365_v23 = vld [vmem:[#allocation115_spill] sm:$0xff] }
 0x293   :  { %v3621_v34 = vpack.c.bf16 %v5884_v47, %v5882_v16  ;;  %5905 = vpow2.f32 %v8580_v52  ;;  %v8728_v62 = vmul.f32 1.442695, %v2663_v13  ;;  %v5888_v58 = vpop.eup %5887  ;;  %v8733_v5 = vadd.f32 %v5886_v18, %v3385_v24  ;;  %5328 = vmatpush3.bf16.msra.mxu1 %v6433_v43  ;;  %v11362_v13 = vld [vmem:[#allocation57_spill] sm:$0xff]  ;;  %5265 = vmatprep.subr.bf16.mxu0 %v6434_v32  ;;  %v6435_v47 = vld [vmem:[%s10679_s1 + $0x1e0] sm:$0xff]   ;;  %v11370_v32 = vld [vmem:[#allocation176_spill] sm:$0xff] }
 0x294   :  { %5907 = vpow2.f32 %v8610_v45  ;;  %v2571_v52 = vsub.f32 %v11361_v51, %v8504_v4  ;;  %v2572_v2 = vsub.f32 %v11362_v13, %v8504_v4  ;;  %v8746_v16 = vpop.eup %5889  ;;  %v8748_v29 = vadd.f32 %v5888_v58, %v3402_v44  ;;  %5329 = vmatprep.subr.bf16.mxu1 %v6435_v47  ;;  %v11368_v51 = vld [vmem:[#allocation174_spill] sm:$0xff] }
 0x295   :  { %v3623_v45 = vpack.c.bf16 %v5888_v58, %v5886_v18  ;;  %5909 = vpow2.f32 %v8615_v12  ;;  %v2573_v9 = vsub.f32 %v11363_v19, %v8504_v4  ;;  %v8756_v24 = vpop.eup %5891  ;;  %3894 = vmatmul.mubr.bf16.gmra.mrb[136].mxu0 %v3621_v34  ;;  %v2574_v44 = vsub.f32 %v11365_v23, %v8504_v4  ;;  %v11366_v18 = vld [vmem:[#allocation116_spill] sm:$0xff]  ;;  %v11367_v12 = vld [vmem:[#allocation117_spill] sm:$0xff]  ;;  %v11369_v34 = vld [vmem:[#allocation175_spill] sm:$0xff] }
 0x296   :  { %11364 = vst [vmem:[#allocation173_spill] sm:$0xff] %v8756_v24  ;;  %5911 = vpow2.f32 %v8662_v48  ;;  %v2575_v26 = vsub.f32 %v11366_v18, %v8504_v4  ;;  %v2576_v58 = vsub.f32 %v11367_v12, %v8504_v4  ;;  %v8765_v43 = vpop.eup %5893  ;;  %v2577_v13 = vsub.f32 %v11368_v51, %v8504_v4  ;;  %v6436_v47 = vld [vmem:[%s10679_s1 + $0x120] sm:$0xff]   ;;  %v6438_v51 = vld [vmem:[%s10679_s1 + $0x168] sm:$0xff]  }
 0x297   :  { %3991 = vmatmul.mubr.bf16.gmra.mrb[136].mxu1 %v3623_v45  ;;  %5913 = vpow2.f32 %v8676_v31  ;;  %v2578_v48 = vsub.f32 %v11369_v34, %v8504_v4  ;;  %v2579_v19 = vsub.f32 %v11370_v32, %v8504_v4  ;;  %5266 = vmatpush3.bf16.msra.mxu0 %v6436_v47  ;;  %v8777_v23 = vpop.eup %5895  ;;  %v3638_v45 = vpack.c.bf16 %v8765_v43, %v8746_v16  ;;  %v6437_v12 = vld [vmem:[%s10679_s1 + $0x1a0] sm:$0xff]   ;;  %v8792_v32 = vpop.xlane.xlu0 %2428 }
 0x298   :  { %11371 = vst [vmem:[#allocation3_spill] sm:$0xff] %v8777_v23  ;;  %5915 = vpow2.f32 %v8687_v1  ;;  %v2580_v31 = vsub.f32 %v8279_v11, %v8504_v4  ;;  %v2845_v18 = vmul.f32 1.442695, %v2569_v57  ;;  %5330 = vmatpush3.bf16.msra.mxu1 %v6437_v12  ;;  %5267 = vmatprep.subr.bf16.mxu0 %v6438_v51  ;;  %v8790_v34 = vpop.eup %5897  ;;  %v8794_v47 = vpop.xlane.xlu1 %2445  ;;  %v3640_v11 = vpack.c.bf16 %v8777_v23, %v8756_v24  ;;  %v6439_v57 = vld [vmem:[%s10679_s1 + $0x1e8] sm:$0xff]  }
 0x299   :  { %11372 = vst [vmem:[#allocation5_spill] sm:$0xff] %v8790_v34  ;;  %5917 = vpow2.f32 %v8692_v54  ;;  %v2847_v4 = vmul.f32 1.442695, %v2570_v21  ;;  %v2849_v1 = vmul.f32 1.442695, %v2571_v52  ;;  %5331 = vmatprep.subr.bf16.mxu1 %v6439_v57  ;;  %v8802_v12 = vpop.eup %5899  ;;  %3901 = vmatprep.mubr.bf16.mxu0 %v3638_v45  ;;  %v3320_v51 = vadd.f32 %v8790_v34, %v8654_v61 }
 0x29a   :  { %11373 = vst [vmem:[#allocation2_spill] sm:$0xff] %v8802_v12  ;;  %5919 = vpow2.f32 %v8705_v17  ;;  %v2851_v39 = vmul.f32 1.442695, %v2572_v2  ;;  %v2853_v10 = vmul.f32 1.442695, %v2573_v9  ;;  %v8807_v23 = vpop.eup %5901  ;;  %3998 = vmatprep.mubr.bf16.mxu1 %v3640_v11  ;;  %v3334_v52 = vadd.f32 %v8593_v15, %v8582_v56  ;;  %v6440_v17 = vld [vmem:[%s10679_s1 + $0x128] sm:$0xff]  }
 0x29b   :  { %11374 = vst [vmem:[#allocation4_spill] sm:$0xff] %v8807_v23  ;;  %5921 = vpow2.f32 %v8707_v7  ;;  %v8810_v54 = vmul.f32 1.442695, %v2574_v44  ;;  %v8812_v21 = vmul.f32 1.442695, %v2575_v26  ;;  %5268 = vmatpush3.bf16.msra.mxu0 %v6440_v17  ;;  %v3321_v2 = vadd.f32 %v8802_v12, %v3320_v51  ;;  %v11376_v7 = vld [vmem:[#allocation23_spill] sm:$0xff] }
 0x29c   :  { %v8819_v61 = vpop.eup %5903  ;;  %5923 = vpow2.f32 %v8715_v38  ;;  %v2678_v9 = vsub.f32 %v11376_v7, %v8792_v32  ;;  %v11377_v44 = vld [vmem:[#allocation26_spill] sm:$0xff]  ;;  %v6441_v15 = vld [vmem:[%s10679_s1 + $0x1a8] sm:$0xff]   ;;  %v6442_v56 = vld [vmem:[%s10679_s1 + $0x170] sm:$0xff]   ;;  %v3335_v38 = vadd.f32 %v8597_v36, %v3334_v52  ;;  %v2863_v52 = vmul.f32 1.442695, %v2578_v48 }
 0x29d   :  { %11375 = vst [vmem:[#allocation7_spill] sm:$0xff] %v8819_v61  ;;  %v2694_v26 = vsub.f32 %v11377_v44, %v8794_v47  ;;  %5332 = vmatpush3.bf16.msra.mxu1 %v6441_v15  ;;  %5269 = vmatprep.subr.bf16.mxu0 %v6442_v56  ;;  %v8833_v45 = vpop.eup %5905  ;;  %5925 = vpow2.f32 %v8723_v30  ;;  %v11379_v11 = vld [vmem:[#allocation27_spill] sm:$0xff]  ;;  %v11380_v51 = vld [vmem:[#allocation29_spill] sm:$0xff]  ;;  %v6443_v7 = vld [vmem:[%s10679_s1 + $0x1f0] sm:$0xff]   ;;  %v3322_v15 = vadd.f32 %v8807_v23, %v3321_v2  ;;  %v2859_v30 = vmul.f32 1.442695, %v2576_v58 }
 0x29e   :  { %11378 = vst [vmem:[#allocation11_spill] sm:$0xff] %v8833_v45  ;;  %v2680_v57 = vsub.f32 %v11379_v11, %v8792_v32  ;;  %v2696_v17 = vsub.f32 %v11380_v51, %v8794_v47  ;;  %5333 = vmatprep.subr.bf16.mxu1 %v6443_v7  ;;  %v8844_v44 = vpop.eup %5907  ;;  %5927 = vpow2.f32 %v8728_v62  ;;  %v2861_v56 = vmul.f32 1.442695, %v2577_v13  ;;  %v6444_v7 = vld [vmem:[%s10679_s1 + $0x130] sm:$0xff]   ;;  %v6447_v2 = vld [vmem:[%s10679_s1 + $0x1f8] sm:$0xff]   ;;  %v11391_v23 = vld [vmem:[#allocation178_spill] sm:$0xff] }
 0x29f   :  { %11381 = vst [vmem:[#allocation6_spill] sm:$0xff] %v8844_v44  ;;  %v8848_v36 = vpop.eup %5909  ;;  %5929 = vpow2.f32 %v2845_v18  ;;  %v8850_v11 = vmul.f32 1.442695, %v2579_v19  ;;  %v8853_v51 = vadd.f32 %v8588_v46, %v3335_v38  ;;  %5270 = vmatpush3.bf16.msra.mxu0 %v6444_v7  ;;  %v3323_v62 = vadd.f32 %v8819_v61, %v3322_v15  ;;  %v6445_v48 = vld [vmem:[%s10679_s1 + $0x1b0] sm:$0xff]   ;;  %v6446_v46 = vld [vmem:[%s10679_s1 + $0x178] sm:$0xff]   ;;  %v11386_v15 = vld [vmem:[#allocation58_spill] sm:$0xff] }
 0x2a0   :  { %11382 = vst [vmem:[#allocation9_spill] sm:$0xff] %v8848_v36  ;;  %v8858_v34 = vpop.eup %5911  ;;  %5931 = vpow2.f32 %v2847_v4  ;;  %v8861_v58 = vmul.f32 1.442695, %v2580_v31  ;;  %v8863_v13 = vmul.f32 1.442695, %v2678_v9  ;;  %5271 = vmatprep.subr.bf16.mxu0 %v6446_v46  ;;  %v2585_v7 = vsub.f32 %v11386_v15, %v8524_v22  ;;  %v11390_v46 = vld [vmem:[#allocation177_spill] sm:$0xff] }
 0x2a1   :  { %11383 = vst [vmem:[#allocation10_spill] sm:$0xff] %v8858_v34  ;;  %5334 = vmatpush3.bf16.msra.mxu1 %v6445_v48  ;;  %v8871_v19 = vpop.eup %5913  ;;  %5933 = vpow2.f32 %v2849_v1  ;;  %v8873_v18 = vmul.f32 1.442695, %v2694_v26  ;;  %v8875_v4 = vmul.f32 1.442695, %v2680_v57  ;;  %v3324_v38 = vadd.f32 %v8833_v45, %v3323_v62  ;;  %v11387_v1 = vld [vmem:[#allocation121_spill] sm:$0xff] }
 0x2a2   :  { %11384 = vst [vmem:[#allocation13_spill] sm:$0xff] %v8871_v19  ;;  %v8877_v31 = vmul.f32 1.442695, %v2696_v17  ;;  %5335 = vmatprep.subr.bf16.mxu1 %v6447_v2  ;;  %v8882_v9 = vpop.eup %5915  ;;  %5935 = vpow2.f32 %v2851_v39  ;;  %v2591_v26 = vsub.f32 %v11387_v1, %v8524_v22  ;;  %v11389_v17 = vld [vmem:[#allocation123_spill] sm:$0xff]  ;;  %v2593_v2 = vsub.f32 %v11390_v46, %v8524_v22  ;;  %v6448_v39 = vld [vmem:[%s10679_s1 + $0x138] sm:$0xff]   ;;  %v6450_v46 = vld [vmem:[%s10679_s1 + $0x240] sm:$0xff]  }
 0x2a3   :  { %11385 = vst [vmem:[#allocation8_spill] sm:$0xff] %v8882_v9  ;;  %v8889_v57 = vpop.eup %5917  ;;  %5937 = vpow2.f32 %v2853_v10  ;;  %v2592_v48 = vsub.f32 %v11389_v17, %v8524_v22  ;;  %5272 = vmatpush3.bf16.msra.mxu0 %v6448_v39  ;;  %v3325_v15 = vadd.f32 %v8844_v44, %v3324_v38  ;;  %v2595_v10 = vsub.f32 %v8294_v0, %v8524_v22  ;;  %v6449_v17 = vld [vmem:[%s10679_s1 + $0x1b8] sm:$0xff]   ;;  %v11395_v1 = vld [vmem:[#allocation63_spill] sm:$0xff] }
 0x2a4   :  { %11388 = vst [vmem:[#allocation12_spill] sm:$0xff] %v8889_v57  ;;  %v8900_v62 = vpop.eup %5919  ;;  %5939 = vpow2.f32 %v8810_v54  ;;  %5385 = vmatprep.subr.bf16.mxu0 %v6450_v46  ;;  %v11393_v54 = vld [vmem:[#allocation59_spill] sm:$0xff]  ;;  %v11394_v0 = vld [vmem:[#allocation61_spill] sm:$0xff]  ;;  %v2588_v45 = vsub.f32 %v11395_v1, %v8524_v22 }
 0x2a5   :  { %11392 = vst [vmem:[#allocation15_spill] sm:$0xff] %v8900_v62  ;;  %5336 = vmatpush3.bf16.msra.mxu1 %v6449_v17  ;;  %v5922_v39 = vpop.eup %5921  ;;  %5941 = vpow2.f32 %v8812_v21  ;;  %v2586_v38 = vsub.f32 %v11393_v54, %v8524_v22  ;;  %v2587_v61 = vsub.f32 %v11394_v0, %v8524_v22  ;;  %v6451_v17 = vld [vmem:[%s10679_s1 + $0x2c0] sm:$0xff]   ;;  %v3326_v46 = vadd.f32 %v8848_v36, %v3325_v15  ;;  %v11397_v1 = vld [vmem:[#allocation119_spill] sm:$0xff] }
 0x2a6   :  { %5449 = vmatprep.subr.bf16.mxu1 %v6451_v17  ;;  %v5924_v44 = vpop.eup %5923  ;;  %v3419_v12 = vadd.f32 %v5922_v39, %v8746_v16  ;;  %5943 = vpow2.f32 %v2859_v30  ;;  %v11396_v21 = vld [vmem:[#allocation118_spill] sm:$0xff]  ;;  %v2590_v24 = vsub.f32 %v11397_v1, %v8524_v22  ;;  %v2877_v15 = vmul.f32 1.442695, %v2585_v7 }
 0x2a7   :  { %v2589_v54 = vsub.f32 %v11396_v21, %v8524_v22  ;;  %v5926_v37 = vpop.eup %5925  ;;  %v3436_v0 = vadd.f32 %v5924_v44, %v8765_v43  ;;  %v3637_v8 = vpack.c.bf16 %v5924_v44, %v5922_v39  ;;  %5945 = vpow2.f32 %v2861_v56 }
 0x2a8   :  { %v5928_v60 = vpop.eup %5927  ;;  %v3327_v17 = vadd.f32 %v8858_v34, %v3326_v46  ;;  %v8932_v27 = vadd.f32 %v5926_v37, %v3419_v12  ;;  %5947 = vpow2.f32 %v2863_v52  ;;  %v2879_v43 = vmul.f32 1.442695, %v2586_v38 }
 0x2a9   :  { %v8934_v16 = vpop.eup %5929  ;;  %3902 = vmatmul.mubr.bf16.gmra.mrb[140].mxu0 %v3637_v8  ;;  %v8936_v30 = vadd.f32 %v5928_v60, %v3436_v0  ;;  %v3639_v21 = vpack.c.bf16 %v5928_v60, %v5926_v37  ;;  %5949 = vpow2.f32 %v8850_v11  ;;  %v2881_v52 = vmul.f32 1.442695, %v2587_v61 }
 0x2aa   :  { %v8939_v44 = vpop.eup %5931  ;;  %v3328_v56 = vadd.f32 %v8871_v19, %v3327_v17  ;;  %5951 = vpow2.f32 %v8861_v58  ;;  %v3337_v12 = vadd.f32 %v8934_v16, %v8853_v51  ;;  %v2883_v8 = vmul.f32 1.442695, %v2588_v45 }
 0x2ab   :  { %v8945_v7 = vpop.eup %5933  ;;  %3999 = vmatmul.mubr.bf16.gmra.mrb[140].mxu1 %v3639_v21  ;;  %5953 = vpow2.f32 %v8863_v13  ;;  %v2885_v37 = vmul.f32 1.442695, %v2589_v54  ;;  %v2887_v60 = vmul.f32 1.442695, %v2590_v24  ;;  %v2889_v58 = vmul.f32 1.442695, %v2591_v26 }
 0x2ac   :  { %v8948_v11 = vpop.eup %5935  ;;  %v3329_v39 = vadd.f32 %v8882_v9, %v3328_v56  ;;  %v3338_v38 = vadd.f32 %v8939_v44, %v3337_v12  ;;  %5955 = vpow2.f32 %v8873_v18  ;;  %v2891_v61 = vmul.f32 1.442695, %v2592_v48  ;;  %v11402_v48 = vld [vmem:[#allocation22_spill] sm:$0xff]  ;;  %v11408_v12 = vld [vmem:[#allocation60_spill] sm:$0xff]  ;;  %v11420_v9 = vld [vmem:[#allocation181_spill] sm:$0xff] }
 0x2ad   :  { %v8953_v46 = vpop.eup %5937  ;;  %5957 = vpow2.f32 %v8875_v4  ;;  %v2893_v51 = vmul.f32 1.442695, %v2593_v2  ;;  %v8958_v45 = vadd.f32 %v8603_v55, %v8643_v42  ;;  %v11400_v18 = vsub.f32 %v11391_v23, %v8524_v22  ;;  %v11403_v42 = vld [vmem:[#allocation24_spill] sm:$0xff]  ;;  %v11405_v23 = vld [vmem:[#allocation25_spill] sm:$0xff] }
 0x2ae   :  { %11398 = vst [vmem:[#allocation19_spill] sm:$0xff] %v8953_v46  ;;  %v8960_v24 = vpop.eup %5939  ;;  %v3330_v13 = vadd.f32 %v8889_v57, %v3329_v39  ;;  %v3339_v54 = vadd.f32 %v8945_v7, %v3338_v38  ;;  %5959 = vpow2.f32 %v8877_v31  ;;  %v2897_v4 = vmul.f32 1.442695, %v2595_v10  ;;  %v11407_v10 = vld [vmem:[#allocation28_spill] sm:$0xff]  ;;  %v11409_v38 = vld [vmem:[#allocation62_spill] sm:$0xff] }
 0x2af   :  { %11399 = vst [vmem:[#allocation14_spill] sm:$0xff] %v8960_v24  ;;  %v2895_v26 = vmul.f32 1.442695, %v11400_v18  ;;  %v8968_v0 = vpop.eup %5941  ;;  %5961 = vpow2.f32 %v2877_v15  ;;  %v2677_v55 = vsub.f32 %v11402_v48, %v8792_v32  ;;  %v2693_v2 = vsub.f32 %v11403_v42, %v8794_v47 }
 0x2b0   :  { %11401 = vst [vmem:[#allocation18_spill] sm:$0xff] %v8968_v0  ;;  %v8974_v1 = vpop.eup %5943  ;;  %v3331_v17 = vadd.f32 %v8900_v62, %v3330_v13  ;;  %v3340_v31 = vadd.f32 %v8948_v11, %v3339_v54  ;;  %5963 = vpow2.f32 %v2879_v43  ;;  %v2679_v21 = vsub.f32 %v11405_v23, %v8792_v32  ;;  %v11411_v13 = vld [vmem:[#allocation64_spill] sm:$0xff] }
 0x2b1   :  { %11404 = vst [vmem:[#allocation21_spill] sm:$0xff] %v8974_v1  ;;  %v8980_v56 = vpop.eup %5945  ;;  %5965 = vpow2.f32 %v2881_v52  ;;  %v2695_v15 = vsub.f32 %v11407_v10, %v8794_v47  ;;  %v2601_v39 = vsub.f32 %v11408_v12, %v8542_v49  ;;  %v2602_v18 = vsub.f32 %v11409_v38, %v8542_v49  ;;  %v11412_v52 = vld [vmem:[#allocation65_spill] sm:$0xff]  ;;  %v11414_v10 = vld [vmem:[#allocation120_spill] sm:$0xff]  ;;  %v11415_v38 = vld [vmem:[#allocation122_spill] sm:$0xff] }
 0x2b2   :  { %11406 = vst [vmem:[#allocation16_spill] sm:$0xff] %v8980_v56  ;;  %v8988_v48 = vpop.eup %5947  ;;  %3332 = vadd.xlane.f32.xlu0 %v3331_v17  ;;  %v3341_v43 = vadd.f32 %v8953_v46, %v3340_v31  ;;  %5967 = vpow2.f32 %v2883_v8  ;;  %v2603_v54 = vsub.f32 %v11411_v13, %v8542_v49  ;;  %v2604_v42 = vsub.f32 %v11412_v52, %v8542_v49  ;;  %v11416_v17 = vld [vmem:[#allocation124_spill] sm:$0xff]  ;;  %v11418_v52 = vld [vmem:[#allocation179_spill] sm:$0xff] }
 0x2b3   :  { %11410 = vst [vmem:[#allocation17_spill] sm:$0xff] %v8988_v48  ;;  %v8995_v23 = vpop.eup %5949  ;;  %5969 = vpow2.f32 %v2885_v37  ;;  %v2605_v12 = vsub.f32 %v11414_v10, %v8542_v49  ;;  %v2606_v57 = vsub.f32 %v11415_v38, %v8542_v49  ;;  %v2607_v19 = vsub.f32 %v11416_v17, %v8542_v49  ;;  %v11419_v10 = vld [vmem:[#allocation180_spill] sm:$0xff] }
 0x2b4   :  { %11413 = vst [vmem:[#allocation20_spill] sm:$0xff] %v8995_v23  ;;  %v9003_v31 = vpop.eup %5951  ;;  %v3342_v8 = vadd.f32 %v8960_v24, %v3341_v43  ;;  %5971 = vpow2.f32 %v2887_v60  ;;  %v2608_v13 = vsub.f32 %v8029_v40, %v8542_v49  ;;  %v2609_v37 = vsub.f32 %v11418_v52, %v8542_v49 }
 0x2b5   :  { %11417 = vst [vmem:[#allocation54_spill] sm:$0xff] %v9003_v31  ;;  %v9010_v62 = vpop.eup %5953  ;;  %5973 = vpow2.f32 %v2889_v58  ;;  %v2610_v38 = vsub.f32 %v11419_v10, %v8542_v49  ;;  %v2611_v17 = vsub.f32 %v11420_v9, %v8542_v49  ;;  %v2612_v36 = vsub.f32 %v8309_v59, %v8542_v49 }
 0x2b6   :  { %v9018_v43 = vpop.eup %5955  ;;  %v3343_v60 = vadd.f32 %v8968_v0, %v3342_v8  ;;  %5975 = vpow2.f32 %v2891_v61  ;;  %v11421_v40 = vsub.f32 %v8303_v14, %v8524_v22  ;;  %v3061_v10 = vmul.f32 1.442695, %v2677_v55  ;;  %v9039_v55 = vpop.xlane.xlu1 %2479 }
 0x2b7   :  { %v9024_v46 = vpop.eup %5957  ;;  %v3654_v58 = vpack.c.bf16 %v9018_v43, %v9010_v62  ;;  %5977 = vpow2.f32 %v2893_v51  ;;  %v3093_v9 = vmul.f32 1.442695, %v2693_v2  ;;  %v3065_v49 = vmul.f32 1.442695, %v2679_v21  ;;  %v9037_v51 = vpop.xlane.xlu0 %2462 }
 0x2b8   :  { %v2899_v52 = vmul.f32 1.442695, %v11421_v40  ;;  %v9028_v34 = vpop.eup %5959  ;;  %v3344_v59 = vadd.f32 %v8974_v1, %v3343_v60  ;;  %5979 = vpow2.f32 %v2895_v26  ;;  %v3097_v8 = vmul.f32 1.442695, %v2695_v15 }
 0x2b9   :  { %v9031_v61 = vpop.eup %5961  ;;  %3909 = vmatprep.mubr.bf16.mxu0 %v3654_v58  ;;  %v3656_v14 = vpack.c.bf16 %v9028_v34, %v9024_v46  ;;  %5981 = vpow2.f32 %v2897_v4  ;;  %v2909_v22 = vmul.f32 1.442695, %v2601_v39  ;;  %v2911_v40 = vmul.f32 1.442695, %v2602_v18 }
 0x2ba   :  { %11422 = vst [vmem:[#allocation55_spill] sm:$0xff] %v9031_v61  ;;  %v9035_v0 = vpop.eup %5963  ;;  %v3345_v2 = vadd.f32 %v8980_v56, %v3344_v59  ;;  %5983 = vpow2.f32 %v2899_v52  ;;  %v3354_v26 = vadd.f32 %v9031_v61, %v8958_v45  ;;  %v2913_v21 = vmul.f32 1.442695, %v2603_v54 }
 0x2bb   :  { %v9044_v15 = vpop.eup %5965  ;;  %4006 = vmatprep.mubr.bf16.mxu1 %v3656_v14  ;;  %5985 = vpow2.f32 %v3061_v10  ;;  %v2915_v4 = vmul.f32 1.442695, %v2604_v42  ;;  %v2917_v39 = vmul.f32 1.442695, %v2605_v12  ;;  %v2919_v18 = vmul.f32 1.442695, %v2606_v57 }
 0x2bc   :  { %11423 = vst [vmem:[#allocation56_spill] sm:$0xff] %v9044_v15  ;;  %v9046_v60 = vpop.eup %5967  ;;  %v3346_v58 = vadd.f32 %v8988_v48, %v3345_v2  ;;  %v3355_v1 = vadd.f32 %v9035_v0, %v3354_v26  ;;  %5987 = vpow2.f32 %v3093_v9  ;;  %v9052_v52 = vadd.f32 %v8641_v41, %v8668_v63  ;;  %v11426_v10 = vld [vmem:[#allocation31_spill] sm:$0xff]  ;;  %v11427_v57 = vld [vmem:[#allocation34_spill] sm:$0xff]  ;;  %v11431_v26 = vld [vmem:[#allocation37_spill] sm:$0xff] }
 0x2bd   :  { %11424 = vst [vmem:[#allocation57_spill] sm:$0xff] %v9046_v60  ;;  %v9054_v45 = vpop.eup %5969  ;;  %5989 = vpow2.f32 %v3065_v49  ;;  %v2921_v54 = vmul.f32 1.442695, %v2607_v19  ;;  %v2710_v42 = vsub.f32 %v11426_v10, %v9037_v51  ;;  %v2726_v12 = vsub.f32 %v11427_v57, %v9039_v55  ;;  %v11429_v41 = vld [vmem:[#allocation35_spill] sm:$0xff] }
 0x2be   :  { %11425 = vst [vmem:[#allocation114_spill] sm:$0xff] %v9054_v45  ;;  %v9060_v59 = vpop.eup %5971  ;;  %v3347_v14 = vadd.f32 %v8995_v23, %v3346_v58  ;;  %v3356_v9 = vadd.f32 %v9044_v15, %v3355_v1  ;;  %5991 = vpow2.f32 %v3097_v8  ;;  %v2712_v63 = vsub.f32 %v11429_v41, %v9037_v51 }
 0x2bf   :  { %11428 = vst [vmem:[#allocation115_spill] sm:$0xff] %v9060_v59  ;;  %v9066_v2 = vpop.eup %5973  ;;  %5993 = vpow2.f32 %v2909_v22  ;;  %v2923_v19 = vmul.f32 1.442695, %v2608_v13  ;;  %v2925_v49 = vmul.f32 1.442695, %v2609_v37  ;;  %v2728_v10 = vsub.f32 %v11431_v26, %v9039_v55 }
 0x2c0   :  { %11430 = vst [vmem:[#allocation116_spill] sm:$0xff] %v9066_v2  ;;  %v9070_v56 = vpop.eup %5975  ;;  %v3348_v57 = vadd.f32 %v9003_v31, %v3347_v14  ;;  %v3357_v58 = vadd.f32 %v9046_v60, %v3356_v9  ;;  %5995 = vpow2.f32 %v2911_v40  ;;  %v2927_v1 = vmul.f32 1.442695, %v2610_v38  ;;  %v11436_v38 = vld [vmem:[#allocation66_spill] sm:$0xff]  ;;  %v11439_v9 = vld [vmem:[#allocation69_spill] sm:$0xff] }
 0x2c1   :  { %11432 = vst [vmem:[#allocation117_spill] sm:$0xff] %v9070_v56  ;;  %v9074_v8 = vpop.eup %5977  ;;  %5997 = vpow2.f32 %v2913_v21  ;;  %v2929_v41 = vmul.f32 1.442695, %v2611_v17  ;;  %v2931_v23 = vmul.f32 1.442695, %v2612_v36  ;;  %v2617_v40 = vsub.f32 %v11436_v38, %v8562_v28  ;;  %v11437_v21 = vld [vmem:[#allocation67_spill] sm:$0xff] }
 0x2c2   :  { %11433 = vst [vmem:[#allocation174_spill] sm:$0xff] %v9074_v8  ;;  %v3127_v48 = vmul.f32 1.442695, %v2710_v42  ;;  %v9076_v22 = vpop.eup %5979  ;;  %3349 = vadd.xlane.f32.xlu1 %v3348_v57  ;;  %v3358_v13 = vadd.f32 %v9054_v45, %v3357_v58  ;;  %5999 = vpow2.f32 %v2915_v4  ;;  %v3159_v37 = vmul.f32 1.442695, %v2726_v12  ;;  %v11440_v12 = vld [vmem:[#allocation71_spill] sm:$0xff] }
 0x2c3   :  { %11434 = vst [vmem:[#allocation175_spill] sm:$0xff] %v9076_v22  ;;  %v3131_v26 = vmul.f32 1.442695, %v2712_v63  ;;  %v9079_v24 = vpop.eup %5981  ;;  %6001 = vpow2.f32 %v2917_v39  ;;  %v3163_v14 = vmul.f32 1.442695, %v2728_v10  ;;  %v2618_v17 = vsub.f32 %v11437_v21, %v8562_v28  ;;  %v11441_v39 = vld [vmem:[#allocation125_spill] sm:$0xff] }
 0x2c4   :  { %11435 = vst [vmem:[#allocation176_spill] sm:$0xff] %v9079_v24  ;;  %v9085_v36 = vpop.eup %5983  ;;  %v3359_v42 = vadd.f32 %v9060_v59, %v3358_v13  ;;  %6003 = vpow2.f32 %v2919_v18  ;;  %v2619_v4 = vsub.f32 %v11439_v9, %v8562_v28  ;;  %v2620_v63 = vsub.f32 %v11440_v12, %v8562_v28  ;;  %v11442_v58 = vld [vmem:[#allocation126_spill] sm:$0xff]  ;;  %v11443_v21 = vld [vmem:[#allocation128_spill] sm:$0xff] }
 0x2c5   :  { %11438 = vst [vmem:[#allocation23_spill] sm:$0xff] %v9085_v36  ;;  %v5986_v57 = vpop.eup %5985  ;;  %6005 = vpow2.f32 %v2921_v54  ;;  %v2621_v10 = vsub.f32 %v11441_v39, %v8562_v28  ;;  %v2622_v38 = vsub.f32 %v11442_v58, %v8562_v28  ;;  %v2623_v31 = vsub.f32 %v11443_v21, %v8562_v28  ;;  %v11444_v9 = vld [vmem:[#allocation130_spill] sm:$0xff] }
 0x2c6   :  { %v5988_v45 = vpop.eup %5987  ;;  %v3360_v18 = vadd.f32 %v9066_v2, %v3359_v42  ;;  %v3453_v13 = vadd.f32 %v5986_v57, %v9010_v62  ;;  %6007 = vpow2.f32 %v2923_v19  ;;  %v2624_v12 = vsub.f32 %v11444_v9, %v8562_v28  ;;  %v11445_v39 = vld [vmem:[#allocation182_spill] sm:$0xff]  ;;  %v11446_v62 = vld [vmem:[#allocation183_spill] sm:$0xff] }
 0x2c7   :  { %v5990_v59 = vpop.eup %5989  ;;  %v3470_v54 = vadd.f32 %v5988_v45, %v9018_v43  ;;  %v3653_v15 = vpack.c.bf16 %v5988_v45, %v5986_v57  ;;  %6009 = vpow2.f32 %v2925_v49  ;;  %v2625_v58 = vsub.f32 %v11445_v39, %v8562_v28 }
 0x2c8   :  { %v5992_v61 = vpop.eup %5991  ;;  %v3361_v21 = vadd.f32 %v9070_v56, %v3360_v18  ;;  %v9106_v60 = vadd.f32 %v5990_v59, %v3453_v13  ;;  %6011 = vpow2.f32 %v2927_v1  ;;  %v2626_v19 = vsub.f32 %v11446_v62, %v8562_v28 }
 0x2c9   :  { %v9110_v42 = vpop.eup %5993  ;;  %3910 = vmatmul.mubr.bf16.gmra.mrb[144].mxu0 %v3653_v15  ;;  %v9112_v9 = vadd.f32 %v5992_v61, %v3470_v54  ;;  %v3655_v43 = vpack.c.bf16 %v5992_v61, %v5990_v59  ;;  %6013 = vpow2.f32 %v2929_v41  ;;  %v2627_v45 = vsub.f32 %v8324_v6, %v8562_v28 }
 0x2ca   :  { %v9116_v49 = vpop.eup %5995  ;;  %v3362_v57 = vadd.f32 %v9074_v8, %v3361_v21  ;;  %6015 = vpow2.f32 %v2931_v23  ;;  %v3371_v1 = vadd.f32 %v9110_v42, %v9052_v52  ;;  %v2628_v18 = vsub.f32 %v8333_v33, %v8562_v28 }
 0x2cb   :  { %v9123_v13 = vpop.eup %5997  ;;  %4007 = vmatmul.mubr.bf16.gmra.mrb[144].mxu1 %v3655_v43  ;;  %6017 = vpow2.f32 %v3127_v48  ;;  %v2941_v61 = vmul.f32 1.442695, %v2617_v40  ;;  %v2943_v15 = vmul.f32 1.442695, %v2618_v17  ;;  %v2945_v59 = vmul.f32 1.442695, %v2619_v4 }
 0x2cc   :  { %v9125_v41 = vpop.eup %5999  ;;  %v3363_v6 = vadd.f32 %v9076_v22, %v3362_v57  ;;  %v3372_v54 = vadd.f32 %v9116_v49, %v3371_v1  ;;  %6019 = vpow2.f32 %v3159_v37  ;;  %v2947_v23 = vmul.f32 1.442695, %v2620_v63  ;;  %v11450_v37 = vld [vmem:[#allocation30_spill] sm:$0xff]  ;;  %v11451_v63 = vld [vmem:[#allocation32_spill] sm:$0xff] }
 0x2cd   :  { %v9129_v39 = vpop.eup %6001  ;;  %6021 = vpow2.f32 %v3131_v26  ;;  %v2949_v52 = vmul.f32 1.442695, %v2621_v10  ;;  %v2951_v33 = vmul.f32 1.442695, %v2622_v38  ;;  %v9133_v28 = vadd.f32 %v8666_v53, %v8733_v5  ;;  %v11452_v53 = vld [vmem:[#allocation33_spill] sm:$0xff] }
 0x2ce   :  { %11447 = vst [vmem:[#allocation26_spill] sm:$0xff] %v9129_v39  ;;  %v9135_v48 = vpop.eup %6003  ;;  %v3364_v40 = vadd.f32 %v9079_v24, %v3363_v6  ;;  %v3373_v17 = vadd.f32 %v9123_v13, %v3372_v54  ;;  %6023 = vpow2.f32 %v3163_v14  ;;  %v2953_v4 = vmul.f32 1.442695, %v2623_v31  ;;  %v11454_v31 = vld [vmem:[#allocation36_spill] sm:$0xff] }
 0x2cf   :  { %11448 = vst [vmem:[#allocation27_spill] sm:$0xff] %v9135_v48  ;;  %v9139_v21 = vpop.eup %6005  ;;  %6025 = vpow2.f32 %v2941_v61  ;;  %v2709_v26 = vsub.f32 %v11450_v37, %v9037_v51  ;;  %v2725_v10 = vsub.f32 %v11451_v63, %v9039_v55  ;;  %v2711_v5 = vsub.f32 %v11452_v53, %v9037_v51 }
 0x2d0   :  { %11449 = vst [vmem:[#allocation29_spill] sm:$0xff] %v9139_v21  ;;  %v9147_v38 = vpop.eup %6007  ;;  %v3365_v62 = vadd.f32 %v9085_v36, %v3364_v40  ;;  %v3374_v43 = vadd.f32 %v9125_v41, %v3373_v17  ;;  %6027 = vpow2.f32 %v2943_v15  ;;  %v2727_v14 = vsub.f32 %v11454_v31, %v9039_v55  ;;  %v11467_v36 = vld [vmem:[#allocation185_spill] sm:$0xff] }
 0x2d1   :  { %11453 = vst [vmem:[#allocation58_spill] sm:$0xff] %v9147_v38  ;;  %v9153_v57 = vpop.eup %6009  ;;  %6029 = vpow2.f32 %v2945_v59  ;;  %v2955_v1 = vmul.f32 1.442695, %v2624_v12  ;;  %v2957_v61 = vmul.f32 1.442695, %v2625_v58  ;;  %v2640_v8 = vsub.f32 %v8065_v35, %v8574_v3  ;;  %v11469_v35 = vld [vmem:[#allocation186_spill] sm:$0xff] }
 0x2d2   :  { %11455 = vst [vmem:[#allocation121_spill] sm:$0xff] %v9153_v57  ;;  %v2959_v6 = vmul.f32 1.442695, %v2626_v19  ;;  %v9155_v54 = vpop.eup %6011  ;;  %3366 = vadd.xlane.f32.xlu0 %v3365_v62  ;;  %v3375_v37 = vadd.f32 %v9129_v39, %v3374_v43  ;;  %6031 = vpow2.f32 %v2947_v23  ;;  %v2961_v63 = vmul.f32 1.442695, %v2627_v45  ;;  %v11459_v19 = vld [vmem:[#allocation68_spill] sm:$0xff]  ;;  %v9210_v39 = vpop.xlane.xlu0 %2496 }
 0x2d3   :  { %11456 = vst [vmem:[#allocation123_spill] sm:$0xff] %v9155_v54  ;;  %v2963_v40 = vmul.f32 1.442695, %v2628_v18  ;;  %v9158_v53 = vpop.eup %6013  ;;  %6033 = vpow2.f32 %v2949_v52  ;;  %v3125_v15 = vmul.f32 1.442695, %v2709_v26  ;;  %v2633_v59 = vsub.f32 %v11459_v19, %v8574_v3  ;;  %v11460_v45 = vld [vmem:[#allocation70_spill] sm:$0xff] }
 0x2d4   :  { %11457 = vst [vmem:[#allocation177_spill] sm:$0xff] %v9158_v53  ;;  %v3157_v17 = vmul.f32 1.442695, %v2725_v10  ;;  %v3129_v31 = vmul.f32 1.442695, %v2711_v5  ;;  %v9160_v24 = vpop.eup %6015  ;;  %v3376_v12 = vadd.f32 %v9135_v48, %v3375_v37  ;;  %6035 = vpow2.f32 %v2951_v33  ;;  %v11461_v23 = vld [vmem:[#allocation72_spill] sm:$0xff] }
 0x2d5   :  { %11458 = vst [vmem:[#allocation178_spill] sm:$0xff] %v9160_v24  ;;  %v3161_v58 = vmul.f32 1.442695, %v2727_v14  ;;  %v9165_v62 = vpop.eup %6017  ;;  %6037 = vpow2.f32 %v2953_v4  ;;  %v2634_v18 = vsub.f32 %v11460_v45, %v8574_v3  ;;  %v2635_v52 = vsub.f32 %v11461_v23, %v8574_v3  ;;  %v11462_v26 = vld [vmem:[#allocation73_spill] sm:$0xff]  ;;  %v11463_v43 = vld [vmem:[#allocation127_spill] sm:$0xff] }
 0x2d6   :  { %v2636_v10 = vsub.f32 %v11462_v26, %v8574_v3  ;;  %v9173_v5 = vpop.eup %6019  ;;  %v3377_v33 = vadd.f32 %v9139_v21, %v3376_v12  ;;  %6039 = vpow2.f32 %v2955_v1  ;;  %v2637_v14 = vsub.f32 %v11463_v43, %v8574_v3  ;;  %v11464_v37 = vld [vmem:[#allocation129_spill] sm:$0xff]  ;;  %v11465_v23 = vld [vmem:[#allocation131_spill] sm:$0xff]  ;;  %v11466_v43 = vld [vmem:[#allocation184_spill] sm:$0xff] }
 0x2d7   :  { %v2638_v4 = vsub.f32 %v11464_v37, %v8574_v3  ;;  %v9180_v19 = vpop.eup %6021  ;;  %v3670_v45 = vpack.c.bf16 %v9173_v5, %v9165_v62  ;;  %6041 = vpow2.f32 %v2957_v61  ;;  %v2639_v26 = vsub.f32 %v11465_v23, %v8574_v3 }
 0x2d8   :  { %v9188_v12 = vpop.eup %6023  ;;  %v3378_v1 = vadd.f32 %v9147_v38, %v3377_v33  ;;  %6043 = vpow2.f32 %v2959_v6  ;;  %v2641_v37 = vsub.f32 %v11466_v43, %v8574_v3  ;;  %v2642_v22 = vsub.f32 %v11467_v36, %v8574_v3 }
 0x2d9   :  { %v9195_v21 = vpop.eup %6025  ;;  %3917 = vmatprep.mubr.bf16.mxu0 %v3670_v45  ;;  %v3672_v61 = vpack.c.bf16 %v9188_v12, %v9180_v19  ;;  %6045 = vpow2.f32 %v2961_v63  ;;  %v2643_v23 = vsub.f32 %v11469_v35, %v8574_v3  ;;  %v2644_v33 = vsub.f32 %v8339_v25, %v8574_v3  ;;  %v9214_v25 = vpop.xlane.xlu1 %2513 }
 0x2da   :  { %11468 = vst [vmem:[#allocation59_spill] sm:$0xff] %v9195_v21  ;;  %v9203_v6 = vpop.eup %6027  ;;  %v3379_v43 = vadd.f32 %v9153_v57, %v3378_v1  ;;  %6047 = vpow2.f32 %v2963_v40  ;;  %v3388_v36 = vadd.f32 %v9195_v21, %v9133_v28  ;;  %v2973_v2 = vmul.f32 1.442695, %v2633_v59 }
 0x2db   :  { %11470 = vst [vmem:[#allocation61_spill] sm:$0xff] %v9203_v6  ;;  %v9208_v45 = vpop.eup %6029  ;;  %4014 = vmatprep.mubr.bf16.mxu1 %v3672_v61  ;;  %6049 = vpow2.f32 %v3125_v15  ;;  %v2975_v63 = vmul.f32 1.442695, %v2634_v18  ;;  %v2977_v35 = vmul.f32 1.442695, %v2635_v52 }
 0x2dc   :  { %11471 = vst [vmem:[#allocation63_spill] sm:$0xff] %v9208_v45  ;;  %v2979_v38 = vmul.f32 1.442695, %v2636_v10  ;;  %v9212_v56 = vpop.eup %6031  ;;  %v3380_v3 = vadd.f32 %v9155_v54, %v3379_v43  ;;  %v3389_v40 = vadd.f32 %v9203_v6, %v3388_v36  ;;  %6051 = vpow2.f32 %v3157_v17  ;;  %v11475_v10 = vld [vmem:[#allocation39_spill] sm:$0xff]  ;;  %v11477_v17 = vld [vmem:[#allocation42_spill] sm:$0xff] }
 0x2dd   :  { %11472 = vst [vmem:[#allocation118_spill] sm:$0xff] %v9212_v56  ;;  %v2981_v28 = vmul.f32 1.442695, %v2637_v14  ;;  %v9218_v59 = vpop.eup %6033  ;;  %6053 = vpow2.f32 %v3129_v31  ;;  %v2983_v1 = vmul.f32 1.442695, %v2638_v4  ;;  %v2742_v43 = vsub.f32 %v11475_v10, %v9210_v39  ;;  %v11478_v31 = vld [vmem:[#allocation43_spill] sm:$0xff] }
 0x2de   :  { %11473 = vst [vmem:[#allocation119_spill] sm:$0xff] %v9218_v59  ;;  %v2985_v57 = vmul.f32 1.442695, %v2639_v26  ;;  %v2987_v61 = vmul.f32 1.442695, %v2640_v8  ;;  %v9220_v15 = vpop.eup %6035  ;;  %v3381_v18 = vadd.f32 %v9158_v53, %v3380_v3  ;;  %v3390_v52 = vadd.f32 %v9208_v45, %v3389_v40  ;;  %v11479_v8 = vld [vmem:[#allocation45_spill] sm:$0xff] }
 0x2df   :  { %11474 = vst [vmem:[#allocation22_spill] sm:$0xff] %v9220_v15  ;;  %6055 = vpow2.f32 %v3161_v58  ;;  %v9226_v54 = vpop.eup %6037  ;;  %v2758_v14 = vsub.f32 %v11477_v17, %v9214_v25  ;;  %v2744_v4 = vsub.f32 %v11478_v31, %v9210_v39  ;;  %v2760_v26 = vsub.f32 %v11479_v8, %v9214_v25 }
 0x2e0   :  { %11476 = vst [vmem:[#allocation24_spill] sm:$0xff] %v9226_v54  ;;  %6057 = vpow2.f32 %v2973_v2  ;;  %v9234_v36 = vpop.eup %6039  ;;  %v3382_v3 = vadd.f32 %v9160_v24, %v3381_v18  ;;  %v3391_v58 = vadd.f32 %v9212_v56, %v3390_v52  ;;  %v2989_v40 = vmul.f32 1.442695, %v2641_v37 }
 0x2e1   :  { %11480 = vst [vmem:[#allocation25_spill] sm:$0xff] %v9234_v36  ;;  %6059 = vpow2.f32 %v2975_v63  ;;  %v9238_v10 = vpop.eup %6041  ;;  %v2991_v2 = vmul.f32 1.442695, %v2642_v22  ;;  %v2993_v53 = vmul.f32 1.442695, %v2643_v23  ;;  %v3404_v8 = vadd.f32 %v8696_v50, %v8748_v29  ;;  %v11485_v23 = vld [vmem:[#allocation74_spill] sm:$0xff] }
 0x2e2   :  { %11481 = vst [vmem:[#allocation28_spill] sm:$0xff] %v9238_v10  ;;  %6061 = vpow2.f32 %v2977_v35  ;;  %v2995_v17 = vmul.f32 1.442695, %v2644_v33  ;;  %v9240_v48 = vpop.eup %6043  ;;  %3383 = vadd.xlane.f32.xlu1 %v3382_v3  ;;  %v3392_v31 = vadd.f32 %v9218_v59, %v3391_v58  ;;  %v3191_v18 = vmul.f32 1.442695, %v2742_v43  ;;  %v11487_v50 = vld [vmem:[#allocation77_spill] sm:$0xff] }
 0x2e3   :  { %11482 = vst [vmem:[#allocation60_spill] sm:$0xff] %v9240_v48  ;;  %6063 = vpow2.f32 %v2979_v38  ;;  %v9245_v24 = vpop.eup %6045  ;;  %v3223_v37 = vmul.f32 1.442695, %v2758_v14  ;;  %v3195_v63 = vmul.f32 1.442695, %v2744_v4  ;;  %v2649_v33 = vsub.f32 %v11485_v23, %v8605_v20  ;;  %v11486_v38 = vld [vmem:[#allocation75_spill] sm:$0xff] }
 0x2e4   :  { %11483 = vst [vmem:[#allocation62_spill] sm:$0xff] %v9245_v24  ;;  %6065 = vpow2.f32 %v2981_v28  ;;  %v3227_v52 = vmul.f32 1.442695, %v2760_v26  ;;  %v9247_v35 = vpop.eup %6047  ;;  %v3393_v22 = vadd.f32 %v9220_v15, %v3392_v31  ;;  %v2650_v3 = vsub.f32 %v11486_v38, %v8605_v20  ;;  %v11488_v28 = vld [vmem:[#allocation79_spill] sm:$0xff]  ;;  %v11489_v14 = vld [vmem:[#allocation132_spill] sm:$0xff]  ;;  %v11490_v23 = vld [vmem:[#allocation133_spill] sm:$0xff] }
 0x2e5   :  { %11484 = vst [vmem:[#allocation64_spill] sm:$0xff] %v9247_v35  ;;  %6067 = vpow2.f32 %v2983_v1  ;;  %v6050_v58 = vpop.eup %6049  ;;  %v2651_v29 = vsub.f32 %v11487_v50, %v8605_v20  ;;  %v2652_v43 = vsub.f32 %v11488_v28, %v8605_v20  ;;  %v2653_v4 = vsub.f32 %v11489_v14, %v8605_v20  ;;  %v11491_v50 = vld [vmem:[#allocation135_spill] sm:$0xff] }
 0x2e6   :  { %6069 = vpow2.f32 %v2985_v57  ;;  %v6052_v26 = vpop.eup %6051  ;;  %v3394_v1 = vadd.f32 %v9226_v54, %v3393_v22  ;;  %v3487_v31 = vadd.f32 %v6050_v58, %v9165_v62  ;;  %v2654_v38 = vsub.f32 %v11490_v23, %v8605_v20  ;;  %v11492_v62 = vld [vmem:[#allocation137_spill] sm:$0xff] }
 0x2e7   :  { %6071 = vpow2.f32 %v2987_v61  ;;  %v6054_v59 = vpop.eup %6053  ;;  %v3504_v57 = vadd.f32 %v6052_v26, %v9173_v5  ;;  %v3669_v15 = vpack.c.bf16 %v6052_v26, %v6050_v58  ;;  %v2655_v28 = vsub.f32 %v11491_v50, %v8605_v20 }
 0x2e8   :  { %6073 = vpow2.f32 %v2989_v40  ;;  %v3395_v14 = vadd.f32 %v9234_v36, %v3394_v1  ;;  %v9268_v21 = vadd.f32 %v6054_v59, %v3487_v31  ;;  %v2656_v61 = vsub.f32 %v11492_v62, %v8605_v20  ;;  %v11494_v40 = vld [vmem:[#allocation187_spill] sm:$0xff]  ;;  %v11496_v31 = vld [vmem:[#allocation188_spill] sm:$0xff] }
 0x2e9   :  { %v6056_v45 = vpop.eup %6055  ;;  %6075 = vpow2.f32 %v2991_v2  ;;  %3918 = vmatmul.mubr.bf16.gmra.mrb[148].mxu0 %v3669_v15  ;;  %v2657_v58 = vsub.f32 %v11494_v40, %v8605_v20  ;;  %v2658_v50 = vsub.f32 %v11496_v31, %v8605_v20 }
 0x2ea   :  { %v9272_v22 = vpop.eup %6057  ;;  %v9274_v23 = vadd.f32 %v6056_v45, %v3504_v57  ;;  %v3671_v5 = vpack.c.bf16 %v6056_v45, %v6054_v59  ;;  %6077 = vpow2.f32 %v2993_v53  ;;  %v3396_v1 = vadd.f32 %v9238_v10, %v3395_v14  ;;  %v11498_v45 = vld [vmem:[#allocation190_spill] sm:$0xff]  ;;  %v11499_v59 = vld [vmem:[#allocation192_spill] sm:$0xff] }
 0x2eb   :  { %11493 = vst [vmem:[#allocation65_spill] sm:$0xff] %v9272_v22  ;;  %v9278_v26 = vpop.eup %6059  ;;  %6079 = vpow2.f32 %v2995_v17  ;;  %v3405_v2 = vadd.f32 %v9272_v22, %v3404_v8  ;;  %v2659_v53 = vsub.f32 %v11498_v45, %v8605_v20  ;;  %v2660_v15 = vsub.f32 %v11499_v59, %v8605_v20  ;;  %v11526_v22 = vld [vmem:[#allocation191_spill] sm:$0xff] }
 0x2ec   :  { %11495 = vst [vmem:[#allocation120_spill] sm:$0xff] %v9278_v26  ;;  %v9284_v62 = vpop.eup %6061  ;;  %4015 = vmatmul.mubr.bf16.gmra.mrb[148].mxu1 %v3671_v5  ;;  %6081 = vpow2.f32 %v3191_v18  ;;  %v3005_v57 = vmul.f32 1.442695, %v2649_v33  ;;  %v3397_v17 = vadd.f32 %v9240_v48, %v3396_v1  ;;  %v3007_v14 = vmul.f32 1.442695, %v2650_v3 }
 0x2ed   :  { %11497 = vst [vmem:[#allocation122_spill] sm:$0xff] %v9284_v62  ;;  %v9290_v40 = vpop.eup %6063  ;;  %v3406_v8 = vadd.f32 %v9278_v26, %v3405_v2  ;;  %6083 = vpow2.f32 %v3223_v37  ;;  %v3009_v5 = vmul.f32 1.442695, %v2651_v29  ;;  %v3011_v18 = vmul.f32 1.442695, %v2652_v43  ;;  %v11504_v37 = vld [vmem:[#allocation38_spill] sm:$0xff]  ;;  %v9374_v26 = vpop.xlane.xlu0 %2530 }
 0x2ee   :  { %11500 = vst [vmem:[#allocation124_spill] sm:$0xff] %v9290_v40  ;;  %v9294_v31 = vpop.eup %6065  ;;  %6085 = vpow2.f32 %v3195_v63  ;;  %v3013_v10 = vmul.f32 1.442695, %v2653_v4  ;;  %v3398_v45 = vadd.f32 %v9245_v24, %v3397_v17  ;;  %v3015_v33 = vmul.f32 1.442695, %v2654_v38  ;;  %v11505_v63 = vld [vmem:[#allocation40_spill] sm:$0xff] }
 0x2ef   :  { %11501 = vst [vmem:[#allocation179_spill] sm:$0xff] %v9294_v31  ;;  %v9296_v54 = vpop.eup %6067  ;;  %v3407_v20 = vadd.f32 %v9284_v62, %v3406_v8  ;;  %6087 = vpow2.f32 %v3227_v52  ;;  %v3017_v1 = vmul.f32 1.442695, %v2655_v28  ;;  %v2741_v3 = vsub.f32 %v11504_v37, %v9210_v39  ;;  %v11507_v52 = vld [vmem:[#allocation41_spill] sm:$0xff]  ;;  %v11509_v8 = vld [vmem:[#allocation44_spill] sm:$0xff] }
 0x2f0   :  { %11502 = vst [vmem:[#allocation180_spill] sm:$0xff] %v9296_v54  ;;  %v9300_v59 = vpop.eup %6069  ;;  %6089 = vpow2.f32 %v3005_v57  ;;  %v2757_v29 = vsub.f32 %v11505_v63, %v9214_v25  ;;  %v3399_v4 = vadd.f32 %v9247_v35, %v3398_v45  ;;  %v2743_v38 = vsub.f32 %v11507_v52, %v9210_v39  ;;  %v11512_v35 = vld [vmem:[#allocation173_spill] sm:$0xff] }
 0x2f1   :  { %11503 = vst [vmem:[#allocation181_spill] sm:$0xff] %v9300_v59  ;;  %v9306_v43 = vpop.eup %6071  ;;  %v3408_v2 = vadd.f32 %v9290_v40, %v3407_v20  ;;  %6091 = vpow2.f32 %v3007_v14  ;;  %v3019_v28 = vmul.f32 1.442695, %v2656_v61  ;;  %v3021_v57 = vmul.f32 1.442695, %v2657_v58 }
 0x2f2   :  { %11506 = vst [vmem:[#allocation31_spill] sm:$0xff] %v9306_v43  ;;  %v9312_v17 = vpop.eup %6073  ;;  %6093 = vpow2.f32 %v3009_v5  ;;  %v2759_v37 = vsub.f32 %v11509_v8, %v9214_v25  ;;  %3400 = vadd.xlane.f32.xlu0 %v3399_v4  ;;  %v3023_v45 = vmul.f32 1.442695, %v2658_v50  ;;  %v3025_v20 = vmul.f32 1.442695, %v2659_v53  ;;  %v11514_v53 = vld [vmem:[#allocation172_spill] sm:$0xff] }
 0x2f3   :  { %11508 = vst [vmem:[#allocation34_spill] sm:$0xff] %v9312_v17  ;;  %v9316_v24 = vpop.eup %6075  ;;  %v3409_v63 = vadd.f32 %v9294_v31, %v3408_v2  ;;  %6095 = vpow2.f32 %v3011_v18  ;;  %v3027_v52 = vmul.f32 1.442695, %v2660_v15  ;;  %v3421_v5 = vadd.f32 %v11512_v35, %v8932_v27  ;;  %v11515_v18 = vld [vmem:[#allocation76_spill] sm:$0xff] }
 0x2f4   :  { %11510 = vst [vmem:[#allocation35_spill] sm:$0xff] %v9316_v24  ;;  %v9319_v14 = vpop.eup %6077  ;;  %6097 = vpow2.f32 %v3013_v10  ;;  %v3189_v61 = vmul.f32 1.442695, %v2741_v3  ;;  %v3221_v48 = vmul.f32 1.442695, %v2757_v29  ;;  %v2665_v2 = vsub.f32 %v11515_v18, %v11514_v53  ;;  %v11516_v10 = vld [vmem:[#allocation78_spill] sm:$0xff] }
 0x2f5   :  { %11511 = vst [vmem:[#allocation37_spill] sm:$0xff] %v9319_v14  ;;  %v9323_v58 = vpop.eup %6079  ;;  %v3410_v8 = vadd.f32 %v9296_v54, %v3409_v63  ;;  %6099 = vpow2.f32 %v3015_v33  ;;  %v3193_v4 = vmul.f32 1.442695, %v2743_v38  ;;  %v3225_v50 = vmul.f32 1.442695, %v2759_v37  ;;  %v11517_v35 = vld [vmem:[#allocation80_spill] sm:$0xff] }
 0x2f6   :  { %11513 = vst [vmem:[#allocation66_spill] sm:$0xff] %v9323_v58  ;;  %v9326_v36 = vpop.eup %6081  ;;  %6101 = vpow2.f32 %v3017_v1  ;;  %v2666_v15 = vsub.f32 %v11516_v10, %v11514_v53  ;;  %v2667_v33 = vsub.f32 %v11517_v35, %v11514_v53  ;;  %v11518_v3 = vld [vmem:[#allocation81_spill] sm:$0xff]  ;;  %v11519_v37 = vld [vmem:[#allocation134_spill] sm:$0xff]  ;;  %v11520_v18 = vld [vmem:[#allocation136_spill] sm:$0xff] }
 0x2f7   :  { %v9332_v31 = vpop.eup %6083  ;;  %v3411_v27 = vadd.f32 %v9300_v59, %v3410_v8  ;;  %6103 = vpow2.f32 %v3019_v28  ;;  %v2668_v29 = vsub.f32 %v11518_v3, %v11514_v53  ;;  %v2669_v63 = vsub.f32 %v11519_v37, %v11514_v53  ;;  %v11522_v35 = vld [vmem:[#allocation138_spill] sm:$0xff]  ;;  %v11523_v59 = vld [vmem:[#allocation139_spill] sm:$0xff]  ;;  %v11525_v37 = vld [vmem:[#allocation189_spill] sm:$0xff] }
 0x2f8   :  { %v9339_v38 = vpop.eup %6085  ;;  %v3686_v1 = vpack.c.bf16 %v9332_v31, %v9326_v36  ;;  %6105 = vpow2.f32 %v3021_v57  ;;  %v2670_v10 = vsub.f32 %v11520_v18, %v11514_v53  ;;  %v2671_v3 = vsub.f32 %v11522_v35, %v11514_v53 }
 0x2f9   :  { %v9347_v8 = vpop.eup %6087  ;;  %v3412_v28 = vadd.f32 %v9306_v43, %v3411_v27  ;;  %6107 = vpow2.f32 %v3023_v45  ;;  %v2672_v54 = vsub.f32 %v11523_v59, %v11514_v53  ;;  %v2673_v18 = vsub.f32 %v11525_v37, %v11514_v53  ;;  %v11527_v43 = vld [vmem:[#allocation193_spill] sm:$0xff] }
 0x2fa   :  { %11521 = vst [vmem:[#allocation67_spill] sm:$0xff] %v9347_v8  ;;  %v9354_v62 = vpop.eup %6089  ;;  %3925 = vmatprep.mubr.bf16.mxu0 %v3686_v1  ;;  %v3688_v57 = vpack.c.bf16 %v9347_v8, %v9339_v38  ;;  %6109 = vpow2.f32 %v3025_v20  ;;  %v2674_v27 = vsub.f32 %v11526_v22, %v11514_v53  ;;  %v2675_v1 = vsub.f32 %v11527_v43, %v11514_v53  ;;  %v11529_v20 = vld [vmem:[#allocation194_spill] sm:$0xff] }
 0x2fb   :  { %11524 = vst [vmem:[#allocation69_spill] sm:$0xff] %v9354_v62  ;;  %v9362_v45 = vpop.eup %6091  ;;  %v3413_v35 = vadd.f32 %v9312_v17, %v3412_v28  ;;  %6111 = vpow2.f32 %v3027_v52  ;;  %v3422_v59 = vadd.f32 %v9354_v62, %v3421_v5  ;;  %v2676_v37 = vsub.f32 %v11529_v20, %v11514_v53  ;;  %v9376_v28 = vpop.xlane.xlu1 %2547 }
 0x2fc   :  { %v9368_v40 = vpop.eup %6093  ;;  %4022 = vmatprep.mubr.bf16.mxu1 %v3688_v57  ;;  %6113 = vpow2.f32 %v3189_v61  ;;  %v3037_v8 = vmul.f32 1.442695, %v2665_v2  ;;  %v3039_v56 = vmul.f32 1.442695, %v2666_v15  ;;  %11530 = vst [vmem:[#allocation125_spill] sm:$0xff] %v9376_v28 }
 0x2fd   :  { %11528 = vst [vmem:[#allocation71_spill] sm:$0xff] %v9368_v40  ;;  %v9372_v22 = vpop.eup %6095  ;;  %v3414_v52 = vadd.f32 %v9316_v24, %v3413_v35  ;;  %v3423_v5 = vadd.f32 %v9362_v45, %v3422_v59  ;;  %6115 = vpow2.f32 %v3221_v48  ;;  %v3041_v43 = vmul.f32 1.442695, %v2667_v33  ;;  %v11534_v48 = vld [vmem:[#allocation47_spill] sm:$0xff]  ;;  %v11535_v35 = vld [vmem:[#allocation50_spill] sm:$0xff] }
 0x2fe   :  { %v9380_v17 = vpop.eup %6097  ;;  %6117 = vpow2.f32 %v3193_v4  ;;  %v3043_v61 = vmul.f32 1.442695, %v2668_v29  ;;  %v3045_v57 = vmul.f32 1.442695, %v2669_v63  ;;  %v3047_v53 = vmul.f32 1.442695, %v2670_v10 }
 0x2ff   :  { %11531 = vst [vmem:[#allocation126_spill] sm:$0xff] %v9380_v17  ;;  %v9382_v2 = vpop.eup %6099  ;;  %v3415_v15 = vadd.f32 %v9319_v14, %v3414_v52  ;;  %v3424_v20 = vadd.f32 %v9368_v40, %v3423_v5  ;;  %6119 = vpow2.f32 %v3225_v50  ;;  %v3049_v62 = vmul.f32 1.442695, %v2671_v3  ;;  %v11536_v29 = vld [vmem:[#allocation51_spill] sm:$0xff]  ;;  %v11538_v50 = vld [vmem:[#allocation53_spill] sm:$0xff] }
 0x300   :  { %11532 = vst [vmem:[#allocation128_spill] sm:$0xff] %v9382_v2  ;;  %v9386_v6 = vpop.eup %6101  ;;  %6121 = vpow2.f32 %v3037_v8  ;;  %v2774_v33 = vsub.f32 %v11534_v48, %v9374_v26  ;;  %v2790_v4 = vsub.f32 %v11535_v35, %v9376_v28  ;;  %v2776_v63 = vsub.f32 %v11536_v29, %v9374_v26 }
 0x301   :  { %11533 = vst [vmem:[#allocation130_spill] sm:$0xff] %v9386_v6  ;;  %v9394_v10 = vpop.eup %6103  ;;  %v3416_v59 = vadd.f32 %v9323_v58, %v3415_v15  ;;  %v3425_v52 = vadd.f32 %v9372_v22, %v3424_v20  ;;  %6123 = vpow2.f32 %v3039_v56  ;;  %v2792_v3 = vsub.f32 %v11538_v50, %v9376_v28  ;;  %v11542_v56 = vld [vmem:[#allocation3_spill] sm:$0xff] }
 0x302   :  { %11537 = vst [vmem:[#allocation182_spill] sm:$0xff] %v9394_v10  ;;  %v9400_v8 = vpop.eup %6105  ;;  %6125 = vpow2.f32 %v3041_v43  ;;  %v3051_v5 = vmul.f32 1.442695, %v2672_v54  ;;  %v3053_v48 = vmul.f32 1.442695, %v2673_v18  ;;  %v3438_v20 = vadd.f32 %v11542_v56, %v8936_v30 }
 0x303   :  { %11539 = vst [vmem:[#allocation183_spill] sm:$0xff] %v9400_v8  ;;  %v3055_v14 = vmul.f32 1.442695, %v2674_v27  ;;  %v9402_v35 = vpop.eup %6107  ;;  %3417 = vadd.xlane.f32.xlu1 %v3416_v59  ;;  %v3426_v29 = vadd.f32 %v9380_v17, %v3425_v52  ;;  %6127 = vpow2.f32 %v3043_v61  ;;  %v3057_v24 = vmul.f32 1.442695, %v2675_v1  ;;  %v11544_v1 = vld [vmem:[#allocation82_spill] sm:$0xff] }
 0x304   :  { %11540 = vst [vmem:[#allocation30_spill] sm:$0xff] %v9402_v35  ;;  %v3059_v15 = vmul.f32 1.442695, %v2676_v37  ;;  %v9405_v58 = vpop.eup %6109  ;;  %6129 = vpow2.f32 %v3045_v57  ;;  %v3255_v50 = vmul.f32 1.442695, %v2774_v33  ;;  %v2681_v37 = vsub.f32 %v11544_v1, %v8792_v32  ;;  %v11545_v61 = vld [vmem:[#allocation83_spill] sm:$0xff] }
 0x305   :  { %11541 = vst [vmem:[#allocation32_spill] sm:$0xff] %v9405_v58  ;;  %v3287_v40 = vmul.f32 1.442695, %v2790_v4  ;;  %v9409_v43 = vpop.eup %6111  ;;  %v3427_v54 = vadd.f32 %v9382_v2, %v3426_v29  ;;  %6131 = vpow2.f32 %v3047_v53  ;;  %v3259_v18 = vmul.f32 1.442695, %v2776_v63  ;;  %v11546_v52 = vld [vmem:[#allocation85_spill] sm:$0xff] }
 0x306   :  { %11543 = vst [vmem:[#allocation33_spill] sm:$0xff] %v9409_v43  ;;  %v3291_v27 = vmul.f32 1.442695, %v2792_v3  ;;  %v6114_v59 = vpop.eup %6113  ;;  %6133 = vpow2.f32 %v3049_v62  ;;  %v2682_v57 = vsub.f32 %v11545_v61, %v8792_v32  ;;  %v2683_v30 = vsub.f32 %v11546_v52, %v8792_v32  ;;  %v11547_v53 = vld [vmem:[#allocation87_spill] sm:$0xff]  ;;  %v11548_v1 = vld [vmem:[#allocation140_spill] sm:$0xff] }
 0x307   :  { %v6116_v33 = vpop.eup %6115  ;;  %v3428_v4 = vadd.f32 %v9386_v6, %v3427_v54  ;;  %v3521_v56 = vadd.f32 %v6114_v59, %v9326_v36  ;;  %6135 = vpow2.f32 %v3051_v5  ;;  %v2684_v63 = vsub.f32 %v11547_v53, %v8792_v32  ;;  %v11549_v36 = vld [vmem:[#allocation141_spill] sm:$0xff] }
 0x308   :  { %v6118_v3 = vpop.eup %6117  ;;  %v3538_v62 = vadd.f32 %v6116_v33, %v9332_v31  ;;  %v3685_v29 = vpack.c.bf16 %v6116_v33, %v6114_v59  ;;  %6137 = vpow2.f32 %v3053_v48  ;;  %v2685_v61 = vsub.f32 %v11548_v1, %v8792_v32  ;;  %v11551_v48 = vld [vmem:[#allocation143_spill] sm:$0xff] }
 0x309   :  { %v6120_v17 = vpop.eup %6119  ;;  %v3429_v52 = vadd.f32 %v9394_v10, %v3428_v4  ;;  %v9426_v2 = vadd.f32 %v6118_v3, %v3521_v56  ;;  %6139 = vpow2.f32 %v3055_v14  ;;  %v2686_v5 = vsub.f32 %v11549_v36, %v8792_v32  ;;  %v11552_v56 = vld [vmem:[#allocation145_spill] sm:$0xff] }
 0x30a   :  { %v9430_v54 = vpop.eup %6121  ;;  %3926 = vmatmul.mubr.bf16.gmra.mrb[152].mxu0 %v3685_v29  ;;  %v9432_v53 = vadd.f32 %v6120_v17, %v3538_v62  ;;  %v3687_v31 = vpack.c.bf16 %v6120_v17, %v6118_v3  ;;  %6141 = vpow2.f32 %v3057_v24  ;;  %v2687_v59 = vsub.f32 %v11551_v48, %v8792_v32  ;;  %v11554_v17 = vld [vmem:[#allocation195_spill] sm:$0xff]  ;;  %v11555_v3 = vld [vmem:[#allocation196_spill] sm:$0xff] }
 0x30b   :  { %11550 = vst [vmem:[#allocation36_spill] sm:$0xff] %v9430_v54  ;;  %v9436_v33 = vpop.eup %6123  ;;  %v3430_v4 = vadd.f32 %v9400_v8, %v3429_v52  ;;  %6143 = vpow2.f32 %v3059_v15  ;;  %v3439_v14 = vadd.f32 %v9430_v54, %v3438_v20  ;;  %v2688_v1 = vsub.f32 %v11552_v56, %v8792_v32 }
 0x30c   :  { %v9442_v36 = vpop.eup %6125  ;;  %4023 = vmatmul.mubr.bf16.gmra.mrb[152].mxu1 %v3687_v31  ;;  %6145 = vpow2.f32 %v3255_v50  ;;  %v2689_v24 = vsub.f32 %v11554_v17, %v8792_v32  ;;  %v2690_v62 = vsub.f32 %v11555_v3, %v8792_v32  ;;  %v3069_v29 = vmul.f32 1.442695, %v2681_v37  ;;  %v11557_v50 = vld [vmem:[#allocation198_spill] sm:$0xff]  ;;  %v11558_v17 = vld [vmem:[#allocation200_spill] sm:$0xff] }
 0x30d   :  { %11553 = vst [vmem:[#allocation68_spill] sm:$0xff] %v9442_v36  ;;  %v9448_v48 = vpop.eup %6127  ;;  %v3431_v15 = vadd.f32 %v9402_v35, %v3430_v4  ;;  %v3440_v20 = vadd.f32 %v9436_v33, %v3439_v14  ;;  %6147 = vpow2.f32 %v3287_v40  ;;  %v3071_v52 = vmul.f32 1.442695, %v2682_v57 }
 0x30e   :  { %v9452_v56 = vpop.eup %6129  ;;  %6149 = vpow2.f32 %v3259_v18  ;;  %v2691_v31 = vsub.f32 %v11557_v50, %v8792_v32  ;;  %v2692_v8 = vsub.f32 %v11558_v17, %v8792_v32  ;;  %v3073_v6 = vmul.f32 1.442695, %v2683_v30  ;;  %v11562_v30 = vld [vmem:[#allocation46_spill] sm:$0xff] }
 0x30f   :  { %11556 = vst [vmem:[#allocation70_spill] sm:$0xff] %v9452_v56  ;;  %v9458_v3 = vpop.eup %6131  ;;  %v3432_v37 = vadd.f32 %v9405_v58, %v3431_v15  ;;  %v3441_v4 = vadd.f32 %v9442_v36, %v3440_v20  ;;  %6151 = vpow2.f32 %v3291_v27  ;;  %v3075_v14 = vmul.f32 1.442695, %v2684_v63  ;;  %v11564_v63 = vld [vmem:[#allocation48_spill] sm:$0xff] }
 0x310   :  { %11559 = vst [vmem:[#allocation72_spill] sm:$0xff] %v9458_v3  ;;  %v9462_v40 = vpop.eup %6133  ;;  %6153 = vpow2.f32 %v3069_v29  ;;  %v3077_v57 = vmul.f32 1.442695, %v2685_v61  ;;  %v3079_v18 = vmul.f32 1.442695, %v2686_v5  ;;  %v2773_v15 = vsub.f32 %v11562_v30, %v9374_v26  ;;  %v11565_v61 = vld [vmem:[#allocation49_spill] sm:$0xff] }
 0x311   :  { %11560 = vst [vmem:[#allocation73_spill] sm:$0xff] %v9462_v40  ;;  %v3081_v35 = vmul.f32 1.442695, %v2687_v59  ;;  %v9464_v10 = vpop.eup %6135  ;;  %v3433_v50 = vadd.f32 %v9409_v43, %v3432_v37  ;;  %v3442_v32 = vadd.f32 %v9448_v48, %v3441_v4  ;;  %6155 = vpow2.f32 %v3071_v52  ;;  %v11567_v37 = vld [vmem:[#allocation52_spill] sm:$0xff] }
 0x312   :  { %11561 = vst [vmem:[#allocation127_spill] sm:$0xff] %v9464_v10  ;;  %v9470_v17 = vpop.eup %6137  ;;  %6157 = vpow2.f32 %v3073_v6  ;;  %v3083_v27 = vmul.f32 1.442695, %v2688_v1  ;;  %v2789_v29 = vsub.f32 %v11564_v63, %v9376_v28  ;;  %v2775_v5 = vsub.f32 %v11565_v61, %v9374_v26  ;;  %v11570_v43 = vld [vmem:[#allocation84_spill] sm:$0xff] }
 0x313   :  { %11563 = vst [vmem:[#allocation129_spill] sm:$0xff] %v9470_v17  ;;  %v9476_v59 = vpop.eup %6139  ;;  %3434 = vadd.xlane.f32.xlu0 %v3433_v50  ;;  %v3443_v20 = vadd.f32 %v9452_v56, %v3442_v32  ;;  %6159 = vpow2.f32 %v3075_v14  ;;  %v3085_v52 = vmul.f32 1.442695, %v2689_v24  ;;  %v2791_v4 = vsub.f32 %v11567_v37, %v9376_v28 }
 0x314   :  { %11566 = vst [vmem:[#allocation131_spill] sm:$0xff] %v9476_v59  ;;  %v9481_v30 = vpop.eup %6141  ;;  %6161 = vpow2.f32 %v3077_v57  ;;  %v3087_v6 = vmul.f32 1.442695, %v2690_v62  ;;  %v3089_v1 = vmul.f32 1.442695, %v2691_v31  ;;  %v3455_v50 = vadd.f32 %v9024_v46, %v9106_v60  ;;  %v11572_v60 = vld [vmem:[#allocation88_spill] sm:$0xff] }
 0x315   :  { %11568 = vst [vmem:[#allocation184_spill] sm:$0xff] %v9481_v30  ;;  %v3091_v58 = vmul.f32 1.442695, %v2692_v8  ;;  %v9483_v63 = vpop.eup %6143  ;;  %v3444_v61 = vadd.f32 %v9458_v3, %v3443_v20  ;;  %6163 = vpow2.f32 %v3079_v18  ;;  %v3253_v32 = vmul.f32 1.442695, %v2773_v15  ;;  %v11571_v18 = vld [vmem:[#allocation86_spill] sm:$0xff] }
 0x316   :  { %11569 = vst [vmem:[#allocation185_spill] sm:$0xff] %v9483_v63  ;;  %v9488_v14 = vpop.eup %6145  ;;  %6165 = vpow2.f32 %v3081_v35  ;;  %v3285_v24 = vmul.f32 1.442695, %v2789_v29  ;;  %v3257_v37 = vmul.f32 1.442695, %v2775_v5  ;;  %v2697_v57 = vsub.f32 %v11570_v43, %v8794_v47  ;;  %v11573_v43 = vld [vmem:[#allocation89_spill] sm:$0xff] }
 0x317   :  { %v9492_v62 = vpop.eup %6147  ;;  %v3445_v8 = vadd.f32 %v9462_v40, %v3444_v61  ;;  %6167 = vpow2.f32 %v3083_v27  ;;  %v3289_v31 = vmul.f32 1.442695, %v2791_v4  ;;  %v2698_v20 = vsub.f32 %v11571_v18, %v8794_v47  ;;  %v11575_v5 = vld [vmem:[#allocation142_spill] sm:$0xff]  ;;  %v11576_v61 = vld [vmem:[#allocation144_spill] sm:$0xff]  ;;  %v11579_v3 = vld [vmem:[#allocation147_spill] sm:$0xff] }
 0x318   :  { %v9497_v56 = vpop.eup %6149  ;;  %v3702_v46 = vpack.c.bf16 %v9492_v62, %v9488_v14  ;;  %6169 = vpow2.f32 %v3085_v52  ;;  %v2699_v35 = vsub.f32 %v11572_v60, %v8794_v47  ;;  %v2700_v15 = vsub.f32 %v11573_v43, %v8794_v47  ;;  %v11578_v60 = vld [vmem:[#allocation146_spill] sm:$0xff] }
 0x319   :  { %v9505_v29 = vpop.eup %6151  ;;  %v3446_v27 = vadd.f32 %v9464_v10, %v3445_v8  ;;  %6171 = vpow2.f32 %v3087_v6  ;;  %v2701_v4 = vsub.f32 %v11575_v5, %v8794_v47  ;;  %v2702_v18 = vsub.f32 %v11576_v61, %v8794_v47  ;;  %v11581_v10 = vld [vmem:[#allocation197_spill] sm:$0xff] }
 0x31a   :  { %11574 = vst [vmem:[#allocation186_spill] sm:$0xff] %v9505_v29  ;;  %v9512_v40 = vpop.eup %6153  ;;  %3933 = vmatprep.mubr.bf16.mxu0 %v3702_v46  ;;  %v3704_v52 = vpack.c.bf16 %v9505_v29, %v9497_v56  ;;  %6173 = vpow2.f32 %v3089_v1  ;;  %v2703_v43 = vsub.f32 %v11578_v60, %v8794_v47  ;;  %v2704_v8 = vsub.f32 %v11579_v3, %v8794_v47  ;;  %v11583_v1 = vld [vmem:[#allocation199_spill] sm:$0xff]  ;;  %v11584_v29 = vld [vmem:[#allocation201_spill] sm:$0xff] }
 0x31b   :  { %11577 = vst [vmem:[#allocation39_spill] sm:$0xff] %v9512_v40  ;;  %v9520_v6 = vpop.eup %6155  ;;  %v3447_v5 = vadd.f32 %v9470_v17, %v3446_v27  ;;  %6175 = vpow2.f32 %v3091_v58  ;;  %v3456_v61 = vadd.f32 %v9512_v40, %v3455_v50  ;;  %v2705_v46 = vsub.f32 %v11581_v10, %v8794_v47  ;;  %v11586_v10 = vld [vmem:[#allocation202_spill] sm:$0xff] }
 0x31c   :  { %11580 = vst [vmem:[#allocation42_spill] sm:$0xff] %v9520_v6  ;;  %v9526_v36 = vpop.eup %6157  ;;  %4030 = vmatprep.mubr.bf16.mxu1 %v3704_v52  ;;  %6177 = vpow2.f32 %v3253_v32  ;;  %v2706_v60 = vsub.f32 %v11583_v1, %v8794_v47  ;;  %v2707_v3 = vsub.f32 %v11584_v29, %v8794_v47  ;;  %v3101_v54 = vmul.f32 1.442695, %v2697_v57 }
 0x31d   :  { %11582 = vst [vmem:[#allocation43_spill] sm:$0xff] %v9526_v36  ;;  %v9532_v28 = vpop.eup %6159  ;;  %v3448_v58 = vadd.f32 %v9476_v59, %v3447_v5  ;;  %v3457_v50 = vadd.f32 %v9520_v6, %v3456_v61  ;;  %6179 = vpow2.f32 %v3285_v24  ;;  %v2708_v27 = vsub.f32 %v11586_v10, %v8794_v47 }
 0x31e   :  { %11585 = vst [vmem:[#allocation45_spill] sm:$0xff] %v9532_v28  ;;  %v9538_v17 = vpop.eup %6161  ;;  %6181 = vpow2.f32 %v3257_v37  ;;  %v3103_v32 = vmul.f32 1.442695, %v2698_v20  ;;  %v3105_v52 = vmul.f32 1.442695, %v2699_v35 }
 0x31f   :  { %11587 = vst [vmem:[#allocation74_spill] sm:$0xff] %v9538_v17  ;;  %v3107_v1 = vmul.f32 1.442695, %v2700_v15  ;;  %v9540_v40 = vpop.eup %6163  ;;  %v3449_v57 = vadd.f32 %v9481_v30, %v3448_v58  ;;  %v3458_v29 = vadd.f32 %v9526_v36, %v3457_v50  ;;  %6183 = vpow2.f32 %v3289_v31  ;;  %v11594_v50 = vld [vmem:[#allocation7_spill] sm:$0xff] }
 0x320   :  { %11588 = vst [vmem:[#allocation75_spill] sm:$0xff] %v9540_v40  ;;  %v3109_v5 = vmul.f32 1.442695, %v2701_v4  ;;  %v9544_v59 = vpop.eup %6165  ;;  %6185 = vpow2.f32 %v3101_v54  ;;  %v3111_v24 = vmul.f32 1.442695, %v2702_v18  ;;  %v3472_v4 = vadd.f32 %v9028_v34, %v9112_v9  ;;  %v11597_v34 = vld [vmem:[#allocation91_spill] sm:$0xff] }
 0x321   :  { %11589 = vst [vmem:[#allocation77_spill] sm:$0xff] %v9544_v59  ;;  %v3113_v61 = vmul.f32 1.442695, %v2703_v43  ;;  %v3115_v47 = vmul.f32 1.442695, %v2704_v8  ;;  %v9546_v10 = vpop.eup %6167  ;;  %v3450_v37 = vadd.f32 %v9483_v63, %v3449_v57  ;;  %v3459_v20 = vadd.f32 %v9532_v28, %v3458_v29  ;;  %v11593_v43 = vld [vmem:[#allocation2_spill] sm:$0xff] }
 0x322   :  { %11590 = vst [vmem:[#allocation79_spill] sm:$0xff] %v9546_v10  ;;  %v3117_v35 = vmul.f32 1.442695, %v2705_v46  ;;  %v3119_v15 = vmul.f32 1.442695, %v2706_v60  ;;  %v9550_v6 = vpop.eup %6169  ;;  %6187 = vpow2.f32 %v3103_v32  ;;  %v3594_v8 = vpack.c.bf16 %v8939_v44, %v11593_v43  ;;  %v11598_v32 = vld [vmem:[#allocation93_spill] sm:$0xff] }
 0x323   :  { %11591 = vst [vmem:[#allocation132_spill] sm:$0xff] %v9550_v6  ;;  %v3121_v58 = vmul.f32 1.442695, %v2707_v3  ;;  %v3123_v31 = vmul.f32 1.442695, %v2708_v27  ;;  %v9554_v54 = vpop.eup %6171  ;;  %3451 = vadd.xlane.f32.xlu1 %v3450_v37  ;;  %v3460_v18 = vadd.f32 %v9538_v17, %v3459_v20  ;;  %6189 = vpow2.f32 %v3105_v52  ;;  %v11596_v3 = vld [vmem:[#allocation90_spill] sm:$0xff] }
 0x324   :  { %11592 = vst [vmem:[#allocation133_spill] sm:$0xff] %v9554_v54  ;;  %v3596_v46 = vpack.c.bf16 %v8948_v11, %v11594_v50  ;;  %v9561_v60 = vpop.eup %6173  ;;  %6191 = vpow2.f32 %v3107_v1  ;;  %v2713_v27 = vsub.f32 %v11596_v3, %v9037_v51  ;;  %v2714_v9 = vsub.f32 %v11597_v34, %v9037_v51  ;;  %v11600_v44 = vld [vmem:[#allocation95_spill] sm:$0xff]  ;;  %v11601_v37 = vld [vmem:[#allocation148_spill] sm:$0xff]  ;;  %v11602_v43 = vld [vmem:[#allocation149_spill] sm:$0xff] }
 0x325   :  { %11595 = vst [vmem:[#allocation135_spill] sm:$0xff] %v9561_v60  ;;  %v2715_v57 = vsub.f32 %v11598_v32, %v9037_v51  ;;  %v9569_v29 = vpop.eup %6175  ;;  %v3461_v52 = vadd.f32 %v9540_v40, %v3460_v18  ;;  %6193 = vpow2.f32 %v3109_v5  ;;  %v2716_v11 = vsub.f32 %v11600_v44, %v9037_v51  ;;  %v11603_v3 = vld [vmem:[#allocation151_spill] sm:$0xff]  ;;  %v11604_v32 = vld [vmem:[#allocation153_spill] sm:$0xff] }
 0x326   :  { %11599 = vst [vmem:[#allocation137_spill] sm:$0xff] %v9569_v29  ;;  %v2717_v1 = vsub.f32 %v11601_v37, %v9037_v51  ;;  %v6178_v20 = vpop.eup %6177  ;;  %6195 = vpow2.f32 %v3111_v24  ;;  %v2718_v50 = vsub.f32 %v11602_v43, %v9037_v51  ;;  %v2719_v34 = vsub.f32 %v11603_v3, %v9037_v51  ;;  %v11605_v44 = vld [vmem:[#allocation203_spill] sm:$0xff] }
 0x327   :  { %v2720_v30 = vsub.f32 %v11604_v32, %v9037_v51  ;;  %v6180_v63 = vpop.eup %6179  ;;  %v3462_v5 = vadd.f32 %v9544_v59, %v3461_v52  ;;  %v3555_v18 = vadd.f32 %v6178_v20, %v9488_v14  ;;  %6197 = vpow2.f32 %v3113_v61  ;;  %v11606_v52 = vld [vmem:[#allocation204_spill] sm:$0xff] }
 0x328   :  { %v2721_v37 = vsub.f32 %v11605_v44, %v9037_v51  ;;  %v6182_v17 = vpop.eup %6181  ;;  %v3572_v24 = vadd.f32 %v6180_v63, %v9492_v62  ;;  %v3701_v40 = vpack.c.bf16 %v6180_v63, %v6178_v20  ;;  %6199 = vpow2.f32 %v3115_v47 }
 0x329   :  { %v3133_v43 = vmul.f32 1.442695, %v2713_v27  ;;  %v6184_v36 = vpop.eup %6183  ;;  %v3463_v3 = vadd.f32 %v9546_v10, %v3462_v5  ;;  %v9588_v28 = vadd.f32 %v6182_v17, %v3555_v18  ;;  %6201 = vpow2.f32 %v3117_v35  ;;  %v11607_v35 = vld [vmem:[#allocation206_spill] sm:$0xff] }
 0x32a   :  { %v2722_v32 = vsub.f32 %v11606_v52, %v9037_v51  ;;  %v9592_v14 = vpop.eup %6185  ;;  %3934 = vmatmul.mubr.bf16.gmra.mrb[156].mxu0 %v3701_v40  ;;  %v9594_v61 = vadd.f32 %v6184_v36, %v3572_v24  ;;  %v3703_v44 = vpack.c.bf16 %v6184_v36, %v6182_v17  ;;  %6203 = vpow2.f32 %v3119_v15  ;;  %v11608_v40 = vld [vmem:[#allocation208_spill] sm:$0xff]  ;;  %v11672_v10 = vld [vmem:[#allocation118_spill] sm:$0xff] }
 0x32b   :  { %v3135_v62 = vmul.f32 1.442695, %v2714_v9  ;;  %v3464_v63 = vadd.f32 %v9550_v6, %v3463_v3  ;;  %6205 = vpow2.f32 %v3121_v58  ;;  %v3473_v47 = vadd.f32 %v9592_v14, %v3472_v4  ;;  %4071 = vmatprep.mubr.bf16.mxu0 %v3594_v8 }
 0x32c   :  { %v3137_v27 = vmul.f32 1.442695, %v2715_v57  ;;  %v9598_v20 = vpop.eup %6187  ;;  %4031 = vmatmul.mubr.bf16.gmra.mrb[156].mxu1 %v3703_v44  ;;  %v2723_v5 = vsub.f32 %v11607_v35, %v9037_v51  ;;  %v2724_v18 = vsub.f32 %v11608_v40, %v9037_v51  ;;  %6207 = vpow2.f32 %v3133_v43 }
 0x32d   :  { %v3139_v36 = vmul.f32 1.442695, %v2716_v11  ;;  %v9604_v17 = vpop.eup %6189  ;;  %v3465_v15 = vadd.f32 %v9554_v54, %v3464_v63  ;;  %6209 = vpow2.f32 %v3123_v31  ;;  %v3474_v58 = vadd.f32 %v9598_v20, %v3473_v47  ;;  %4168 = vmatprep.mubr.bf16.mxu1 %v3596_v46  ;;  %v11666_v54 = vld [vmem:[#allocation217_spill] sm:$0xff] }
 0x32e   :  { %v3141_v4 = vmul.f32 1.442695, %v2717_v1  ;;  %v9608_v8 = vpop.eup %6191  ;;  %6211 = vpow2.f32 %v3135_v62  ;;  %v3143_v9 = vmul.f32 1.442695, %v2718_v50  ;;  %v3145_v57 = vmul.f32 1.442695, %v2719_v34 }
 0x32f   :  { %v3147_v24 = vmul.f32 1.442695, %v2720_v30  ;;  %v9610_v3 = vpop.eup %6193  ;;  %v3466_v51 = vadd.f32 %v9561_v60, %v3465_v15  ;;  %v3475_v11 = vadd.f32 %v9604_v17, %v3474_v58  ;;  %6213 = vpow2.f32 %v3137_v27  ;;  %v11611_v1 = vld [vmem:[#allocation5_spill] sm:$0xff]  ;;  %v11613_v34 = vld [vmem:[#allocation92_spill] sm:$0xff] }
 0x330   :  { %11609 = vst [vmem:[#allocation187_spill] sm:$0xff] %v9610_v3  ;;  %v3149_v43 = vmul.f32 1.442695, %v2721_v37  ;;  %v9614_v52 = vpop.eup %6195  ;;  %6215 = vpow2.f32 %v3139_v36  ;;  %v3151_v31 = vmul.f32 1.442695, %v2722_v32  ;;  %v3593_v44 = vpack.c.bf16 %v8934_v16, %v11611_v1  ;;  %v11615_v32 = vld [vmem:[#allocation4_spill] sm:$0xff] }
 0x331   :  { %11610 = vst [vmem:[#allocation188_spill] sm:$0xff] %v9614_v52  ;;  %v3153_v46 = vmul.f32 1.442695, %v2723_v5  ;;  %v9618_v62 = vpop.eup %6197  ;;  %v3467_v30 = vadd.f32 %v9569_v29, %v3466_v51  ;;  %v3476_v50 = vadd.f32 %v9608_v8, %v3475_v11  ;;  %6217 = vpow2.f32 %v3141_v4  ;;  %v11616_v16 = vld [vmem:[#allocation94_spill] sm:$0xff]  ;;  %v11618_v15 = vld [vmem:[#allocation96_spill] sm:$0xff]  ;;  %v11620_v4 = vld [vmem:[#allocation97_spill] sm:$0xff] }
 0x332   :  { %11612 = vst [vmem:[#allocation190_spill] sm:$0xff] %v9618_v62  ;;  %v2729_v63 = vsub.f32 %v11613_v34, %v9039_v55  ;;  %v9624_v47 = vpop.eup %6199  ;;  %6219 = vpow2.f32 %v3143_v9  ;;  %v3155_v37 = vmul.f32 1.442695, %v2724_v18  ;;  %4072 = vmatmul.mubr.bf16.vlgmr.msra.gmra.mrb[160].mxu0 %v3593_v44  ;;  %v3595_v27 = vpack.c.bf16 %v8945_v7, %v11615_v32  ;;  %v6452_v18 = vld [vmem:[%s10679_s1 + $0x200] sm:$0xff]   ;;  %v6453_v11 = vld [vmem:[%s10679_s1 + $0x248] sm:$0xff]  }
 0x333   :  { %11614 = vst [vmem:[#allocation192_spill] sm:$0xff] %v9624_v47  ;;  %v2730_v35 = vsub.f32 %v11616_v16, %v9039_v55  ;;  %v9630_v5 = vpop.eup %6201  ;;  %3468 = vadd.xlane.f32.xlu0 %v3467_v30  ;;  %v3477_v40 = vadd.f32 %v9610_v3, %v3476_v50  ;;  %6221 = vpow2.f32 %v3145_v57  ;;  %v3489_v36 = vadd.f32 %v9180_v19, %v9268_v21  ;;  %v11621_v57 = vld [vmem:[#allocation150_spill] sm:$0xff]  ;;  %v11622_v21 = vld [vmem:[#allocation152_spill] sm:$0xff] }
 0x334   :  { %11617 = vst [vmem:[#allocation38_spill] sm:$0xff] %v9630_v5  ;;  %v2731_v58 = vsub.f32 %v11618_v15, %v9039_v55  ;;  %5386 = vmatpush3.bf16.msra.mxu0 %v6452_v18  ;;  %v9640_v7 = vpop.eup %6203  ;;  %6223 = vpow2.f32 %v3147_v24  ;;  %4169 = vmatmul.mubr.bf16.vlgmr.msra.gmra.mrb[160].mxu1 %v3595_v27  ;;  %v2732_v9 = vsub.f32 %v11620_v4, %v9039_v55  ;;  %v11624_v24 = vld [vmem:[#allocation154_spill] sm:$0xff]  ;;  %v3165_v50 = vmul.f32 1.442695, %v2729_v63  ;;  %v11625_v27 = vld [vmem:[#allocation155_spill] sm:$0xff]  ;;  %v11626_v15 = vld [vmem:[#allocation205_spill] sm:$0xff] }
 0x335   :  { %11619 = vst [vmem:[#allocation40_spill] sm:$0xff] %v9640_v7  ;;  %v2733_v51 = vsub.f32 %v11621_v57, %v9039_v55  ;;  %v2734_v19 = vsub.f32 %v11622_v21, %v9039_v55  ;;  %5387 = vmatprep.subr.bf16.mxu0 %v6453_v11  ;;  %v9651_v1 = vpop.eup %6205  ;;  %v3478_v44 = vadd.f32 %v9614_v52, %v3477_v40  ;;  %6225 = vpow2.f32 %v3149_v43  ;;  %v6454_v34 = vld [vmem:[%s10679_s1 + $0x280] sm:$0xff]   ;;  %v6455_v43 = vld [vmem:[%s10679_s1 + $0x2c8] sm:$0xff]   ;;  %v11671_v3 = vld [vmem:[#allocation120_spill] sm:$0xff] }
 0x336   :  { %11623 = vst [vmem:[#allocation41_spill] sm:$0xff] %v9651_v1  ;;  %v2735_v30 = vsub.f32 %v11624_v24, %v9039_v55  ;;  %5450 = vmatpush3.bf16.msra.mxu1 %v6454_v34  ;;  %v9659_v32 = vpop.eup %6207  ;;  %6227 = vpow2.f32 %v3151_v31  ;;  %v2736_v16 = vsub.f32 %v11625_v27, %v9039_v55  ;;  %v2737_v18 = vsub.f32 %v11626_v15, %v9039_v55  ;;  %v11628_v31 = vld [vmem:[#allocation207_spill] sm:$0xff]  ;;  %v11629_v24 = vld [vmem:[#allocation209_spill] sm:$0xff]  ;;  %v11630_v27 = vld [vmem:[#allocation210_spill] sm:$0xff] }
 0x337   :  { %v3167_v40 = vmul.f32 1.442695, %v2730_v35  ;;  %5451 = vmatprep.subr.bf16.mxu1 %v6455_v43  ;;  %v9668_v63 = vpop.eup %6209  ;;  %v3479_v4 = vadd.f32 %v9618_v62, %v3478_v44  ;;  %6229 = vpow2.f32 %v3153_v46  ;;  %v3490_v57 = vadd.f32 %v9659_v32, %v3489_v36  ;;  %v6456_v11 = vld [vmem:[%s10679_s1 + $0x208] sm:$0xff]   ;;  %v6457_v36 = vld [vmem:[%s10679_s1 + $0x250] sm:$0xff]   ;;  %v11690_v52 = vld [vmem:[#allocation222_spill] sm:$0xff] }
 0x338   :  { %11627 = vst [vmem:[#allocation44_spill] sm:$0xff] %v9668_v63  ;;  %v2738_v21 = vsub.f32 %v11628_v31, %v9039_v55  ;;  %5388 = vmatpush3.bf16.msra.mxu0 %v6456_v11  ;;  %v9677_v35 = vpop.eup %6211  ;;  %v2739_v34 = vsub.f32 %v11629_v24, %v9039_v55  ;;  %v2740_v15 = vsub.f32 %v11630_v27, %v9039_v55  ;;  %6231 = vpow2.f32 %v3165_v50  ;;  %v6458_v24 = vld [vmem:[%s10679_s1 + $0x288] sm:$0xff]  }
 0x339   :  { %v3169_v46 = vmul.f32 1.442695, %v2731_v58  ;;  %5389 = vmatprep.subr.bf16.mxu0 %v6457_v36  ;;  %v9686_v44 = vpop.eup %6213  ;;  %v3480_v43 = vadd.f32 %v9624_v47, %v3479_v4  ;;  %6233 = vpow2.f32 %v3155_v37  ;;  %v3491_v31 = vadd.f32 %v9677_v35, %v3490_v57  ;;  %v6459_v36 = vld [vmem:[%s10679_s1 + $0x2d0] sm:$0xff]  }
 0x33a   :  { %v3171_v11 = vmul.f32 1.442695, %v2732_v9  ;;  %5452 = vmatpush3.bf16.msra.mxu1 %v6458_v24  ;;  %v9693_v55 = vpop.eup %6215  ;;  %6235 = vpow2.f32 %v3167_v40  ;;  %v3173_v58 = vmul.f32 1.442695, %v2733_v51  ;;  %v3175_v50 = vmul.f32 1.442695, %v2734_v19 }
 0x33b   :  { %v3177_v27 = vmul.f32 1.442695, %v2735_v30  ;;  %5453 = vmatprep.subr.bf16.mxu1 %v6459_v36  ;;  %v9698_v37 = vpop.eup %6217  ;;  %v3481_v9 = vadd.f32 %v9630_v5, %v3480_v43  ;;  %v3492_v4 = vadd.f32 %v9686_v44, %v3491_v31  ;;  %v3179_v57 = vmul.f32 1.442695, %v2736_v16  ;;  %v6460_v40 = vld [vmem:[%s10679_s1 + $0x210] sm:$0xff]   ;;  %v11632_v24 = vld [vmem:[#allocation57_spill] sm:$0xff] }
 0x33c   :  { %11631 = vst [vmem:[#allocation173_spill] sm:$0xff] %v9698_v37  ;;  %v3181_v60 = vmul.f32 1.442695, %v2737_v18  ;;  %5390 = vmatpush3.bf16.msra.mxu0 %v6460_v40  ;;  %v9705_v51 = vpop.eup %6219  ;;  %6237 = vpow2.f32 %v3169_v46  ;;  %v3183_v19 = vmul.f32 1.442695, %v2738_v21  ;;  %v3610_v30 = vpack.c.bf16 %v9116_v49, %v9035_v0  ;;  %v6461_v16 = vld [vmem:[%s10679_s1 + $0x258] sm:$0xff]  }
 0x33d   :  { %v3612_v36 = vpack.c.bf16 %v9125_v41, %v11632_v24  ;;  %5391 = vmatprep.subr.bf16.mxu0 %v6461_v16  ;;  %v9714_v18 = vpop.eup %6221  ;;  %v3482_v43 = vadd.f32 %v9640_v7, %v3481_v9  ;;  %v3493_v31 = vadd.f32 %v9693_v55, %v3492_v4  ;;  %6239 = vpow2.f32 %v3171_v11  ;;  %v6462_v0 = vld [vmem:[%s10679_s1 + $0x290] sm:$0xff]   ;;  %v11633_v9 = vld [vmem:[#allocation98_spill] sm:$0xff]  ;;  %v11635_v24 = vld [vmem:[#allocation99_spill] sm:$0xff] }
 0x33e   :  { %v3185_v46 = vmul.f32 1.442695, %v2739_v34  ;;  %5454 = vmatpush3.bf16.msra.mxu1 %v6462_v0  ;;  %v9721_v49 = vpop.eup %6223  ;;  %6241 = vpow2.f32 %v3173_v58  ;;  %v9723_v41 = vmul.f32 1.442695, %v2740_v15  ;;  %v3506_v21 = vadd.f32 %v9188_v12, %v9274_v23  ;;  %4079 = vmatprep.mubr.bf16.mxu0 %v3610_v30  ;;  %v6463_v15 = vld [vmem:[%s10679_s1 + $0x218] sm:$0xff]   ;;  %v6465_v0 = vld [vmem:[%s10679_s1 + $0x260] sm:$0xff]  }
 0x33f   :  { %4176 = vmatprep.mubr.bf16.mxu1 %v3612_v36  ;;  %v2745_v4 = vsub.f32 %v11633_v9, %v9210_v39  ;;  %v9729_v11 = vpop.eup %6225  ;;  %v3483_v34 = vadd.f32 %v9651_v1, %v3482_v43  ;;  %v3494_v40 = vadd.f32 %v9698_v37, %v3493_v31  ;;  %6243 = vpow2.f32 %v3175_v50  ;;  %v6464_v12 = vld [vmem:[%s10679_s1 + $0x2d8] sm:$0xff]   ;;  %v11638_v50 = vld [vmem:[#allocation103_spill] sm:$0xff]  ;;  %v11639_v43 = vld [vmem:[#allocation156_spill] sm:$0xff] }
 0x340   :  { %11634 = vst [vmem:[#allocation172_spill] sm:$0xff] %v9729_v11  ;;  %v2746_v58 = vsub.f32 %v11635_v24, %v9210_v39  ;;  %5392 = vmatpush3.bf16.msra.mxu0 %v6463_v15  ;;  %5455 = vmatprep.subr.bf16.mxu1 %v6464_v12  ;;  %v9741_v23 = vpop.eup %6227  ;;  %6245 = vpow2.f32 %v3177_v27  ;;  %v11637_v30 = vld [vmem:[#allocation101_spill] sm:$0xff]  ;;  %v2748_v16 = vsub.f32 %v11638_v50, %v9210_v39 }
 0x341   :  { %11636 = vst [vmem:[#allocation76_spill] sm:$0xff] %v9741_v23  ;;  %v2747_v36 = vsub.f32 %v11637_v30, %v9210_v39  ;;  %v2749_v31 = vsub.f32 %v11639_v43, %v9210_v39  ;;  %5393 = vmatprep.subr.bf16.mxu0 %v6465_v0  ;;  %v9752_v9 = vpop.eup %6229  ;;  %v3484_v24 = vadd.f32 %v9668_v63, %v3483_v34  ;;  %6247 = vpow2.f32 %v3179_v57  ;;  %v11641_v15 = vld [vmem:[#allocation157_spill] sm:$0xff]  ;;  %v11642_v43 = vld [vmem:[#allocation159_spill] sm:$0xff]  ;;  %v6467_v57 = vld [vmem:[%s10679_s1 + $0x2e0] sm:$0xff]  }
 0x342   :  { %11640 = vst [vmem:[#allocation78_spill] sm:$0xff] %v9752_v9  ;;  %v3495_v27 = vadd.f32 %v9705_v51, %v3494_v40  ;;  %v2750_v12 = vsub.f32 %v11641_v15, %v9210_v39  ;;  %v6466_v30 = vld [vmem:[%s10679_s1 + $0x298] sm:$0xff]   ;;  %v9761_v50 = vpop.eup %6231  ;;  %6249 = vpow2.f32 %v3181_v60  ;;  %v2751_v0 = vsub.f32 %v11642_v43, %v9210_v39  ;;  %v6468_v43 = vld [vmem:[%s10679_s1 + $0x220] sm:$0xff]  }
 0x343   :  { %5456 = vmatpush3.bf16.msra.mxu1 %v6466_v30  ;;  %v11643_v1 = vld [vmem:[#allocation161_spill] sm:$0xff]  ;;  %v3197_v5 = vmul.f32 1.442695, %v2745_v4  ;;  %v9770_v40 = vpop.eup %6233  ;;  %3485 = vadd.xlane.f32.xlu1 %v3484_v24  ;;  %6251 = vpow2.f32 %v3183_v19  ;;  %v3507_v60 = vadd.f32 %v9761_v50, %v3506_v21  ;;  %v3199_v30 = vmul.f32 1.442695, %v2746_v58  ;;  %v11645_v4 = vld [vmem:[#allocation211_spill] sm:$0xff] }
 0x344   :  { %v2752_v34 = vsub.f32 %v11643_v1, %v9210_v39  ;;  %5457 = vmatprep.subr.bf16.mxu1 %v6467_v57  ;;  %11644 = vst [vmem:[#allocation80_spill] sm:$0xff] %v9770_v40  ;;  %v3496_v15 = vadd.f32 %v9714_v18, %v3495_v27  ;;  %5394 = vmatpush3.bf16.msra.mxu0 %v6468_v43  ;;  %v9777_v1 = vpop.eup %6235  ;;  %v11646_v57 = vld [vmem:[#allocation212_spill] sm:$0xff]  ;;  %v3201_v24 = vmul.f32 1.442695, %v2747_v36  ;;  %v6469_v19 = vld [vmem:[%s10679_s1 + $0x268] sm:$0xff]   ;;  %v6470_v43 = vld [vmem:[%s10679_s1 + $0x2a0] sm:$0xff]  }
 0x345   :  { %v2753_v6 = vsub.f32 %v11645_v4, %v9210_v39  ;;  %v2754_v63 = vsub.f32 %v11646_v57, %v9210_v39  ;;  %6253 = vpow2.f32 %v3197_v5  ;;  %5395 = vmatprep.subr.bf16.mxu0 %v6469_v19  ;;  %v3508_v58 = vadd.f32 %v9777_v1, %v3507_v60  ;;  %v11647_v5 = vld [vmem:[#allocation214_spill] sm:$0xff]  ;;  %v11648_v57 = vld [vmem:[#allocation216_spill] sm:$0xff] }
 0x346   :  { %v3497_v21 = vadd.f32 %v9721_v49, %v3496_v15  ;;  %6255 = vpow2.f32 %v3185_v46  ;;  %v3203_v27 = vmul.f32 1.442695, %v2748_v16  ;;  %v9791_v4 = vpop.eup %6237  ;;  %v2755_v36 = vsub.f32 %v11647_v5, %v9210_v39  ;;  %v6471_v46 = vld [vmem:[%s10679_s1 + $0x2e8] sm:$0xff]  }
 0x347   :  { %5458 = vmatpush3.bf16.msra.mxu1 %v6470_v43  ;;  %v2756_v29 = vsub.f32 %v11648_v57, %v9210_v39  ;;  %6257 = vpow2.f32 %v3199_v30  ;;  %v3205_v19 = vmul.f32 1.442695, %v2749_v31  ;;  %v9800_v16 = vpop.eup %6239  ;;  %v3509_v60 = vadd.f32 %v9791_v4, %v3508_v58  ;;  %v6472_v39 = vld [vmem:[%s10679_s1 + $0x228] sm:$0xff]  }
 0x348   :  { %5459 = vmatprep.subr.bf16.mxu1 %v6471_v46  ;;  %v3498_v15 = vadd.f32 %v9729_v11, %v3497_v21  ;;  %6259 = vpow2.f32 %v9723_v41  ;;  %v3207_v43 = vmul.f32 1.442695, %v2750_v12  ;;  %5396 = vmatpush3.bf16.msra.mxu0 %v6472_v39  ;;  %v9808_v31 = vpop.eup %6241  ;;  %v3209_v30 = vmul.f32 1.442695, %v2751_v0  ;;  %v6473_v21 = vld [vmem:[%s10679_s1 + $0x270] sm:$0xff]   ;;  %v11650_v46 = vld [vmem:[#allocation55_spill] sm:$0xff] }
 0x349   :  { %11649 = vst [vmem:[#allocation81_spill] sm:$0xff] %v9808_v31  ;;  %6261 = vpow2.f32 %v3201_v24  ;;  %v3211_v5 = vmul.f32 1.442695, %v2752_v34  ;;  %v3213_v57 = vmul.f32 1.442695, %v2753_v6  ;;  %5397 = vmatprep.subr.bf16.mxu0 %v6473_v21  ;;  %v9813_v41 = vpop.eup %6243  ;;  %v3510_v58 = vadd.f32 %v9800_v16, %v3509_v60  ;;  %v6474_v0 = vld [vmem:[%s10679_s1 + $0x2a8] sm:$0xff]  }
 0x34a   :  { %v3499_v12 = vadd.f32 %v9741_v23, %v3498_v15  ;;  %6263 = vpow2.f32 %v3203_v27  ;;  %v3609_v39 = vpack.c.bf16 %v9110_v42, %v11650_v46  ;;  %v9822_v6 = vpop.eup %6245  ;;  %v3215_v34 = vmul.f32 1.442695, %v2754_v63  ;;  %v11651_v21 = vld [vmem:[#allocation56_spill] sm:$0xff] }
 0x34b   :  { %5460 = vmatpush3.bf16.msra.mxu1 %v6474_v0  ;;  %6265 = vpow2.f32 %v3205_v19  ;;  %v3217_v24 = vmul.f32 1.442695, %v2755_v36  ;;  %v3611_v11 = vpack.c.bf16 %v9123_v13, %v11651_v21  ;;  %v6475_v27 = vld [vmem:[%s10679_s1 + $0x2f0] sm:$0xff]   ;;  %v9829_v15 = vpop.eup %6247  ;;  %v3511_v60 = vadd.f32 %v9808_v31, %v3510_v58  ;;  %v11654_v0 = vld [vmem:[#allocation102_spill] sm:$0xff]  ;;  %v6478_v58 = vld [vmem:[%s10679_s1 + $0x278] sm:$0xff]  }
 0x34c   :  { %5461 = vmatprep.subr.bf16.mxu1 %v6475_v27  ;;  %v3500_v42 = vadd.f32 %v9752_v9, %v3499_v12  ;;  %6267 = vpow2.f32 %v3207_v43  ;;  %v3523_v19 = vadd.f32 %v9339_v38, %v9426_v2  ;;  %4080 = vmatmul.mubr.bf16.gmra.mrb[164].mxu0 %v3609_v39  ;;  %v9835_v63 = vpop.eup %6249  ;;  %v3219_v13 = vmul.f32 1.442695, %v2756_v29  ;;  %v11653_v36 = vld [vmem:[#allocation100_spill] sm:$0xff]  ;;  %v11657_v27 = vld [vmem:[#allocation105_spill] sm:$0xff] }
 0x34d   :  { %11652 = vst [vmem:[#allocation134_spill] sm:$0xff] %v9835_v63  ;;  %6269 = vpow2.f32 %v3209_v30  ;;  %4177 = vmatmul.mubr.bf16.gmra.mrb[164].mxu1 %v3611_v11  ;;  %v2761_v46 = vsub.f32 %v11653_v36, %v9214_v25  ;;  %v2762_v21 = vsub.f32 %v11654_v0, %v9214_v25  ;;  %v6476_v12 = vld [vmem:[%s10679_s1 + $0x230] sm:$0xff]   ;;  %v9844_v43 = vpop.eup %6251  ;;  %v3512_v2 = vadd.f32 %v9813_v41, %v3511_v60 }
 0x34e   :  { %5398 = vmatpush3.bf16.msra.mxu0 %v6476_v12  ;;  %11655 = vst [vmem:[#allocation136_spill] sm:$0xff] %v9844_v43  ;;  %v3501_v38 = vadd.f32 %v9770_v40, %v3500_v42  ;;  %6271 = vpow2.f32 %v3211_v5  ;;  %v11656_v29 = vld [vmem:[#allocation104_spill] sm:$0xff]  ;;  %v2764_v42 = vsub.f32 %v11657_v27, %v9214_v25  ;;  %v11658_v5 = vld [vmem:[#allocation158_spill] sm:$0xff]  ;;  %v6479_v12 = vld [vmem:[%s10679_s1 + $0x2f8] sm:$0xff]   ;;  %v2771_v31 = vsub.f32 %v11666_v54, %v9214_v25 }
 0x34f   :  { %v2763_v11 = vsub.f32 %v11656_v29, %v9214_v25  ;;  %v6477_v30 = vld [vmem:[%s10679_s1 + $0x2b0] sm:$0xff]   ;;  %5399 = vmatprep.subr.bf16.mxu0 %v6478_v58  ;;  %v9856_v39 = vpop.eup %6253  ;;  %6273 = vpow2.f32 %v3213_v57  ;;  %v2765_v60 = vsub.f32 %v11658_v5, %v9214_v25  ;;  %v11661_v58 = vld [vmem:[#allocation162_spill] sm:$0xff]  ;;  %v3229_v23 = vmul.f32 1.442695, %v2761_v46 }
 0x350   :  { %5462 = vmatpush3.bf16.msra.mxu1 %v6477_v30  ;;  %v11659_v36 = vld [vmem:[#allocation160_spill] sm:$0xff]  ;;  %v9867_v29 = vpop.eup %6255  ;;  %3502 = vadd.xlane.f32.xlu0 %v3501_v38  ;;  %v3513_v30 = vadd.f32 %v9822_v6, %v3512_v2  ;;  %6275 = vpow2.f32 %v3215_v34  ;;  %v3524_v57 = vadd.f32 %v9856_v39, %v3523_v19  ;;  %v2767_v27 = vsub.f32 %v11661_v58, %v9214_v25  ;;  %v6480_v38 = vld [vmem:[%s10679_s1 + $0x238] sm:$0xff]   ;;  %v6482_v46 = vld [vmem:[%s10679_s1 + $0x340] sm:$0xff]  }
 0x351   :  { %v2766_v0 = vsub.f32 %v11659_v36, %v9214_v25  ;;  %5463 = vmatprep.subr.bf16.mxu1 %v6479_v12  ;;  %11660 = vst [vmem:[#allocation138_spill] sm:$0xff] %v9867_v29  ;;  %v9873_v5 = vpop.eup %6257  ;;  %6277 = vpow2.f32 %v3217_v24  ;;  %v11662_v36 = vld [vmem:[#allocation163_spill] sm:$0xff]  ;;  %v3231_v7 = vmul.f32 1.442695, %v2762_v21  ;;  %v3233_v12 = vmul.f32 1.442695, %v2763_v11 }
 0x352   :  { %v2768_v9 = vsub.f32 %v11662_v36, %v9214_v25  ;;  %5400 = vmatpush3.bf16.msra.mxu0 %v6480_v38  ;;  %v9880_v2 = vpop.eup %6259  ;;  %v3514_v34 = vadd.f32 %v9829_v15, %v3513_v30  ;;  %6279 = vpow2.f32 %v3219_v13  ;;  %v3525_v19 = vadd.f32 %v9873_v5, %v3524_v57  ;;  %v6481_v24 = vld [vmem:[%s10679_s1 + $0x2b8] sm:$0xff]   ;;  %v11665_v13 = vld [vmem:[#allocation215_spill] sm:$0xff]  ;;  %v6483_v57 = vld [vmem:[%s10679_s1 + $0x3c0] sm:$0xff]  }
 0x353   :  { %11663 = vst [vmem:[#allocation139_spill] sm:$0xff] %v9880_v2  ;;  %5513 = vmatprep.subr.bf16.mxu0 %v6482_v46  ;;  %v9890_v21 = vpop.eup %6261  ;;  %v11664_v58 = vld [vmem:[#allocation213_spill] sm:$0xff]  ;;  %v2770_v30 = vsub.f32 %v11665_v13, %v9214_v25  ;;  %6281 = vpow2.f32 %v3229_v23  ;;  %v3235_v11 = vmul.f32 1.442695, %v2764_v42  ;;  %v11668_v23 = vld [vmem:[#allocation218_spill] sm:$0xff] }
 0x354   :  { %5464 = vmatpush3.bf16.msra.mxu1 %v6481_v24  ;;  %v2769_v36 = vsub.f32 %v11664_v58, %v9214_v25  ;;  %v9899_v38 = vpop.eup %6263  ;;  %v3515_v24 = vadd.f32 %v9835_v63, %v3514_v34  ;;  %v3526_v46 = vadd.f32 %v9890_v21, %v3525_v19  ;;  %v3237_v58 = vmul.f32 1.442695, %v2765_v60  ;;  %v11670_v60 = vld [vmem:[#allocation61_spill] sm:$0xff] }
 0x355   :  { %5577 = vmatprep.subr.bf16.mxu1 %v6483_v57  ;;  %v9905_v37 = vpop.eup %6265  ;;  %v2772_v42 = vsub.f32 %v11668_v23, %v9214_v25  ;;  %6283 = vpow2.f32 %v3231_v7  ;;  %v3239_v13 = vmul.f32 1.442695, %v2766_v0  ;;  %v3241_v62 = vmul.f32 1.442695, %v2767_v27  ;;  %v11673_v25 = vld [vmem:[#allocation124_spill] sm:$0xff] }
 0x356   :  { %11667 = vst [vmem:[#allocation189_spill] sm:$0xff] %v9905_v37  ;;  %v9909_v59 = vpop.eup %6267  ;;  %v3516_v57 = vadd.f32 %v9844_v43, %v3515_v24  ;;  %v3527_v34 = vadd.f32 %v9899_v38, %v3526_v46  ;;  %6285 = vpow2.f32 %v3233_v12  ;;  %v3243_v19 = vmul.f32 1.442695, %v2768_v9  ;;  %v11689_v43 = vld [vmem:[#allocation220_spill] sm:$0xff] }
 0x357   :  { %v9913_v63 = vpop.eup %6269  ;;  %6287 = vpow2.f32 %v3235_v11  ;;  %v3245_v54 = vmul.f32 1.442695, %v2769_v36  ;;  %v3626_v47 = vpack.c.bf16 %v11671_v3, %v11670_v60  ;;  %v3628_v7 = vpack.c.bf16 %v11673_v25, %v11672_v10  ;;  %v11676_v36 = vld [vmem:[#allocation106_spill] sm:$0xff]  ;;  %v11677_v11 = vld [vmem:[#allocation107_spill] sm:$0xff] }
 0x358   :  { %11669 = vst [vmem:[#allocation191_spill] sm:$0xff] %v9913_v63  ;;  %v9919_v0 = vpop.eup %6271  ;;  %v3517_v27 = vadd.f32 %v9867_v29, %v3516_v57  ;;  %v3528_v24 = vadd.f32 %v9905_v37, %v3527_v34  ;;  %6289 = vpow2.f32 %v3237_v58  ;;  %v3247_v46 = vmul.f32 1.442695, %v2770_v30  ;;  %v11679_v30 = vld [vmem:[#allocation67_spill] sm:$0xff] }
 0x359   :  { %11674 = vst [vmem:[#allocation193_spill] sm:$0xff] %v9919_v0  ;;  %v9923_v12 = vpop.eup %6273  ;;  %6291 = vpow2.f32 %v3239_v13  ;;  %v3249_v9 = vmul.f32 1.442695, %v2771_v31  ;;  %4087 = vmatprep.mubr.bf16.mxu0 %v3626_v47  ;;  %4184 = vmatprep.mubr.bf16.mxu1 %v3628_v7  ;;  %v2777_v3 = vsub.f32 %v11676_v36, %v9374_v26  ;;  %v2778_v10 = vsub.f32 %v11677_v11, %v9374_v26  ;;  %v11681_v47 = vld [vmem:[#allocation109_spill] sm:$0xff] }
 0x35a   :  { %11675 = vst [vmem:[#allocation194_spill] sm:$0xff] %v9923_v12  ;;  %v9929_v23 = vpop.eup %6275  ;;  %v3518_v57 = vadd.f32 %v9880_v2, %v3517_v27  ;;  %v3529_v34 = vadd.f32 %v9909_v59, %v3528_v24  ;;  %6293 = vpow2.f32 %v3241_v62  ;;  %v3540_v58 = vadd.f32 %v11679_v30, %v9432_v53  ;;  %v11683_v27 = vld [vmem:[#allocation111_spill] sm:$0xff]  ;;  %v11684_v53 = vld [vmem:[#allocation164_spill] sm:$0xff] }
 0x35b   :  { %11678 = vst [vmem:[#allocation47_spill] sm:$0xff] %v9929_v23  ;;  %v9935_v13 = vpop.eup %6277  ;;  %6295 = vpow2.f32 %v3243_v19  ;;  %v2779_v31 = vsub.f32 %v11681_v47, %v9374_v26  ;;  %v3251_v7 = vmul.f32 1.442695, %v2772_v42  ;;  %v2780_v24 = vsub.f32 %v11683_v27, %v9374_v26  ;;  %v11686_v47 = vld [vmem:[#allocation167_spill] sm:$0xff] }
 0x35c   :  { %11680 = vst [vmem:[#allocation50_spill] sm:$0xff] %v9935_v13  ;;  %v9939_v60 = vpop.eup %6279  ;;  %3519 = vadd.xlane.f32.xlu1 %v3518_v57  ;;  %v3530_v25 = vadd.f32 %v9913_v63, %v3529_v34  ;;  %6297 = vpow2.f32 %v3245_v54  ;;  %v2781_v36 = vsub.f32 %v11684_v53, %v9374_v26  ;;  %v3261_v19 = vmul.f32 1.442695, %v2777_v3  ;;  %v11685_v34 = vld [vmem:[#allocation165_spill] sm:$0xff]  ;;  %v11691_v63 = vld [vmem:[#allocation59_spill] sm:$0xff] }
 0x35d   :  { %11682 = vst [vmem:[#allocation51_spill] sm:$0xff] %v9939_v60  ;;  %v9944_v62 = vpop.eup %6281  ;;  %6299 = vpow2.f32 %v3247_v46  ;;  %v3263_v11 = vmul.f32 1.442695, %v2778_v10  ;;  %v2782_v54 = vsub.f32 %v11685_v34, %v9374_v26  ;;  %v2783_v27 = vsub.f32 %v11686_v47, %v9374_v26  ;;  %v11687_v46 = vld [vmem:[#allocation169_spill] sm:$0xff] }
 0x35e   :  { %v3531_v30 = vadd.f32 %v9919_v0, %v3530_v25  ;;  %6301 = vpow2.f32 %v3249_v9  ;;  %v3541_v57 = vadd.f32 %v9944_v62, %v3540_v58  ;;  %v2784_v29 = vsub.f32 %v11687_v46, %v9374_v26  ;;  %v11688_v58 = vld [vmem:[#allocation219_spill] sm:$0xff] }
 0x35f   :  { %v9952_v42 = vpop.eup %6283  ;;  %6303 = vpow2.f32 %v3261_v19  ;;  %v3265_v53 = vmul.f32 1.442695, %v2779_v31  ;;  %v2785_v25 = vsub.f32 %v11688_v58, %v9374_v26  ;;  %v2786_v47 = vsub.f32 %v11689_v43, %v9374_v26  ;;  %v11692_v43 = vld [vmem:[#allocation65_spill] sm:$0xff] }
 0x360   :  { %v9958_v3 = vpop.eup %6285  ;;  %v3532_v10 = vadd.f32 %v9923_v12, %v3531_v30  ;;  %6305 = vpow2.f32 %v3251_v7  ;;  %v3542_v9 = vadd.f32 %v9952_v42, %v3541_v57  ;;  %v2787_v46 = vsub.f32 %v11690_v52, %v9374_v26 }
 0x361   :  { %v9964_v34 = vpop.eup %6287  ;;  %6307 = vpow2.f32 %v3263_v11  ;;  %v3267_v31 = vmul.f32 1.442695, %v2780_v24  ;;  %v3269_v57 = vmul.f32 1.442695, %v2781_v36  ;;  %v3271_v12 = vmul.f32 1.442695, %v2782_v54 }
 0x362   :  { %v9970_v19 = vpop.eup %6289  ;;  %v3533_v30 = vadd.f32 %v9929_v23, %v3532_v10  ;;  %v3543_v7 = vadd.f32 %v9958_v3, %v3542_v9  ;;  %6309 = vpow2.f32 %v3265_v53  ;;  %v3273_v58 = vmul.f32 1.442695, %v2783_v27  ;;  %v11693_v10 = vld [vmem:[#allocation63_spill] sm:$0xff]  ;;  %v11694_v23 = vld [vmem:[#allocation122_spill] sm:$0xff] }
 0x363   :  { %v9974_v2 = vpop.eup %6291  ;;  %v3275_v40 = vmul.f32 1.442695, %v2784_v29  ;;  %v3625_v37 = vpack.c.bf16 %v11692_v43, %v11691_v63  ;;  %v3277_v11 = vmul.f32 1.442695, %v2785_v25  ;;  %v3627_v9 = vpack.c.bf16 %v11694_v23, %v11693_v10 }
 0x364   :  { %v9978_v0 = vpop.eup %6293  ;;  %v3534_v52 = vadd.f32 %v9935_v13, %v3533_v30  ;;  %v3544_v24 = vadd.f32 %v9964_v34, %v3543_v7  ;;  %6311 = vpow2.f32 %v3267_v31  ;;  %v3279_v54 = vmul.f32 1.442695, %v2786_v47  ;;  %v11700_v47 = vld [vmem:[#allocation112_spill] sm:$0xff] }
 0x365   :  { %v9984_v36 = vpop.eup %6295  ;;  %4088 = vmatmul.mubr.bf16.gmra.mrb[168].mxu0 %v3625_v37  ;;  %v3642_v29 = vpack.c.bf16 %v9436_v33, %v9362_v45  ;;  %v3644_v63 = vpack.c.bf16 %v9448_v48, %v9372_v22  ;;  %6313 = vpow2.f32 %v3269_v57  ;;  %v3557_v23 = vadd.f32 %v9497_v56, %v9588_v28  ;;  %4185 = vmatmul.mubr.bf16.gmra.mrb[168].mxu1 %v3627_v9  ;;  %v11697_v45 = vld [vmem:[#allocation125_spill] sm:$0xff]  ;;  %v11698_v33 = vld [vmem:[#allocation108_spill] sm:$0xff]  ;;  %v11699_v22 = vld [vmem:[#allocation110_spill] sm:$0xff] }
 0x366   :  { %v9990_v27 = vpop.eup %6297  ;;  %v3535_v53 = vadd.f32 %v9939_v60, %v3534_v52  ;;  %v3545_v25 = vadd.f32 %v9970_v19, %v3544_v24  ;;  %6315 = vpow2.f32 %v3271_v12  ;;  %v2793_v37 = vsub.f32 %v11698_v33, %v11697_v45  ;;  %v11701_v12 = vld [vmem:[#allocation113_spill] sm:$0xff]  ;;  %v11703_v52 = vld [vmem:[#allocation224_spill] sm:$0xff] }
 0x367   :  { %11695 = vst [vmem:[#allocation53_spill] sm:$0xff] %v9990_v27  ;;  %v9996_v31 = vpop.eup %6299  ;;  %4095 = vmatprep.mubr.bf16.mxu0 %v3642_v29  ;;  %4192 = vmatprep.mubr.bf16.mxu1 %v3644_v63  ;;  %v2794_v48 = vsub.f32 %v11699_v22, %v11697_v45  ;;  %v2795_v30 = vsub.f32 %v11700_v47, %v11697_v45  ;;  %6317 = vpow2.f32 %v3273_v58  ;;  %v3281_v56 = vmul.f32 1.442695, %v2787_v46  ;;  %v11704_v63 = vld [vmem:[#allocation166_spill] sm:$0xff]  ;;  %v10023_v47 = vpop.f32.mrb[128].mxu0  ;;  %v11713_v60 = vld [vmem:[#allocation36_spill] sm:$0xff] }
 0x368   :  { %11696 = vst [vmem:[#allocation3_spill] sm:$0xff] %v9996_v31  ;;  %v10004_v7 = vpop.eup %6301  ;;  %3536 = vadd.xlane.f32.xlu0 %v3535_v53  ;;  %v3546_v28 = vadd.f32 %v9974_v2, %v3545_v25  ;;  %v2796_v57 = vsub.f32 %v11701_v12, %v11697_v45  ;;  %v2788_v24 = vsub.f32 %v11703_v52, %v9374_v26  ;;  %6319 = vpow2.f32 %v3275_v40 }
 0x369   :  { %v10009_v43 = vpop.eup %6303  ;;  %6321 = vpow2.f32 %v3277_v11  ;;  %v2797_v58 = vsub.f32 %v11704_v63, %v11697_v45  ;;  %v3293_v53 = vmul.f32 1.442695, %v2793_v37  ;;  %v3295_v25 = vmul.f32 1.442695, %v2794_v48  ;;  %11705 = vst [vmem:[#allocation83_spill] sm:$0xff] %v10023_v47  ;;  %v10025_v11 = vpop.f32.mrb[128].mxu1 }
 0x36a   :  { %11702 = vst [vmem:[#allocation82_spill] sm:$0xff] %v10009_v43  ;;  %v10013_v10 = vpop.eup %6305  ;;  %v3547_v9 = vadd.f32 %v9978_v0, %v3546_v28  ;;  %v3558_v29 = vadd.f32 %v10009_v43, %v3557_v23  ;;  %6323 = vpow2.f32 %v3279_v54  ;;  %v3297_v33 = vmul.f32 1.442695, %v2795_v30  ;;  %11706 = vst [vmem:[#allocation85_spill] sm:$0xff] %v10025_v11  ;;  %v11707_v28 = vld [vmem:[#allocation168_spill] sm:$0xff]  ;;  %v11708_v54 = vld [vmem:[#allocation171_spill] sm:$0xff] }
 0x36b   :  { %v10019_v46 = vpop.eup %6307  ;;  %6325 = vpow2.f32 %v3281_v56  ;;  %v3299_v40 = vmul.f32 1.442695, %v2796_v57  ;;  %v2798_v12 = vsub.f32 %v11707_v28, %v11697_v45  ;;  %v2800_v37 = vsub.f32 %v11708_v54, %v11697_v45  ;;  %v10035_v56 = vpop.f32.mrb[129].mxu1  ;;  %v11711_v63 = vld [vmem:[#allocation221_spill] sm:$0xff] }
 0x36c   :  { %v3548_v22 = vadd.f32 %v9984_v36, %v3547_v9  ;;  %v3559_v26 = vadd.f32 %v10019_v46, %v3558_v29  ;;  %v10027_v23 = vpop.eup %6309  ;;  %6327 = vpow2.f32 %v3293_v53  ;;  %11709 = vst [vmem:[#allocation87_spill] sm:$0xff] %v10035_v56  ;;  %v3283_v52 = vmul.f32 1.442695, %v2788_v24  ;;  %v11710_v9 = vld [vmem:[#allocation170_spill] sm:$0xff]  ;;  %v11712_v24 = vld [vmem:[#allocation69_spill] sm:$0xff]  ;;  %v11715_v56 = vld [vmem:[#allocation68_spill] sm:$0xff] }
 0x36d   :  { %6329 = vpow2.f32 %v3295_v25  ;;  %v2799_v29 = vsub.f32 %v11710_v9, %v11697_v45  ;;  %v2801_v28 = vsub.f32 %v11711_v63, %v11697_v45  ;;  %v3301_v25 = vmul.f32 1.442695, %v2797_v58  ;;  %v11714_v9 = vld [vmem:[#allocation71_spill] sm:$0xff]  ;;  %v11717_v58 = vld [vmem:[#allocation45_spill] sm:$0xff] }
 0x36e   :  { %v3549_v48 = vadd.f32 %v9990_v27, %v3548_v22  ;;  %v3560_v30 = vadd.f32 %v10027_v23, %v3559_v26  ;;  %v10037_v57 = vpop.eup %6311  ;;  %6331 = vpow2.f32 %v3297_v33  ;;  %v3303_v54 = vmul.f32 1.442695, %v2798_v12 }
 0x36f   :  { %v10043_v13 = vpop.eup %6313  ;;  %6333 = vpow2.f32 %v3299_v40  ;;  %v3307_v27 = vmul.f32 1.442695, %v2800_v37  ;;  %v3641_v47 = vpack.c.bf16 %v11713_v60, %v11712_v24  ;;  %v3643_v11 = vpack.c.bf16 %v11715_v56, %v11714_v9  ;;  %v11718_v60 = vld [vmem:[#allocation186_spill] sm:$0xff] }
 0x370   :  { %v3550_v53 = vadd.f32 %v9996_v31, %v3549_v48  ;;  %v3561_v22 = vadd.f32 %v10037_v57, %v3560_v30  ;;  %v10047_v26 = vpop.eup %6315  ;;  %v11716_v31 = vld [vmem:[#allocation42_spill] sm:$0xff]  ;;  %v3660_v30 = vpack.c.bf16 %v9608_v8, %v11717_v58  ;;  %6335 = vpow2.f32 %v3283_v52  ;;  %v10088_v52 = vpop.f32.mrb[129].mxu0 }
 0x371   :  { %v10053_v63 = vpop.eup %6317  ;;  %v3658_v40 = vpack.c.bf16 %v9598_v20, %v11716_v31  ;;  %v3305_v37 = vmul.f32 1.442695, %v2799_v29  ;;  %v3574_v24 = vadd.f32 %v11718_v60, %v9594_v61  ;;  %4096 = vmatmul.mubr.bf16.gmra.mrb[172].mxu0 %v3641_v47  ;;  %4193 = vmatmul.mubr.bf16.gmra.mrb[172].mxu1 %v3643_v11  ;;  %v3674_v56 = vpack.c.bf16 %v9777_v1, %v9677_v35  ;;  %v10090_v29 = vpop.f32.mrb[130].mxu1  ;;  %v11725_v1 = vld [vmem:[#allocation43_spill] sm:$0xff] }
 0x372   :  { %v3551_v33 = vadd.f32 %v10004_v7, %v3550_v53  ;;  %v3562_v48 = vadd.f32 %v10043_v13, %v3561_v22  ;;  %v10061_v12 = vpop.eup %6319  ;;  %6337 = vpow2.f32 %v3301_v25  ;;  %4200 = vmatprep.mubr.bf16.mxu1 %v3660_v30  ;;  %v3676_v8 = vpack.c.bf16 %v9800_v16, %v9693_v55  ;;  %v11723_v30 = vld [vmem:[#allocation225_spill] sm:$0xff]  ;;  %v11724_v16 = vld [vmem:[#allocation39_spill] sm:$0xff] }
 0x373   :  { %v10067_v53 = vpop.eup %6321  ;;  %4103 = vmatprep.mubr.bf16.mxu0 %v3658_v40  ;;  %6339 = vpow2.f32 %v3303_v54  ;;  %v11722_v54 = vld [vmem:[#allocation223_spill] sm:$0xff]  ;;  %v2803_v60 = vsub.f32 %v11723_v30, %v11697_v45  ;;  %v3657_v55 = vpack.c.bf16 %v9592_v14, %v11724_v16  ;;  %v3659_v35 = vpack.c.bf16 %v9604_v17, %v11725_v1  ;;  %v11726_v30 = vld [vmem:[#allocation226_spill] sm:$0xff] }
 0x374   :  { %11719 = vst [vmem:[#allocation140_spill] sm:$0xff] %v10067_v53  ;;  %v3552_v22 = vadd.f32 %v10013_v10, %v3551_v33  ;;  %v3563_v20 = vadd.f32 %v10047_v26, %v3562_v48  ;;  %v10073_v31 = vpop.eup %6323  ;;  %6341 = vpow2.f32 %v3307_v27  ;;  %v2802_v9 = vsub.f32 %v11722_v54, %v11697_v45  ;;  %v10098_v27 = vpop.f32.mrb[130].mxu0 }
 0x375   :  { %v10081_v47 = vpop.eup %6325  ;;  %6343 = vpow2.f32 %v3305_v37  ;;  %v10100_v48 = vpop.f32.mrb[131].mxu1  ;;  %v3309_v33 = vmul.f32 1.442695, %v2801_v28 }
 0x376   :  { %11720 = vst [vmem:[#allocation141_spill] sm:$0xff] %v10081_v47  ;;  %3553 = vadd.xlane.f32.xlu1 %v3552_v22  ;;  %v3564_v11 = vadd.f32 %v10053_v63, %v3563_v20  ;;  %v10092_v25 = vpop.eup %6327  ;;  %v5149_v37 = vpop.f32.mrb[131].mxu0  ;;  %v2804_v20 = vsub.f32 %v11726_v30, %v11697_v45  ;;  %v3313_v45 = vmul.f32 1.442695, %v2803_v60 }
 0x377   :  { %11721 = vst [vmem:[#allocation143_spill] sm:$0xff] %v10092_v25  ;;  %v10102_v40 = vpop.eup %6329  ;;  %v3575_v22 = vadd.f32 %v10092_v25, %v3574_v24  ;;  %v3311_v25 = vmul.f32 1.442695, %v2802_v9  ;;  %6345 = vpow2.f32 %v3309_v33 }
 0x378   :  { %v3565_v58 = vadd.f32 %v10061_v12, %v3564_v11  ;;  %v10110_v54 = vpop.eup %6331  ;;  %v3706_v11 = vpack.c.bf16 %v10102_v40, %v10019_v46  ;;  %v3315_v9 = vmul.f32 1.442695, %v2804_v20 }
 0x379   :  { %v10118_v61 = vpop.eup %6333  ;;  %v3576_v43 = vadd.f32 %v10102_v40, %v3575_v22  ;;  %v3707_v28 = vpack.c.bf16 %v10110_v54, %v10027_v23  ;;  %4104 = vmatmul.mubr.bf16.gmra.mrb[176].mxu0 %v3657_v55  ;;  %4201 = vmatmul.mubr.bf16.gmra.mrb[176].mxu1 %v3659_v35  ;;  %6347 = vpow2.f32 %v3311_v25  ;;  %v11739_v25 = vpack.c.bf16 %v9958_v3, %v9890_v21  ;;  %v11742_v3 = vld [vmem:[#allocation47_spill] sm:$0xff]  ;;  %v11762_v23 = vld [vmem:[#allocation58_spill] sm:$0xff] }
 0x37a   :  { %v3566_v24 = vadd.f32 %v10067_v53, %v3565_v58  ;;  %v3708_v14 = vpack.c.bf16 %v10118_v61, %v10037_v57  ;;  %4111 = vmatprep.mubr.bf16.mxu0 %v3674_v56  ;;  %4208 = vmatprep.mubr.bf16.mxu1 %v3676_v8  ;;  %v10130_v16 = vpop.eup %6335  ;;  %6349 = vpow2.f32 %v3313_v45  ;;  %v11729_v45 = vpack.c.bf16 %v9761_v50, %v9659_v32  ;;  %v11761_v53 = vld [vmem:[#allocation117_spill] sm:$0xff] }
 0x37b   :  { %v3577_v1 = vadd.f32 %v10110_v54, %v3576_v43  ;;  %6351 = vpow2.f32 %v3315_v9  ;;  %v11733_v32 = vpack.c.bf16 %v9964_v34, %v9899_v38  ;;  %v11735_v38 = vld [vmem:[#allocation87_spill] sm:$0xff]  ;;  %v5150_v9 = vadd.f32 %v5149_v37, %v10098_v27  ;;  %v11751_v37 = vld [vmem:[#allocation21_spill] sm:$0xff] }
 0x37c   :  { %v3567_v17 = vadd.f32 %v10073_v31, %v3566_v24  ;;  %v10132_v58 = vpop.eup %6337  ;;  %v11727_v24 = vld [vmem:[#allocation193_spill] sm:$0xff]  ;;  %v5214_v50 = vadd.f32 %v10100_v48, %v10090_v29  ;;  %v3616_v54 = vpack.c.bf16 %v11762_v23, %v11761_v53  ;;  %v6487_v53 = vld [vmem:[%s10679_s1 + $0x3c8] sm:$0xff]  }
 0x37d   :  { %v3578_v35 = vadd.f32 %v10118_v61, %v3577_v1  ;;  %v10136_v55 = vpop.eup %6339  ;;  %v11732_v1 = vpack.c.bf16 %v9952_v42, %v9873_v5  ;;  %v6488_v23 = vld [vmem:[%s10679_s1 + $0x308] sm:$0xff]  }
 0x37e   :  { %v3568_v22 = vadd.f32 %v10081_v47, %v3567_v17  ;;  %v10138_v57 = vpop.eup %6341  ;;  %v11728_v17 = vld [vmem:[#allocation189_spill] sm:$0xff]  ;;  %v11758_v47 = vld [vmem:[#allocation18_spill] sm:$0xff] }
 0x37f   :  { %v3579_v56 = vadd.f32 %v10132_v58, %v3578_v35  ;;  %v10144_v33 = vpop.eup %6343  ;;  %v11731_v35 = vld [vmem:[#allocation191_spill] sm:$0xff] }
 0x380   :  { %v3569_v43 = vadd.f32 %v10130_v16, %v3568_v22  ;;  %v11730_v22 = vpack.c.bf16 %v9791_v4, %v9686_v44  ;;  %v5151_v4 = vpop.f32.mrb[132].mxu0 }
 0x381   :  { %v3580_v20 = vadd.f32 %v10136_v55, %v3579_v56  ;;  %4112 = vmatmul.mubr.bf16.gmra.mrb[180].mxu0 %v11729_v45  ;;  %v5215_v45 = vpop.f32.mrb[132].mxu1 }
 0x382   :  { %3570 = vadd.xlane.f32.xlu0 %v3569_v43  ;;  %4209 = vmatmul.mubr.bf16.gmra.mrb[180].mxu1 %v11730_v22  ;;  %v5216_v22 = vpop.f32.mrb[133].mxu1 }
 0x383   :  { %v3581_v30 = vadd.f32 %v10144_v33, %v3580_v20  ;;  %4119 = vmatprep.mubr.bf16.mxu0 %v11732_v1  ;;  %4216 = vmatprep.mubr.bf16.mxu1 %v11733_v32  ;;  %v10181_v20 = vpop.eup %6345  ;;  %v11734_v1 = vld [vmem:[#allocation85_spill] sm:$0xff]  ;;  %v11736_v32 = vld [vmem:[#allocation83_spill] sm:$0xff]  ;;  %v5217_v48 = vadd.f32 %v5216_v22, %v5215_v45  ;;  %v5218_v45 = vpop.f32.mrb[134].mxu1 }
 0x384   :  { %v10184_v42 = vpop.eup %6347  ;;  %v5211_v34 = vadd.f32 %v11735_v38, %v11734_v1  ;;  %v5147_v44 = vadd.f32 %v10088_v52, %v11736_v32  ;;  %v10204_v52 = vadd.f32 %v5214_v50, %v5150_v9  ;;  %v11744_v9 = vld [vmem:[#allocation51_spill] sm:$0xff]  ;;  %v11746_v38 = vld [vmem:[#allocation53_spill] sm:$0xff]  ;;  %v11749_v50 = vld [vmem:[#allocation14_spill] sm:$0xff]  ;;  %v5219_v60 = vpop.f32.mrb[135].mxu1 }
 0x385   :  { %v3582_v56 = vadd.f32 %v10138_v57, %v3581_v30  ;;  %v10194_v30 = vpop.eup %6349  ;;  %v11757_v32 = vld [vmem:[#allocation9_spill] sm:$0xff] }
 0x386   :  { %11737 = vst [vmem:[#allocation145_spill] sm:$0xff] %v10194_v30  ;;  %v10202_v1 = vadd.f32 %v5211_v34, %v5147_v44  ;;  %v10206_v27 = vpop.eup %6351  ;;  %v11747_v34 = vld [vmem:[#allocation50_spill] sm:$0xff] }
 0x387   :  { %v3583_v5 = vadd.f32 %v10181_v20, %v3582_v56  ;;  %v11738_v56 = vpack.c.bf16 %v9944_v62, %v9856_v39  ;;  %v11740_v39 = vld [vmem:[#allocation80_spill] sm:$0xff]  ;;  %v11741_v62 = vld [vmem:[#allocation139_spill] sm:$0xff]  ;;  %v11750_v44 = vld [vmem:[#allocation10_spill] sm:$0xff] }
 0x388   :  { %v3600_v40 = vpack.c.bf16 %v11751_v37, %v11750_v44  ;;  %v11756_v37 = vld [vmem:[#allocation19_spill] sm:$0xff] }
 0x389   :  { %v3584_v43 = vadd.f32 %v10184_v42, %v3583_v5  ;;  %4120 = vmatmul.mubr.bf16.gmra.mrb[184].mxu0 %v11738_v56  ;;  %v11745_v5 = vld [vmem:[#allocation194_spill] sm:$0xff] }
 0x38a   :  { %4217 = vmatmul.mubr.bf16.gmra.mrb[184].mxu1 %v11739_v25  ;;  %4127 = vmatprep.mubr.bf16.mxu0 %v3706_v11  ;;  %v11743_v25 = vld [vmem:[#allocation3_spill] sm:$0xff] }
 0x38b   :  { %v3585_v29 = vadd.f32 %v10194_v30, %v3584_v43  ;;  %4224 = vmatprep.mubr.bf16.mxu1 %v3708_v14  ;;  %v5152_v14 = vpop.f32.mrb[133].mxu0  ;;  %v11748_v43 = vld [vmem:[#allocation6_spill] sm:$0xff]  ;;  %v11752_v11 = vld [vmem:[#allocation143_spill] sm:$0xff]  ;;  %v3599_v30 = vpack.c.bf16 %v11758_v47, %v11757_v32 }
 0x38c   :  { %v5153_v56 = vadd.f32 %v5152_v14, %v5151_v4  ;;  %v3598_v46 = vpack.c.bf16 %v11749_v50, %v11748_v43  ;;  %v5220_v14 = vadd.f32 %v5219_v60, %v5218_v45  ;;  %v11755_v43 = vld [vmem:[#allocation11_spill] sm:$0xff]  ;;  %v6485_v60 = vld [vmem:[%s10679_s1 + $0x380] sm:$0xff]  }
 0x38d   :  { %v3586_v21 = vadd.f32 %v10206_v27, %v3585_v29  ;;  %v5154_v29 = vpop.f32.mrb[134].mxu0  ;;  %v3597_v44 = vpack.c.bf16 %v11756_v37, %v11755_v43  ;;  %v6486_v47 = vld [vmem:[%s10679_s1 + $0x348] sm:$0xff]   ;;  %v11765_v43 = vld [vmem:[#allocation116_spill] sm:$0xff]  ;;  %v11766_v37 = vld [vmem:[#allocation29_spill] sm:$0xff] }
 0x38e   :  { %v5155_v61 = vpop.f32.mrb[135].mxu0  ;;  %v10241_v22 = vadd.f32 %v5217_v48, %v5153_v56 }
 0x38f   :  { %3587 = vadd.xlane.f32.xlu1 %v3586_v21  ;;  %v11753_v21 = vld [vmem:[#allocation82_spill] sm:$0xff]  ;;  %v5156_v4 = vadd.f32 %v5155_v61, %v5154_v29  ;;  %v5157_v61 = vpop.f32.mrb[136].mxu0 }
 0x390   :  { %v11754_v8 = vpack.c.bf16 %v11752_v11, %v11753_v21  ;;  %v11759_v11 = vld [vmem:[#allocation115_spill] sm:$0xff]  ;;  %v5158_v48 = vpop.f32.mrb[137].mxu0  ;;  %v11763_v29 = vld [vmem:[#allocation114_spill] sm:$0xff] }
 0x391   :  { %v10243_v50 = vadd.f32 %v5220_v14, %v5156_v4  ;;  %v5160_v32 = vpop.f32.mrb[138].mxu0  ;;  %v11764_v4 = vld [vmem:[#allocation26_spill] sm:$0xff] }
 0x392   :  { %4128 = vmatmul.mubr.bf16.gmra.mrb[188].mxu0 %v11754_v8  ;;  %4225 = vmatmul.mubr.bf16.gmra.mrb[188].mxu1 %v3707_v28  ;;  %v11760_v8 = vld [vmem:[#allocation27_spill] sm:$0xff]  ;;  %v6484_v28 = vld [vmem:[%s10679_s1 + $0x300] sm:$0xff]   ;;  %v3613_v14 = vpack.c.bf16 %v11764_v4, %v11763_v29 }
 0x393   :  { %4265 = vmatprep.mubr.bf16.mxu0 %v3598_v46  ;;  %4362 = vmatprep.mubr.bf16.mxu1 %v3600_v40  ;;  %v3614_v21 = vpack.c.bf16 %v11760_v8, %v11759_v11  ;;  %v5159_v40 = vadd.f32 %v5158_v48, %v5157_v61  ;;  %v11767_v11 = vld [vmem:[#allocation22_spill] sm:$0xff]  ;;  %v11768_v8 = vld [vmem:[#allocation180_spill] sm:$0xff] }
 0x394   :  { %v6490_v61 = vld [vmem:[%s10679_s1 + $0x350] sm:$0xff]  }
 0x39a   :  { %4266 = vmatmul.mubr.bf16.vlgmr.msra.gmra.mrb[192].mxu0 %v3597_v44  ;;  %4363 = vmatmul.mubr.bf16.vlgmr.msra.gmra.mrb[192].mxu1 %v3599_v30  ;;  %v5221_v30 = vpop.f32.mrb[136].mxu1  ;;  %v3615_v44 = vpack.c.bf16 %v11766_v37, %v11765_v43 }
 0x39b   :  { %4273 = vmatprep.mubr.bf16.mxu0 %v3614_v21  ;;  %4370 = vmatprep.mubr.bf16.mxu1 %v3616_v54  ;;  %v5222_v46 = vpop.f32.mrb[137].mxu1  ;;  %v3630_v21 = vpack.c.bf16 %v11768_v8, %v11767_v11  ;;  %v6489_v54 = vld [vmem:[%s10679_s1 + $0x388] sm:$0xff]  }
 0x39c   :  { %5514 = vmatpush3.bf16.msra.mxu0 %v6484_v28  ;;  %5578 = vmatpush3.bf16.msra.mxu1 %v6485_v60  ;;  %v5223_v45 = vadd.f32 %v5222_v46, %v5221_v30  ;;  %v5224_v56 = vpop.f32.mrb[138].mxu1  ;;  %v5161_v28 = vpop.f32.mrb[139].mxu0  ;;  %v11769_v60 = vld [vmem:[#allocation25_spill] sm:$0xff]  ;;  %v6491_v30 = vld [vmem:[%s10679_s1 + $0x3d0] sm:$0xff]  }
 0x39d   :  { %5515 = vmatprep.subr.bf16.mxu0 %v6486_v47  ;;  %5579 = vmatprep.subr.bf16.mxu1 %v6487_v53  ;;  %v11770_v47 = vld [vmem:[#allocation31_spill] sm:$0xff]  ;;  %v5162_v46 = vadd.f32 %v5161_v28, %v5160_v32  ;;  %v5225_v29 = vpop.f32.mrb[139].mxu1  ;;  %v5163_v4 = vpop.f32.mrb[140].mxu0 }
 0x39e   :  { %v3632_v53 = vpack.c.bf16 %v11770_v47, %v11769_v60  ;;  %v10285_v48 = vadd.f32 %v5223_v45, %v5159_v40  ;;  %v5226_v43 = vadd.f32 %v5225_v29, %v5224_v56  ;;  %v5227_v37 = vpop.f32.mrb[140].mxu1  ;;  %v5164_v11 = vpop.f32.mrb[141].mxu0  ;;  %v6492_v60 = vld [vmem:[%s10679_s1 + $0x310] sm:$0xff]  }
 0x39f   :  { %v5165_v8 = vadd.f32 %v5164_v11, %v5163_v4  ;;  %v6493_v40 = vld [vmem:[%s10679_s1 + $0x390] sm:$0xff]   ;;  %v11772_v4 = vld [vmem:[#allocation119_spill] sm:$0xff] }
 0x3a0   :  { %5516 = vmatpush3.bf16.msra.mxu0 %v6488_v23  ;;  %5580 = vmatpush3.bf16.msra.mxu1 %v6489_v54  ;;  %v5228_v23 = vpop.f32.mrb[141].mxu1  ;;  %v5166_v54 = vpop.f32.mrb[142].mxu0  ;;  %v10293_v45 = vadd.f32 %v5226_v43, %v5162_v46  ;;  %v11773_v43 = vld [vmem:[#allocation179_spill] sm:$0xff] }
 0x3a1   :  { %5517 = vmatprep.subr.bf16.mxu0 %v6490_v61  ;;  %5581 = vmatprep.subr.bf16.mxu1 %v6491_v30  ;;  %v5229_v32 = vadd.f32 %v5228_v23, %v5227_v37  ;;  %v5230_v56 = vpop.f32.mrb[142].mxu1  ;;  %v3629_v37 = vpack.c.bf16 %v11773_v43, %v11772_v4  ;;  %v11778_v4 = vld [vmem:[#allocation182_spill] sm:$0xff]  ;;  %v11779_v43 = vld [vmem:[#allocation127_spill] sm:$0xff] }
 0x3a2   :  { %4274 = vmatmul.mubr.bf16.gmra.mrb[196].mxu0 %v3613_v14  ;;  %4371 = vmatmul.mubr.bf16.gmra.mrb[196].mxu1 %v3615_v44  ;;  %11771 = vst [vmem:[#allocation195_spill] sm:$0xff] %v10293_v45  ;;  %v5167_v14 = vpop.f32.mrb[143].mxu0  ;;  %v6494_v44 = vld [vmem:[%s10679_s1 + $0x358] sm:$0xff]   ;;  %v5231_v47 = vpop.f32.mrb[143].mxu1 }
 0x3a3   :  { %4281 = vmatprep.mubr.bf16.mxu0 %v3630_v21  ;;  %4378 = vmatprep.mubr.bf16.mxu1 %v3632_v53  ;;  %v6495_v21 = vld [vmem:[%s10679_s1 + $0x3d8] sm:$0xff]   ;;  %v5168_v28 = vadd.f32 %v5167_v14, %v5166_v54  ;;  %v5169_v53 = vpop.f32.mrb[144].mxu0  ;;  %v10301_v61 = vadd.f32 %v5229_v32, %v5165_v8  ;;  %v5232_v30 = vadd.f32 %v5231_v47, %v5230_v56  ;;  %v5233_v46 = vpop.f32.mrb[144].mxu1  ;;  %v11776_v47 = vld [vmem:[#allocation128_spill] sm:$0xff] }
 0x3a4   :  { %5518 = vmatpush3.bf16.msra.mxu0 %v6492_v60  ;;  %5582 = vmatpush3.bf16.msra.mxu1 %v6493_v40  ;;  %v5170_v29 = vpop.f32.mrb[145].mxu0  ;;  %v5234_v23 = vpop.f32.mrb[145].mxu1  ;;  %v11774_v40 = vld [vmem:[#allocation24_spill] sm:$0xff]  ;;  %v6496_v54 = vld [vmem:[%s10679_s1 + $0x318] sm:$0xff]  }
 0x3a5   :  { %5519 = vmatprep.subr.bf16.mxu0 %v6494_v44  ;;  %5583 = vmatprep.subr.bf16.mxu1 %v6495_v21  ;;  %v5171_v11 = vadd.f32 %v5170_v29, %v5169_v53  ;;  %v5172_v60 = vpop.f32.mrb[146].mxu0  ;;  %v11775_v44 = vld [vmem:[#allocation181_spill] sm:$0xff]  ;;  %v10313_v32 = vadd.f32 %v5232_v30, %v5168_v28  ;;  %v5235_v56 = vadd.f32 %v5234_v23, %v5233_v46  ;;  %v5236_v14 = vpop.f32.mrb[146].mxu1  ;;  %v11777_v53 = vld [vmem:[#allocation72_spill] sm:$0xff] }
 0x3a6   :  { %v3631_v45 = vpack.c.bf16 %v11775_v44, %v11774_v40  ;;  %v6497_v8 = vld [vmem:[%s10679_s1 + $0x398] sm:$0xff]   ;;  %v5173_v21 = vpop.f32.mrb[147].mxu0  ;;  %v3646_v29 = vpack.c.bf16 %v11777_v53, %v11776_v47  ;;  %v3648_v40 = vpack.c.bf16 %v11779_v43, %v11778_v4  ;;  %v6498_v44 = vld [vmem:[%s10679_s1 + $0x360] sm:$0xff]   ;;  %v5237_v30 = vpop.f32.mrb[147].mxu1  ;;  %v6504_v4 = vld [vmem:[%s10679_s1 + $0x328] sm:$0xff]  }
 0x3a7   :  { %v5174_v28 = vadd.f32 %v5173_v21, %v5172_v60  ;;  %v10325_v46 = vadd.f32 %v5235_v56, %v5171_v11  ;;  %v5238_v23 = vadd.f32 %v5237_v30, %v5236_v14  ;;  %v6501_v47 = vld [vmem:[%s10679_s1 + $0x3a0] sm:$0xff]   ;;  %v11783_v21 = vld [vmem:[#allocation73_spill] sm:$0xff]  ;;  %v6505_v43 = vld [vmem:[%s10679_s1 + $0x3a8] sm:$0xff]  }
 0x3a8   :  { %5520 = vmatpush3.bf16.msra.mxu0 %v6496_v54  ;;  %5584 = vmatpush3.bf16.msra.mxu1 %v6497_v8  ;;  %v6499_v54 = vld [vmem:[%s10679_s1 + $0x3e0] sm:$0xff]   ;;  %v11787_v30 = vld [vmem:[#allocation192_spill] sm:$0xff] }
 0x3a9   :  { %5521 = vmatprep.subr.bf16.mxu0 %v6498_v44  ;;  %5585 = vmatprep.subr.bf16.mxu1 %v6499_v54  ;;  %v6500_v8 = vld [vmem:[%s10679_s1 + $0x320] sm:$0xff]   ;;  %v10333_v53 = vadd.f32 %v5238_v23, %v5174_v28  ;;  %v11785_v44 = vld [vmem:[#allocation188_spill] sm:$0xff]  ;;  %v11786_v28 = vld [vmem:[#allocation79_spill] sm:$0xff] }
 0x3aa   :  { %4282 = vmatmul.mubr.bf16.gmra.mrb[200].mxu0 %v3629_v37  ;;  %4379 = vmatmul.mubr.bf16.gmra.mrb[200].mxu1 %v3631_v45  ;;  %v6502_v45 = vld [vmem:[%s10679_s1 + $0x368] sm:$0xff]   ;;  %v11780_v11 = vld [vmem:[#allocation126_spill] sm:$0xff]  ;;  %v3664_v23 = vpack.c.bf16 %v11787_v30, %v11786_v28  ;;  %v11793_v28 = vpack.c.bf16 %v9829_v15, %v9721_v49  ;;  %v11797_v15 = vpack.c.bf16 %v9974_v2, %v9909_v59  ;;  %v11803_v2 = vld [vmem:[#allocation8_spill] sm:$0xff] }
 0x3ab   :  { %4289 = vmatprep.mubr.bf16.mxu0 %v3646_v29  ;;  %4386 = vmatprep.mubr.bf16.mxu1 %v3648_v40  ;;  %v6503_v37 = vld [vmem:[%s10679_s1 + $0x3e8] sm:$0xff]   ;;  %v11781_v60 = vld [vmem:[#allocation70_spill] sm:$0xff]  ;;  %v11801_v59 = vpack.c.bf16 %v10136_v55, %v10047_v26  ;;  %v11809_v26 = vld [vmem:[#allocation13_spill] sm:$0xff] }
 0x3ac   :  { %5522 = vmatpush3.bf16.msra.mxu0 %v6500_v8  ;;  %5586 = vmatpush3.bf16.msra.mxu1 %v6501_v47  ;;  %v3645_v56 = vpack.c.bf16 %v11781_v60, %v11780_v11  ;;  %v11782_v14 = vld [vmem:[#allocation130_spill] sm:$0xff]  ;;  %v11784_v40 = vld [vmem:[#allocation75_spill] sm:$0xff]  ;;  %v6506_v8 = vld [vmem:[%s10679_s1 + $0x370] sm:$0xff]  }
 0x3ad   :  { %5523 = vmatprep.subr.bf16.mxu0 %v6502_v45  ;;  %5587 = vmatprep.subr.bf16.mxu1 %v6503_v37  ;;  %v3647_v29 = vpack.c.bf16 %v11783_v21, %v11782_v14  ;;  %v3662_v54 = vpack.c.bf16 %v11785_v44, %v11784_v40  ;;  %v6507_v47 = vld [vmem:[%s10679_s1 + $0x3f0] sm:$0xff]   ;;  %v6510_v11 = vld [vmem:[%s10679_s1 + $0x378] sm:$0xff]   ;;  %v11789_v14 = vld [vmem:[#allocation187_spill] sm:$0xff] }
 0x3ae   :  { %v6508_v45 = vld [vmem:[%s10679_s1 + $0x330] sm:$0xff]   ;;  %v6511_v60 = vld [vmem:[%s10679_s1 + $0x3f8] sm:$0xff]  }
 0x3af   :  { %v6509_v37 = vld [vmem:[%s10679_s1 + $0x3b0] sm:$0xff]   ;;  %v6512_v40 = vld [vmem:[%s10679_s1 + $0x338] sm:$0xff]  }
 0x3b0   :  { %5524 = vmatpush3.bf16.msra.mxu0 %v6504_v4  ;;  %5588 = vmatpush3.bf16.msra.mxu1 %v6505_v43  ;;  %v11791_v4 = vld [vmem:[#allocation190_spill] sm:$0xff]  ;;  %v6513_v44 = vld [vmem:[%s10679_s1 + $0x3b8] sm:$0xff]   ;;  %v11810_v55 = vld [vmem:[#allocation16_spill] sm:$0xff] }
 0x3b1   :  { %5525 = vmatprep.subr.bf16.mxu0 %v6506_v8  ;;  %5589 = vmatprep.subr.bf16.mxu1 %v6507_v47 }
 0x3b2   :  { %4290 = vmatmul.mubr.bf16.gmra.mrb[204].mxu0 %v3645_v56  ;;  %4387 = vmatmul.mubr.bf16.gmra.mrb[204].mxu1 %v3647_v29  ;;  %v11788_v56 = vld [vmem:[#allocation74_spill] sm:$0xff]  ;;  %v11790_v29 = vld [vmem:[#allocation77_spill] sm:$0xff] }
 0x3b3   :  { %4297 = vmatprep.mubr.bf16.mxu0 %v3662_v54  ;;  %4394 = vmatprep.mubr.bf16.mxu1 %v3664_v23  ;;  %v3661_v21 = vpack.c.bf16 %v11789_v14, %v11788_v56  ;;  %v3663_v43 = vpack.c.bf16 %v11791_v4, %v11790_v29  ;;  %v11792_v54 = vpack.c.bf16 %v9813_v41, %v9705_v51 }
 0x3b4   :  { %5526 = vmatpush3.bf16.msra.mxu0 %v6508_v45  ;;  %5590 = vmatpush3.bf16.msra.mxu1 %v6509_v37  ;;  %v11794_v37 = vld [vmem:[#allocation173_spill] sm:$0xff]  ;;  %v11796_v51 = vpack.c.bf16 %v9822_v6, %v9714_v18  ;;  %v11798_v4 = vpack.c.bf16 %v9984_v36, %v11727_v24  ;;  %v11800_v18 = vpack.c.bf16 %v9978_v0, %v11731_v35 }
 0x3b5   :  { %5527 = vmatprep.subr.bf16.mxu0 %v6510_v11  ;;  %5591 = vmatprep.subr.bf16.mxu1 %v6511_v60  ;;  %v11795_v11 = vld [vmem:[#allocation81_spill] sm:$0xff]  ;;  %v11802_v6 = vpack.c.bf16 %v10138_v57, %v10061_v12  ;;  %v11808_v0 = vpack.c.bf16 %v10144_v33, %v10053_v63  ;;  %v3601_v12 = vpack.c.bf16 %v11810_v55, %v11809_v26  ;;  %v11811_v57 = vld [vmem:[#allocation12_spill] sm:$0xff]  ;;  %v11826_v55 = vld [vmem:[#allocation34_spill] sm:$0xff] }
 0x3b6   :  { %v3677_v60 = vpack.c.bf16 %v11795_v11, %v11794_v37  ;;  %v11804_v36 = vld [vmem:[#allocation17_spill] sm:$0xff]  ;;  %v11815_v37 = vld [vmem:[#allocation23_spill] sm:$0xff]  ;;  %v11816_v11 = vld [vmem:[#allocation178_spill] sm:$0xff] }
 0x3b7   :  { %v3602_v24 = vpack.c.bf16 %v11804_v36, %v11803_v2  ;;  %v11825_v26 = vld [vmem:[#allocation28_spill] sm:$0xff] }
 0x3b8   :  { %5528 = vmatpush3.bf16.msra.mxu0 %v6512_v40  ;;  %5592 = vmatpush3.bf16.msra.mxu1 %v6513_v44 }
 0x3ba   :  { %4298 = vmatmul.mubr.bf16.gmra.mrb[208].mxu0 %v3661_v21  ;;  %4395 = vmatmul.mubr.bf16.gmra.mrb[208].mxu1 %v3663_v43 }
 0x3bb   :  { %4305 = vmatprep.mubr.bf16.mxu0 %v11792_v54  ;;  %4402 = vmatprep.mubr.bf16.mxu1 %v11793_v28  ;;  %v11799_v54 = vpack.c.bf16 %v9970_v19, %v11728_v17  ;;  %v11805_v28 = vld [vmem:[#allocation15_spill] sm:$0xff]  ;;  %v11807_v19 = vpack.c.bf16 %v10132_v58, %v10043_v13  ;;  %v11812_v17 = vld [vmem:[#allocation20_spill] sm:$0xff] }
 0x3bc   :  { %v5175_v30 = vpop.f32.mrb[148].mxu0  ;;  %v3603_v35 = vpack.c.bf16 %v11812_v17, %v11811_v57  ;;  %v11827_v57 = vld [vmem:[#allocation62_spill] sm:$0xff]  ;;  %v11828_v17 = vld [vmem:[#allocation37_spill] sm:$0xff] }
 0x3bd   :  { %v5176_v23 = vpop.f32.mrb[149].mxu0 }
 0x3be   :  { %v5177_v47 = vadd.f32 %v5176_v23, %v5175_v30  ;;  %v5178_v45 = vpop.f32.mrb[150].mxu0  ;;  %v11806_v30 = vld [vmem:[#allocation54_spill] sm:$0xff] }
 0x3bf   :  { %v5239_v8 = vpop.f32.mrb[148].mxu1  ;;  %v5179_v29 = vpop.f32.mrb[151].mxu0  ;;  %v3604_v23 = vpack.c.bf16 %v11806_v30, %v11805_v28 }
 0x3c0   :  { %v5240_v56 = vpop.f32.mrb[149].mxu1  ;;  %v5180_v41 = vadd.f32 %v5179_v29, %v5178_v45 }
 0x3c1   :  { %v5241_v14 = vadd.f32 %v5240_v56, %v5239_v8  ;;  %v5242_v21 = vpop.f32.mrb[150].mxu1  ;;  %v11813_v8 = vld [vmem:[#allocation175_spill] sm:$0xff] }
 0x3c2   :  { %4306 = vmatmul.mubr.bf16.gmra.mrb[212].mxu0 %v3677_v60  ;;  %4403 = vmatmul.mubr.bf16.gmra.mrb[212].mxu1 %v11796_v51  ;;  %v5243_v49 = vpop.f32.mrb[151].mxu1  ;;  %v3620_v60 = vpack.c.bf16 %v11816_v11, %v11815_v37  ;;  %v11819_v51 = vld [vmem:[#allocation176_spill] sm:$0xff]  ;;  %v11831_v37 = vld [vmem:[#allocation33_spill] sm:$0xff] }
 0x3c3   :  { %4313 = vmatprep.mubr.bf16.mxu0 %v11797_v15  ;;  %4410 = vmatprep.mubr.bf16.mxu1 %v11798_v4  ;;  %v10400_v43 = vadd.f32 %v5241_v14, %v5177_v47  ;;  %v5244_v40 = vadd.f32 %v5243_v49, %v5242_v21  ;;  %v11814_v47 = vld [vmem:[#allocation123_spill] sm:$0xff]  ;;  %v11817_v14 = vld [vmem:[#allocation174_spill] sm:$0xff]  ;;  %v11818_v21 = vld [vmem:[#allocation121_spill] sm:$0xff] }
 0x3c4   :  { %v3618_v45 = vpack.c.bf16 %v11814_v47, %v11813_v8  ;;  %v3617_v29 = vpack.c.bf16 %v11818_v21, %v11817_v14  ;;  %v11829_v8 = vld [vmem:[#allocation30_spill] sm:$0xff]  ;;  %v11830_v47 = vld [vmem:[#allocation131_spill] sm:$0xff]  ;;  %v11832_v11 = vld [vmem:[#allocation185_spill] sm:$0xff] }
 0x3c5   :  { %v10402_v44 = vadd.f32 %v5244_v40, %v5180_v41  ;;  %v11820_v41 = vld [vmem:[#allocation177_spill] sm:$0xff]  ;;  %v11821_v40 = vld [vmem:[#allocation60_spill] sm:$0xff] }
 0x3c6   :  { %v3619_v49 = vpack.c.bf16 %v11820_v41, %v11819_v51  ;;  %v11837_v21 = vld [vmem:[#allocation133_spill] sm:$0xff] }
 0x3c7   :  { %v11839_v41 = vld [vmem:[#allocation137_spill] sm:$0xff] }
 0x3ca   :  { %4314 = vmatmul.mubr.bf16.gmra.mrb[216].mxu0 %v11799_v54  ;;  %4411 = vmatmul.mubr.bf16.gmra.mrb[216].mxu1 %v11800_v18  ;;  %v11822_v54 = vld [vmem:[#allocation35_spill] sm:$0xff] }
 0x3cb   :  { %4321 = vmatprep.mubr.bf16.mxu0 %v11801_v59  ;;  %4418 = vmatprep.mubr.bf16.mxu1 %v11802_v6  ;;  %v3634_v18 = vpack.c.bf16 %v11822_v54, %v11821_v40  ;;  %v11823_v59 = vld [vmem:[#allocation64_spill] sm:$0xff]  ;;  %v11824_v6 = vld [vmem:[#allocation66_spill] sm:$0xff] }
 0x3cc   :  { %v3636_v2 = vpack.c.bf16 %v11824_v6, %v11823_v59  ;;  %v11842_v40 = vld [vmem:[#allocation38_spill] sm:$0xff]  ;;  %v11844_v59 = vld [vmem:[#allocation41_spill] sm:$0xff] }
 0x3d2   :  { %4322 = vmatmul.mubr.bf16.gmra.mrb[220].mxu0 %v11807_v19  ;;  %4419 = vmatmul.mubr.bf16.gmra.mrb[220].mxu1 %v11808_v0 }
 0x3d3   :  { %4459 = vmatprep.mubr.bf16.mxu0 %v3602_v24  ;;  %4556 = vmatprep.mubr.bf16.mxu1 %v3604_v23 }
 0x3da   :  { %4460 = vmatmul.mubr.bf16.vlgmr.msra.gmra.mrb[224].mxu0 %v3601_v12  ;;  %4557 = vmatmul.mubr.bf16.vlgmr.msra.gmra.mrb[224].mxu1 %v3603_v35  ;;  %v3633_v12 = vpack.c.bf16 %v11826_v55, %v11825_v26  ;;  %v3635_v35 = vpack.c.bf16 %v11828_v17, %v11827_v57  ;;  %v11848_v57 = vld [vmem:[#allocation172_spill] sm:$0xff]  ;;  %v11849_v17 = vld [vmem:[#allocation134_spill] sm:$0xff] }
 0x3db   :  { %4467 = vmatprep.mubr.bf16.mxu0 %v3618_v45  ;;  %4564 = vmatprep.mubr.bf16.mxu1 %v3620_v60  ;;  %v3650_v45 = vpack.c.bf16 %v11830_v47, %v11829_v8  ;;  %v3652_v60 = vpack.c.bf16 %v11832_v11, %v11831_v37  ;;  %v11850_v8 = vld [vmem:[#allocation78_spill] sm:$0xff] }
 0x3dc   :  { %v11851_v47 = vld [vmem:[#allocation138_spill] sm:$0xff] }
 0x3dd   :  { %v5181_v13 = vpop.f32.mrb[152].mxu0 }
 0x3de   :  { %v5182_v63 = vpop.f32.mrb[153].mxu0 }
 0x3df   :  { %v5245_v58 = vpop.f32.mrb[152].mxu1  ;;  %v5183_v33 = vadd.f32 %v5182_v63, %v5181_v13  ;;  %v5184_v56 = vpop.f32.mrb[154].mxu0  ;;  %v11833_v13 = vld [vmem:[#allocation183_spill] sm:$0xff]  ;;  %v11834_v63 = vld [vmem:[#allocation129_spill] sm:$0xff] }
 0x3e0   :  { %v5246_v15 = vpop.f32.mrb[153].mxu1  ;;  %v5185_v4 = vpop.f32.mrb[155].mxu0 }
 0x3e1   :  { %v5247_v36 = vadd.f32 %v5246_v15, %v5245_v58  ;;  %v5248_v24 = vpop.f32.mrb[154].mxu1  ;;  %v5186_v28 = vadd.f32 %v5185_v4, %v5184_v56  ;;  %v3649_v58 = vpack.c.bf16 %v11834_v63, %v11833_v13  ;;  %v11836_v56 = vld [vmem:[#allocation184_spill] sm:$0xff] }
 0x3e2   :  { %4468 = vmatmul.mubr.bf16.gmra.mrb[228].mxu0 %v3617_v29  ;;  %4565 = vmatmul.mubr.bf16.gmra.mrb[228].mxu1 %v3619_v49  ;;  %v5249_v30 = vpop.f32.mrb[155].mxu1  ;;  %v11838_v29 = vld [vmem:[#allocation40_spill] sm:$0xff] }
 0x3e3   :  { %4475 = vmatprep.mubr.bf16.mxu0 %v3634_v18  ;;  %4572 = vmatprep.mubr.bf16.mxu1 %v3636_v2  ;;  %v10442_v23 = vadd.f32 %v5247_v36, %v5183_v33  ;;  %v5250_v19 = vadd.f32 %v5249_v30, %v5248_v24  ;;  %v11835_v33 = vld [vmem:[#allocation32_spill] sm:$0xff]  ;;  %v3666_v51 = vpack.c.bf16 %v11838_v29, %v11837_v21  ;;  %v11843_v18 = vld [vmem:[#allocation135_spill] sm:$0xff] }
 0x3e4   :  { %v3651_v14 = vpack.c.bf16 %v11836_v56, %v11835_v33  ;;  %v11840_v49 = vld [vmem:[#allocation44_spill] sm:$0xff]  ;;  %v3667_v6 = vpack.c.bf16 %v11844_v59, %v11843_v18  ;;  %v11856_v59 = vpack.c.bf16 %v10184_v42, %v10073_v31 }
 0x3e5   :  { %v10444_v0 = vadd.f32 %v5250_v19, %v5186_v28  ;;  %v3668_v15 = vpack.c.bf16 %v11840_v49, %v11839_v41  ;;  %v11841_v4 = vld [vmem:[#allocation132_spill] sm:$0xff]  ;;  %v11847_v28 = vpack.c.bf16 %v11741_v62, %v11740_v39  ;;  %v11852_v62 = vpack.c.bf16 %v11743_v25, %v11742_v3 }
 0x3e6   :  { %v3665_v54 = vpack.c.bf16 %v11842_v40, %v11841_v4  ;;  %v11845_v2 = vld [vmem:[#allocation76_spill] sm:$0xff] }
 0x3e7   :  { %v11846_v36 = vld [vmem:[#allocation136_spill] sm:$0xff] }
 0x3e8   :  { %v3682_v24 = vpack.c.bf16 %v11846_v36, %v11845_v2 }
 0x3ea   :  { %4476 = vmatmul.mubr.bf16.gmra.mrb[232].mxu0 %v3633_v12  ;;  %4573 = vmatmul.mubr.bf16.gmra.mrb[232].mxu1 %v3635_v35  ;;  %v3681_v35 = vpack.c.bf16 %v11849_v17, %v11848_v57 }
 0x3eb   :  { %4483 = vmatprep.mubr.bf16.mxu0 %v3650_v45  ;;  %4580 = vmatprep.mubr.bf16.mxu1 %v3652_v60  ;;  %v3683_v45 = vpack.c.bf16 %v11851_v47, %v11850_v8 }
 0x3f2   :  { %4484 = vmatmul.mubr.bf16.gmra.mrb[236].mxu0 %v3649_v58  ;;  %4581 = vmatmul.mubr.bf16.gmra.mrb[236].mxu1 %v3651_v14  ;;  %v11853_v58 = vpack.c.bf16 %v10013_v10, %v11744_v9  ;;  %v11854_v10 = vpack.c.bf16 %v11746_v38, %v11745_v5  ;;  %v11855_v9 = vpack.c.bf16 %v10004_v7, %v11747_v34  ;;  %v11858_v38 = vld [vmem:[#allocation140_spill] sm:$0xff]  ;;  %v11860_v34 = vld [vmem:[#allocation145_spill] sm:$0xff] }
 0x3f3   :  { %4491 = vmatprep.mubr.bf16.mxu0 %v3666_v51  ;;  %4588 = vmatprep.mubr.bf16.mxu1 %v3668_v15  ;;  %v11859_v7 = vpack.c.bf16 %v10181_v20, %v11858_v38 }
 0x3fa   :  { %4492 = vmatmul.mubr.bf16.gmra.mrb[240].mxu0 %v3665_v54  ;;  %4589 = vmatmul.mubr.bf16.gmra.mrb[240].mxu1 %v3667_v6  ;;  %v11857_v6 = vpack.c.bf16 %v10206_v27, %v10130_v16 }
 0x3fb   :  { %4499 = vmatprep.mubr.bf16.mxu0 %v3682_v24  ;;  %4596 = vmatprep.mubr.bf16.mxu1 %v11847_v28  ;;  %v11861_v24 = vld [vmem:[#allocation141_spill] sm:$0xff] }
 0x3fc   :  { %v11862_v28 = vpack.c.bf16 %v11860_v34, %v11861_v24 }
 0x3fd   :  { %v5187_v30 = vpop.f32.mrb[156].mxu0 }
 0x3fe   :  { %v5188_v19 = vpop.f32.mrb[157].mxu0 }
 0x3ff   :  { %v5251_v26 = vpop.f32.mrb[156].mxu1  ;;  %v5189_v55 = vadd.f32 %v5188_v19, %v5187_v30  ;;  %v5190_v12 = vpop.f32.mrb[158].mxu0 }
 0x400   :  { %v5252_v37 = vpop.f32.mrb[157].mxu1  ;;  %v5191_v11 = vpop.f32.mrb[159].mxu0 }
 0x401   :  { %v5253_v60 = vadd.f32 %v5252_v37, %v5251_v26  ;;  %v5254_v13 = vpop.f32.mrb[158].mxu1  ;;  %v5192_v63 = vadd.f32 %v5191_v11, %v5190_v12 }
 0x402   :  { %4500 = vmatmul.mubr.bf16.gmra.mrb[244].mxu0 %v3681_v35  ;;  %4597 = vmatmul.mubr.bf16.gmra.mrb[244].mxu1 %v3683_v45  ;;  %v5255_v39 = vpop.f32.mrb[159].mxu1 }
 0x403   :  { %4507 = vmatprep.mubr.bf16.mxu0 %v11852_v62  ;;  %4604 = vmatprep.mubr.bf16.mxu1 %v11853_v58  ;;  %v10481_v33 = vadd.f32 %v5253_v60, %v5189_v55  ;;  %v5256_v56 = vadd.f32 %v5255_v39, %v5254_v13 }
 0x405   :  { %v10483_v14 = vadd.f32 %v5256_v56, %v5192_v63  ;;  %v5273_v21 = vpop.f32.mrb[160].mxu0 }
 0x406   :  { %v5274_v29 = vpop.f32.mrb[161].mxu0 }
 0x407   :  { %v5337_v51 = vpop.f32.mrb[160].mxu1  ;;  %v5275_v41 = vadd.f32 %v5274_v29, %v5273_v21  ;;  %v5276_v49 = vpop.f32.mrb[162].mxu0 }
 0x408   :  { %v5338_v15 = vpop.f32.mrb[161].mxu1  ;;  %v5277_v4 = vpop.f32.mrb[163].mxu0 }
 0x409   :  { %v4074_v40 = vadd.f32 %v5275_v41, %v10202_v1  ;;  %v5339_v3 = vadd.f32 %v5338_v15, %v5337_v51  ;;  %v5340_v25 = vpop.f32.mrb[162].mxu1  ;;  %v5278_v54 = vadd.f32 %v5277_v4, %v5276_v49  ;;  %v11863_v41 = vld [vmem:[#allocation195_spill] sm:$0xff] }
 0x40a   :  { %4508 = vmatmul.mubr.bf16.gmra.mrb[248].mxu0 %v11854_v10  ;;  %4605 = vmatmul.mubr.bf16.gmra.mrb[248].mxu1 %v11855_v9  ;;  %v5341_v18 = vpop.f32.mrb[163].mxu1 }
 0x40b   :  { %4515 = vmatprep.mubr.bf16.mxu0 %v11856_v59  ;;  %4612 = vmatprep.mubr.bf16.mxu1 %v11857_v6  ;;  %v10498_v1 = vadd.f32 %v5339_v3, %v4074_v40  ;;  %v4077_v2 = vadd.f32 %v5278_v54, %v10204_v52  ;;  %v5342_v36 = vadd.f32 %v5341_v18, %v5340_v25 }
 0x40d   :  { %v10501_v5 = vadd.f32 %v5342_v36, %v4077_v2 }
 0x412   :  { %4516 = vmatmul.mubr.bf16.gmra.mrb[252].mxu0 %v11859_v7  ;;  %4613 = vmatmul.mubr.bf16.gmra.mrb[252].mxu1 %v11862_v28 }
 0x41f   :  { %v5279_v31 = vpop.f32.mrb[164].mxu0 }
 0x420   :  { %v5343_v42 = vpop.f32.mrb[164].mxu1  ;;  %v5280_v30 = vpop.f32.mrb[165].mxu0 }
 0x421   :  { %v5281_v16 = vadd.f32 %v5280_v30, %v5279_v31  ;;  %v5344_v27 = vpop.f32.mrb[165].mxu1  ;;  %v5282_v19 = vpop.f32.mrb[166].mxu0 }
 0x422   :  { %v5345_v26 = vadd.f32 %v5344_v27, %v5343_v42  ;;  %v5346_v55 = vpop.f32.mrb[166].mxu1  ;;  %v5283_v52 = vpop.f32.mrb[167].mxu0 }
 0x423   :  { %v4082_v12 = vadd.f32 %v5281_v16, %v10241_v22  ;;  %v5284_v57 = vadd.f32 %v5283_v52, %v5282_v19  ;;  %v5347_v17 = vpop.f32.mrb[167].mxu1 }
 0x424   :  { %v5348_v35 = vadd.f32 %v5347_v17, %v5346_v55 }
 0x425   :  { %v10510_v20 = vadd.f32 %v5345_v26, %v4082_v12  ;;  %v4085_v8 = vadd.f32 %v5284_v57, %v10243_v50 }
 0x427   :  { %v10513_v47 = vadd.f32 %v5348_v35, %v4085_v8 }
 0x438   :  { %v5285_v45 = vpop.f32.mrb[168].mxu0  ;;  %v5349_v37 = vpop.f32.mrb[168].mxu1 }
 0x439   :  { %v5286_v11 = vpop.f32.mrb[169].mxu0  ;;  %v5350_v13 = vpop.f32.mrb[169].mxu1 }
 0x43a   :  { %v5287_v60 = vadd.f32 %v5286_v11, %v5285_v45  ;;  %v5288_v63 = vpop.f32.mrb[170].mxu0  ;;  %v5351_v39 = vadd.f32 %v5350_v13, %v5349_v37  ;;  %v5352_v62 = vpop.f32.mrb[170].mxu1 }
 0x43b   :  { %v5289_v58 = vpop.f32.mrb[171].mxu0  ;;  %v5353_v21 = vpop.f32.mrb[171].mxu1 }
 0x43c   :  { %v4090_v22 = vadd.f32 %v5287_v60, %v10285_v48  ;;  %v5290_v56 = vadd.f32 %v5289_v58, %v5288_v63  ;;  %v5354_v29 = vadd.f32 %v5353_v21, %v5352_v62 }
 0x43e   :  { %v10516_v51 = vadd.f32 %v5351_v39, %v4090_v22  ;;  %v4093_v50 = vadd.f32 %v5290_v56, %v11863_v41 }
 0x440   :  { %v10519_v49 = vadd.f32 %v5354_v29, %v4093_v50 }
 0x444   :  { %v5291_v15 = vpop.f32.mrb[172].mxu0  ;;  %v5355_v4 = vpop.f32.mrb[172].mxu1 }
 0x445   :  { %v5292_v40 = vpop.f32.mrb[173].mxu0  ;;  %v5356_v3 = vpop.f32.mrb[173].mxu1 }
 0x446   :  { %v5293_v25 = vadd.f32 %v5292_v40, %v5291_v15  ;;  %v5357_v54 = vadd.f32 %v5356_v3, %v5355_v4  ;;  %v5294_v10 = vpop.f32.mrb[174].mxu0  ;;  %v5358_v9 = vpop.f32.mrb[174].mxu1 }
 0x447   :  { %v5295_v18 = vpop.f32.mrb[175].mxu0  ;;  %v5359_v59 = vpop.f32.mrb[175].mxu1 }
 0x448   :  { %v4098_v48 = vadd.f32 %v5293_v25, %v10301_v61  ;;  %v5296_v6 = vadd.f32 %v5295_v18, %v5294_v10  ;;  %v5360_v2 = vadd.f32 %v5359_v59, %v5358_v9 }
 0x44a   :  { %v10522_v36 = vadd.f32 %v5357_v54, %v4098_v48  ;;  %v4101_v38 = vadd.f32 %v5296_v6, %v10313_v32 }
 0x44c   :  { %v10525_v7 = vadd.f32 %v5360_v2, %v4101_v38  ;;  %v5297_v34 = vpop.f32.mrb[176].mxu0  ;;  %v5361_v24 = vpop.f32.mrb[176].mxu1 }
 0x44d   :  { %v5298_v28 = vpop.f32.mrb[177].mxu0  ;;  %v5362_v31 = vpop.f32.mrb[177].mxu1 }
 0x44e   :  { %v5299_v42 = vadd.f32 %v5298_v28, %v5297_v34  ;;  %v5363_v30 = vadd.f32 %v5362_v31, %v5361_v24  ;;  %v5300_v16 = vpop.f32.mrb[178].mxu0  ;;  %v5364_v27 = vpop.f32.mrb[178].mxu1 }
 0x44f   :  { %v5301_v19 = vpop.f32.mrb[179].mxu0  ;;  %v5365_v26 = vpop.f32.mrb[179].mxu1 }
 0x450   :  { %v4106_v61 = vadd.f32 %v5299_v42, %v10325_v46  ;;  %v5302_v55 = vadd.f32 %v5301_v19, %v5300_v16  ;;  %v5366_v52 = vadd.f32 %v5365_v26, %v5364_v27 }
 0x452   :  { %v10528_v12 = vadd.f32 %v5363_v30, %v4106_v61  ;;  %v4109_v32 = vadd.f32 %v5302_v55, %v10333_v53 }
 0x454   :  { %v10531_v57 = vadd.f32 %v5366_v52, %v4109_v32  ;;  %v5303_v17 = vpop.f32.mrb[180].mxu0 }
 0x455   :  { %v5367_v35 = vpop.f32.mrb[180].mxu1  ;;  %v5304_v8 = vpop.f32.mrb[181].mxu0 }
 0x456   :  { %v5368_v45 = vpop.f32.mrb[181].mxu1  ;;  %v5305_v37 = vadd.f32 %v5304_v8, %v5303_v17  ;;  %v5306_v60 = vpop.f32.mrb[182].mxu0 }
 0x457   :  { %v5369_v11 = vadd.f32 %v5368_v45, %v5367_v35  ;;  %v5370_v13 = vpop.f32.mrb[182].mxu1  ;;  %v5307_v63 = vpop.f32.mrb[183].mxu0 }
 0x458   :  { %v5371_v39 = vpop.f32.mrb[183].mxu1  ;;  %v4114_v46 = vadd.f32 %v5305_v37, %v10400_v43  ;;  %v5308_v62 = vadd.f32 %v5307_v63, %v5306_v60 }
 0x459   :  { %v5372_v58 = vadd.f32 %v5371_v39, %v5370_v13 }
 0x45a   :  { %v10534_v22 = vadd.f32 %v5369_v11, %v4114_v46  ;;  %v4117_v53 = vadd.f32 %v5308_v62, %v10402_v44 }
 0x45c   :  { %v10537_v56 = vadd.f32 %v5372_v58, %v4117_v53  ;;  %v5309_v21 = vpop.f32.mrb[184].mxu0 }
 0x45d   :  { %v5373_v29 = vpop.f32.mrb[184].mxu1  ;;  %v5310_v41 = vpop.f32.mrb[185].mxu0 }
 0x45e   :  { %v5374_v50 = vpop.f32.mrb[185].mxu1  ;;  %v5311_v15 = vadd.f32 %v5310_v41, %v5309_v21  ;;  %v5312_v40 = vpop.f32.mrb[186].mxu0 }
 0x45f   :  { %v5375_v4 = vadd.f32 %v5374_v50, %v5373_v29  ;;  %v5376_v3 = vpop.f32.mrb[186].mxu1  ;;  %v5313_v25 = vpop.f32.mrb[187].mxu0 }
 0x460   :  { %v5377_v54 = vpop.f32.mrb[187].mxu1  ;;  %v4122_v43 = vadd.f32 %v5311_v15, %v10442_v23  ;;  %v5314_v10 = vadd.f32 %v5313_v25, %v5312_v40 }
 0x461   :  { %v5378_v9 = vadd.f32 %v5377_v54, %v5376_v3 }
 0x462   :  { %v10540_v18 = vadd.f32 %v5375_v4, %v4122_v43  ;;  %v4125_v44 = vadd.f32 %v5314_v10, %v10444_v0 }
 0x464   :  { %v10543_v59 = vadd.f32 %v5378_v9, %v4125_v44 }
 0x465   :  { %v5315_v48 = vpop.f32.mrb[188].mxu0  ;;  %v5379_v6 = vpop.f32.mrb[188].mxu1 }
 0x466   :  { %v5316_v2 = vpop.f32.mrb[189].mxu0  ;;  %v5380_v38 = vpop.f32.mrb[189].mxu1 }
 0x467   :  { %v5317_v34 = vadd.f32 %v5316_v2, %v5315_v48  ;;  %v5381_v24 = vadd.f32 %v5380_v38, %v5379_v6  ;;  %v5318_v28 = vpop.f32.mrb[190].mxu0  ;;  %v5382_v31 = vpop.f32.mrb[190].mxu1 }
 0x468   :  { %v5319_v42 = vpop.f32.mrb[191].mxu0  ;;  %v5383_v30 = vpop.f32.mrb[191].mxu1 }
 0x469   :  { %v4130_v23 = vadd.f32 %v5317_v34, %v10481_v33  ;;  %v5320_v16 = vadd.f32 %v5319_v42, %v5318_v28  ;;  %v5384_v27 = vadd.f32 %v5383_v30, %v5382_v31 }
 0x46b   :  { %v10546_v19 = vadd.f32 %v5381_v24, %v4130_v23  ;;  %v4133_v0 = vadd.f32 %v5320_v16, %v10483_v14 }
 0x46d   :  { %v10549_v26 = vadd.f32 %v5384_v27, %v4133_v0  ;;  %v5401_v61 = vpop.f32.mrb[192].mxu0  ;;  %v5465_v55 = vpop.f32.mrb[192].mxu1 }
 0x46e   :  { %v5402_v52 = vpop.f32.mrb[193].mxu0  ;;  %v5466_v32 = vpop.f32.mrb[193].mxu1 }
 0x46f   :  { %v5403_v17 = vadd.f32 %v5402_v52, %v5401_v61  ;;  %v5467_v35 = vadd.f32 %v5466_v32, %v5465_v55  ;;  %v5404_v8 = vpop.f32.mrb[194].mxu0  ;;  %v5468_v45 = vpop.f32.mrb[194].mxu1 }
 0x470   :  { %v5405_v37 = vpop.f32.mrb[195].mxu0  ;;  %v5469_v11 = vpop.f32.mrb[195].mxu1 }
 0x471   :  { %v4268_v33 = vadd.f32 %v5403_v17, %v10498_v1  ;;  %v5406_v60 = vadd.f32 %v5405_v37, %v5404_v8  ;;  %v5470_v13 = vadd.f32 %v5469_v11, %v5468_v45 }
 0x473   :  { %v10552_v63 = vadd.f32 %v5467_v35, %v4268_v33  ;;  %v4271_v14 = vadd.f32 %v5406_v60, %v10501_v5 }
 0x475   :  { %v10555_v39 = vadd.f32 %v5470_v13, %v4271_v14  ;;  %v5407_v46 = vpop.f32.mrb[196].mxu0  ;;  %v5471_v62 = vpop.f32.mrb[196].mxu1 }
 0x476   :  { %v5408_v58 = vpop.f32.mrb[197].mxu0  ;;  %v5472_v53 = vpop.f32.mrb[197].mxu1 }
 0x477   :  { %v5409_v21 = vadd.f32 %v5408_v58, %v5407_v46  ;;  %v5473_v29 = vadd.f32 %v5472_v53, %v5471_v62  ;;  %v5410_v41 = vpop.f32.mrb[198].mxu0  ;;  %v5474_v50 = vpop.f32.mrb[198].mxu1 }
 0x478   :  { %v5411_v15 = vpop.f32.mrb[199].mxu0  ;;  %v5475_v4 = vpop.f32.mrb[199].mxu1 }
 0x479   :  { %v4276_v1 = vadd.f32 %v5409_v21, %v10510_v20  ;;  %v5412_v40 = vadd.f32 %v5411_v15, %v5410_v41  ;;  %v5476_v3 = vadd.f32 %v5475_v4, %v5474_v50 }
 0x47b   :  { %v10558_v25 = vadd.f32 %v5473_v29, %v4276_v1  ;;  %v4279_v5 = vadd.f32 %v5412_v40, %v10513_v47 }
 0x47d   :  { %v10561_v54 = vadd.f32 %v5476_v3, %v4279_v5  ;;  %v5413_v43 = vpop.f32.mrb[200].mxu0  ;;  %v5477_v10 = vpop.f32.mrb[200].mxu1 }
 0x47e   :  { %v5414_v9 = vpop.f32.mrb[201].mxu0  ;;  %v5478_v44 = vpop.f32.mrb[201].mxu1 }
 0x47f   :  { %v5415_v48 = vadd.f32 %v5414_v9, %v5413_v43  ;;  %v5479_v6 = vadd.f32 %v5478_v44, %v5477_v10  ;;  %v5416_v2 = vpop.f32.mrb[202].mxu0  ;;  %v5480_v38 = vpop.f32.mrb[202].mxu1 }
 0x480   :  { %v5417_v34 = vpop.f32.mrb[203].mxu0  ;;  %v5481_v24 = vpop.f32.mrb[203].mxu1 }
 0x481   :  { %v4284_v20 = vadd.f32 %v5415_v48, %v10516_v51  ;;  %v5418_v28 = vadd.f32 %v5417_v34, %v5416_v2  ;;  %v5482_v31 = vadd.f32 %v5481_v24, %v5480_v38 }
 0x483   :  { %v10564_v42 = vadd.f32 %v5479_v6, %v4284_v20  ;;  %v4287_v47 = vadd.f32 %v5418_v28, %v10519_v49 }
 0x485   :  { %v10567_v30 = vadd.f32 %v5482_v31, %v4287_v47  ;;  %v5419_v23 = vpop.f32.mrb[204].mxu0  ;;  %v5483_v16 = vpop.f32.mrb[204].mxu1 }
 0x486   :  { %v5420_v27 = vpop.f32.mrb[205].mxu0  ;;  %v5484_v0 = vpop.f32.mrb[205].mxu1 }
 0x487   :  { %v5421_v61 = vadd.f32 %v5420_v27, %v5419_v23  ;;  %v5485_v55 = vadd.f32 %v5484_v0, %v5483_v16  ;;  %v5422_v52 = vpop.f32.mrb[206].mxu0  ;;  %v5486_v32 = vpop.f32.mrb[206].mxu1 }
 0x488   :  { %v5423_v17 = vpop.f32.mrb[207].mxu0  ;;  %v5487_v35 = vpop.f32.mrb[207].mxu1 }
 0x489   :  { %v4292_v51 = vadd.f32 %v5421_v61, %v10522_v36  ;;  %v5424_v8 = vadd.f32 %v5423_v17, %v5422_v52  ;;  %v5488_v45 = vadd.f32 %v5487_v35, %v5486_v32  ;;  %v3333_v35 = vpop.xlane.xlu0 %3332 }
 0x48a   :  { %6353 = vrcp.f32 %v3333_v35 }
 0x48b   :  { %v10570_v37 = vadd.f32 %v5485_v55, %v4292_v51  ;;  %v4295_v49 = vadd.f32 %v5424_v8, %v10525_v7 }
 0x48d   :  { %v10573_v11 = vadd.f32 %v5488_v45, %v4295_v49  ;;  %v5425_v33 = vpop.f32.mrb[208].mxu0  ;;  %v5489_v60 = vpop.f32.mrb[208].mxu1 }
 0x48e   :  { %v5426_v13 = vpop.f32.mrb[209].mxu0  ;;  %v5490_v14 = vpop.f32.mrb[209].mxu1 }
 0x48f   :  { %v5427_v46 = vadd.f32 %v5426_v13, %v5425_v33  ;;  %v5491_v62 = vadd.f32 %v5490_v14, %v5489_v60  ;;  %v5428_v58 = vpop.f32.mrb[210].mxu0  ;;  %v5492_v53 = vpop.f32.mrb[210].mxu1 }
 0x490   :  { %v5429_v21 = vpop.f32.mrb[211].mxu0  ;;  %v5493_v29 = vpop.f32.mrb[211].mxu1 }
 0x491   :  { %v4300_v36 = vadd.f32 %v5427_v46, %v10528_v12  ;;  %v5430_v41 = vadd.f32 %v5429_v21, %v5428_v58  ;;  %v5494_v50 = vadd.f32 %v5493_v29, %v5492_v53 }
 0x493   :  { %v10576_v15 = vadd.f32 %v5491_v62, %v4300_v36  ;;  %v4303_v7 = vadd.f32 %v5430_v41, %v10531_v57  ;;  %v3367_v41 = vpop.xlane.xlu0 %3366 }
 0x495   :  { %v10579_v4 = vadd.f32 %v5494_v50, %v4303_v7  ;;  %v5431_v1 = vpop.f32.mrb[212].mxu0  ;;  %v5495_v40 = vpop.f32.mrb[212].mxu1 }
 0x496   :  { %v5432_v3 = vpop.f32.mrb[213].mxu0  ;;  %v5496_v5 = vpop.f32.mrb[213].mxu1 }
 0x497   :  { %v5433_v43 = vadd.f32 %v5432_v3, %v5431_v1  ;;  %v5497_v10 = vadd.f32 %v5496_v5, %v5495_v40  ;;  %v5434_v9 = vpop.f32.mrb[214].mxu0  ;;  %v5498_v44 = vpop.f32.mrb[214].mxu1 }
 0x498   :  { %v5435_v48 = vpop.f32.mrb[215].mxu0  ;;  %v5499_v6 = vpop.f32.mrb[215].mxu1 }
 0x499   :  { %v4308_v12 = vadd.f32 %v5433_v43, %v10534_v22  ;;  %v5436_v2 = vadd.f32 %v5435_v48, %v5434_v9  ;;  %v5500_v38 = vadd.f32 %v5499_v6, %v5498_v44 }
 0x49b   :  { %v10582_v34 = vadd.f32 %v5497_v10, %v4308_v12  ;;  %v4311_v57 = vadd.f32 %v5436_v2, %v10537_v56 }
 0x49d   :  { %v10585_v24 = vadd.f32 %v5500_v38, %v4311_v57  ;;  %v5437_v20 = vpop.f32.mrb[216].mxu0  ;;  %v5501_v28 = vpop.f32.mrb[216].mxu1 }
 0x49e   :  { %v5438_v31 = vpop.f32.mrb[217].mxu0  ;;  %v5502_v47 = vpop.f32.mrb[217].mxu1 }
 0x49f   :  { %v5439_v23 = vadd.f32 %v5438_v31, %v5437_v20  ;;  %v5503_v16 = vadd.f32 %v5502_v47, %v5501_v28  ;;  %v5440_v27 = vpop.f32.mrb[218].mxu0  ;;  %v5504_v0 = vpop.f32.mrb[218].mxu1 }
 0x4a0   :  { %v5441_v61 = vpop.f32.mrb[219].mxu0  ;;  %v5505_v55 = vpop.f32.mrb[219].mxu1 }
 0x4a1   :  { %v4316_v22 = vadd.f32 %v5439_v23, %v10540_v18  ;;  %v5442_v52 = vadd.f32 %v5441_v61, %v5440_v27  ;;  %v5506_v32 = vadd.f32 %v5505_v55, %v5504_v0  ;;  %v3350_v18 = vpop.xlane.xlu1 %3349  ;;  %v6354_v57 = vpop.eup %6353 }
 0x4a2   :  { %6355 = vrcp.f32 %v3350_v18  ;;  %v3401_v20 = vpop.xlane.xlu0 %3400 }
 0x4a3   :  { %v10588_v17 = vadd.f32 %v5503_v16, %v4316_v22  ;;  %v4319_v56 = vadd.f32 %v5442_v52, %v10543_v59  ;;  %6357 = vrcp.f32 %v3367_v41 }
 0x4a5   :  { %v10591_v51 = vadd.f32 %v5506_v32, %v4319_v56  ;;  %v5443_v8 = vpop.f32.mrb[220].mxu0  ;;  %v5507_v45 = vpop.f32.mrb[220].mxu1 }
 0x4a6   :  { %v5444_v49 = vpop.f32.mrb[221].mxu0  ;;  %v5508_v33 = vpop.f32.mrb[221].mxu1 }
 0x4a7   :  { %v5445_v60 = vadd.f32 %v5444_v49, %v5443_v8  ;;  %v5509_v13 = vadd.f32 %v5508_v33, %v5507_v45  ;;  %v5446_v14 = vpop.f32.mrb[222].mxu0  ;;  %v5510_v46 = vpop.f32.mrb[222].mxu1 }
 0x4a8   :  { %v5447_v62 = vpop.f32.mrb[223].mxu0  ;;  %v5511_v58 = vpop.f32.mrb[223].mxu1 }
 0x4a9   :  { %v4324_v53 = vadd.f32 %v5445_v60, %v10546_v19  ;;  %v5448_v21 = vadd.f32 %v5447_v62, %v5446_v14  ;;  %v5512_v29 = vadd.f32 %v5511_v58, %v5510_v46  ;;  %v3384_v48 = vpop.xlane.xlu1 %3383 }
 0x4aa   :  { %6359 = vrcp.f32 %v3384_v48 }
 0x4ab   :  { %v10594_v59 = vadd.f32 %v5509_v13, %v4324_v53  ;;  %v4327_v36 = vadd.f32 %v5448_v21, %v10549_v26  ;;  %6361 = vrcp.f32 %v3401_v20  ;;  %v3435_v13 = vpop.xlane.xlu0 %3434 }
 0x4ac   :  { %v6356_v16 = vpop.eup %6355 }
 0x4ad   :  { %v10597_v50 = vadd.f32 %v5512_v29, %v4327_v36  ;;  %v5529_v7 = vpop.f32.mrb[224].mxu0  ;;  %v5593_v1 = vpop.f32.mrb[224].mxu1 }
 0x4ae   :  { %v5530_v40 = vpop.f32.mrb[225].mxu0  ;;  %v5594_v3 = vpop.f32.mrb[225].mxu1 }
 0x4af   :  { %v5531_v5 = vadd.f32 %v5530_v40, %v5529_v7  ;;  %v5595_v43 = vadd.f32 %v5594_v3, %v5593_v1  ;;  %v5532_v10 = vpop.f32.mrb[226].mxu0  ;;  %v5596_v9 = vpop.f32.mrb[226].mxu1 }
 0x4b0   :  { %v5533_v19 = vpop.f32.mrb[227].mxu0  ;;  %v5597_v44 = vpop.f32.mrb[227].mxu1 }
 0x4b1   :  { %v4462_v6 = vadd.f32 %v5531_v5, %v10552_v63  ;;  %v5534_v12 = vadd.f32 %v5533_v19, %v5532_v10  ;;  %v5598_v2 = vadd.f32 %v5597_v44, %v5596_v9  ;;  %v3418_v56 = vpop.xlane.xlu1 %3417  ;;  %v6358_v60 = vpop.eup %6357 }
 0x4b2   :  { %6363 = vrcp.f32 %v3418_v56  ;;  %v3469_v44 = vpop.xlane.xlu0 %3468 }
 0x4b3   :  { %v4559_v26 = vadd.f32 %v5595_v43, %v4462_v6  ;;  %v4465_v38 = vadd.f32 %v5534_v12, %v10555_v39  ;;  %6365 = vrcp.f32 %v3435_v13 }
 0x4b4   :  { %v6360_v18 = vpop.eup %6359 }
 0x4b5   :  { %v4622_v28 = vmul.f32 %v6354_v57, %v4559_v26  ;;  %v4562_v31 = vadd.f32 %v5598_v2, %v4465_v38  ;;  %v5535_v47 = vpop.f32.mrb[228].mxu0  ;;  %v5599_v23 = vpop.f32.mrb[228].mxu1 }
 0x4b6   :  { %v5536_v27 = vpop.f32.mrb[229].mxu0  ;;  %v5600_v0 = vpop.f32.mrb[229].mxu1 }
 0x4b7   :  { %4653 = vst.msk [vmem:[%s10681_s2] sm:$0xff] %vm964_vm0, %v4622_v28  ;;  %v4624_v63 = vmul.f32 %v6356_v16, %v4562_v31  ;;  %v5537_v61 = vadd.f32 %v5536_v27, %v5535_v47  ;;  %v5601_v55 = vadd.f32 %v5600_v0, %v5599_v23  ;;  %v5538_v22 = vpop.f32.mrb[230].mxu0  ;;  %v5602_v39 = vpop.f32.mrb[230].mxu1 }
 0x4b8   :  { %v5539_v52 = vpop.f32.mrb[231].mxu0  ;;  %v5603_v32 = vpop.f32.mrb[231].mxu1 }
 0x4b9   :  { %4654 = vst.msk [vmem:[%s10681_s2 + $0x8] sm:$0xff] %vm964_vm0, %v4624_v63  ;;  %v4470_v35 = vadd.f32 %v5537_v61, %v10558_v25  ;;  %v5540_v8 = vadd.f32 %v5539_v52, %v5538_v22  ;;  %v5604_v45 = vadd.f32 %v5603_v32, %v5602_v39  ;;  %v3452_v40 = vpop.xlane.xlu1 %3451  ;;  %v6362_v19 = vpop.eup %6361 }
 0x4ba   :  { %6367 = vrcp.f32 %v3452_v40  ;;  %v3503_v39 = vpop.xlane.xlu0 %3502 }
 0x4bb   :  { %v4567_v49 = vadd.f32 %v5601_v55, %v4470_v35  ;;  %v4473_v33 = vadd.f32 %v5540_v8, %v10561_v54  ;;  %6369 = vrcp.f32 %v3469_v44 }
 0x4bc   :  { %v6364_v26 = vpop.eup %6363 }
 0x4bd   :  { %v4626_v14 = vmul.f32 %v6358_v60, %v4567_v49  ;;  %v4570_v46 = vadd.f32 %v5604_v45, %v4473_v33  ;;  %v5541_v62 = vpop.f32.mrb[232].mxu0  ;;  %v5605_v58 = vpop.f32.mrb[232].mxu1 }
 0x4be   :  { %v5542_v53 = vpop.f32.mrb[233].mxu0  ;;  %v5606_v21 = vpop.f32.mrb[233].mxu1 }
 0x4bf   :  { %4655 = vst.msk [vmem:[%s10681_s2 + $0x10] sm:$0xff] %vm964_vm0, %v4626_v14  ;;  %v4628_v25 = vmul.f32 %v6360_v18, %v4570_v46  ;;  %v5543_v29 = vadd.f32 %v5542_v53, %v5541_v62  ;;  %v5607_v36 = vadd.f32 %v5606_v21, %v5605_v58  ;;  %v5544_v41 = vpop.f32.mrb[234].mxu0  ;;  %v5608_v54 = vpop.f32.mrb[234].mxu1 }
 0x4c0   :  { %v5545_v7 = vpop.f32.mrb[235].mxu0  ;;  %v5609_v1 = vpop.f32.mrb[235].mxu1 }
 0x4c1   :  { %4656 = vst.msk [vmem:[%s10681_s2 + $0x18] sm:$0xff] %vm964_vm0, %v4628_v25  ;;  %v4478_v3 = vadd.f32 %v5543_v29, %v10564_v42  ;;  %v5546_v5 = vadd.f32 %v5545_v7, %v5544_v41  ;;  %v5610_v43 = vadd.f32 %v5609_v1, %v5608_v54  ;;  %v3486_v16 = vpop.xlane.xlu1 %3485  ;;  %v6366_v22 = vpop.eup %6365 }
 0x4c2   :  { %6371 = vrcp.f32 %v3486_v16 }
 0x4c3   :  { %v4575_v10 = vadd.f32 %v5607_v36, %v4478_v3  ;;  %v4481_v9 = vadd.f32 %v5546_v5, %v10567_v30  ;;  %6373 = vrcp.f32 %v3503_v39  ;;  %v3537_v36 = vpop.xlane.xlu0 %3536 }
 0x4c4   :  { %v6368_v8 = vpop.eup %6367 }
 0x4c5   :  { %v4630_v48 = vmul.f32 %v6362_v19, %v4575_v10  ;;  %v4578_v6 = vadd.f32 %v5610_v43, %v4481_v9  ;;  %v5547_v12 = vpop.f32.mrb[236].mxu0  ;;  %v5611_v2 = vpop.f32.mrb[236].mxu1 }
 0x4c6   :  { %v5548_v38 = vpop.f32.mrb[237].mxu0  ;;  %v5612_v57 = vpop.f32.mrb[237].mxu1 }
 0x4c7   :  { %4657 = vst.msk [vmem:[%s10681_s2 + $0x20] sm:$0xff] %vm964_vm0, %v4630_v48  ;;  %v4632_v42 = vmul.f32 %v6364_v26, %v4578_v6  ;;  %v5549_v20 = vadd.f32 %v5548_v38, %v5547_v12  ;;  %v5613_v28 = vadd.f32 %v5612_v57, %v5611_v2  ;;  %v5550_v31 = vpop.f32.mrb[238].mxu0  ;;  %v5614_v30 = vpop.f32.mrb[238].mxu1 }
 0x4c8   :  { %v5551_v47 = vpop.f32.mrb[239].mxu0  ;;  %v5615_v23 = vpop.f32.mrb[239].mxu1 }
 0x4c9   :  { %4658 = vst.msk [vmem:[%s10681_s2 + $0x28] sm:$0xff] %vm964_vm0, %v4632_v42  ;;  %v4486_v27 = vadd.f32 %v5549_v20, %v10570_v37  ;;  %v5552_v0 = vadd.f32 %v5551_v47, %v5550_v31  ;;  %v5616_v63 = vadd.f32 %v5615_v23, %v5614_v30  ;;  %v3520_v62 = vpop.xlane.xlu1 %3519  ;;  %v6370_v29 = vpop.eup %6369 }
 0x4ca   :  { %6375 = vrcp.f32 %v3520_v62  ;;  %v3571_v42 = vpop.xlane.xlu0 %3570 }
 0x4cb   :  { %v4583_v61 = vadd.f32 %v5613_v28, %v4486_v27  ;;  %v4489_v55 = vadd.f32 %v5552_v0, %v10573_v11  ;;  %6377 = vrcp.f32 %v3537_v36 }
 0x4cc   :  { %v6372_v40 = vpop.eup %6371 }
 0x4cd   :  { %v4634_v52 = vmul.f32 %v6366_v22, %v4583_v61  ;;  %v4586_v32 = vadd.f32 %v5616_v63, %v4489_v55  ;;  %v5553_v56 = vpop.f32.mrb[240].mxu0  ;;  %v5617_v35 = vpop.f32.mrb[240].mxu1 }
 0x4ce   :  { %v5554_v45 = vpop.f32.mrb[241].mxu0  ;;  %v5618_v49 = vpop.f32.mrb[241].mxu1 }
 0x4cf   :  { %4659 = vst.msk [vmem:[%s10681_s2 + $0x30] sm:$0xff] %vm964_vm0, %v4634_v52  ;;  %v4636_v37 = vmul.f32 %v6368_v8, %v4586_v32  ;;  %v5555_v33 = vadd.f32 %v5554_v45, %v5553_v56  ;;  %v5619_v60 = vadd.f32 %v5618_v49, %v5617_v35  ;;  %v5556_v13 = vpop.f32.mrb[242].mxu0  ;;  %v5620_v11 = vpop.f32.mrb[242].mxu1 }
 0x4d0   :  { %v5557_v14 = vpop.f32.mrb[243].mxu0  ;;  %v5621_v46 = vpop.f32.mrb[243].mxu1 }
 0x4d1   :  { %4660 = vst.msk [vmem:[%s10681_s2 + $0x38] sm:$0xff] %vm964_vm0, %v4636_v37  ;;  %v4494_v58 = vadd.f32 %v5555_v33, %v10576_v15  ;;  %v5558_v18 = vadd.f32 %v5557_v14, %v5556_v13  ;;  %v5622_v53 = vadd.f32 %v5621_v46, %v5620_v11  ;;  %v3554_v48 = vpop.xlane.xlu1 %3553  ;;  %v6374_v57 = vpop.eup %6373 }
 0x4d2   :  { %6379 = vrcp.f32 %v3554_v48 }
 0x4d3   :  { %v4591_v21 = vadd.f32 %v5619_v60, %v4494_v58  ;;  %v4497_v25 = vadd.f32 %v5558_v18, %v10579_v4  ;;  %6381 = vrcp.f32 %v3571_v42 }
 0x4d4   :  { %v6376_v47 = vpop.eup %6375 }
 0x4d5   :  { %v4638_v41 = vmul.f32 %v6370_v29, %v4591_v21  ;;  %v4594_v54 = vadd.f32 %v5622_v53, %v4497_v25  ;;  %v5559_v7 = vpop.f32.mrb[244].mxu0  ;;  %v5623_v1 = vpop.f32.mrb[244].mxu1 }
 0x4d6   :  { %v5560_v3 = vpop.f32.mrb[245].mxu0  ;;  %v5624_v5 = vpop.f32.mrb[245].mxu1 }
 0x4d7   :  { %4661 = vst.msk [vmem:[%s10681_s2 + $0x40] sm:$0xff] %vm964_vm0, %v4638_v41  ;;  %v4640_v15 = vmul.f32 %v6372_v40, %v4594_v54  ;;  %v5561_v43 = vadd.f32 %v5560_v3, %v5559_v7  ;;  %v5625_v10 = vadd.f32 %v5624_v5, %v5623_v1  ;;  %v5562_v9 = vpop.f32.mrb[246].mxu0  ;;  %v5626_v4 = vpop.f32.mrb[246].mxu1 }
 0x4d8   :  { %v5563_v19 = vpop.f32.mrb[247].mxu0  ;;  %v5627_v44 = vpop.f32.mrb[247].mxu1 }
 0x4d9   :  { %4662 = vst.msk [vmem:[%s10681_s2 + $0x48] sm:$0xff] %vm964_vm0, %v4640_v15  ;;  %v4502_v6 = vadd.f32 %v5561_v43, %v10582_v34  ;;  %v5564_v12 = vadd.f32 %v5563_v19, %v5562_v9  ;;  %v5628_v2 = vadd.f32 %v5627_v44, %v5626_v4  ;;  %v3588_v22 = vpop.xlane.xlu1 %3587  ;;  %v6378_v8 = vpop.eup %6377 }
 0x4da   :  { %6383 = vrcp.f32 %v3588_v22 }
 0x4db   :  { %v4599_v26 = vadd.f32 %v5625_v10, %v4502_v6  ;;  %v4505_v38 = vadd.f32 %v5564_v12, %v10585_v24 }
 0x4dc   :  { %v6380_v60 = vpop.eup %6379 }
 0x4dd   :  { %v4642_v20 = vmul.f32 %v6374_v57, %v4599_v26  ;;  %v4602_v28 = vadd.f32 %v5628_v2, %v4505_v38  ;;  %v5565_v31 = vpop.f32.mrb[248].mxu0  ;;  %v5629_v30 = vpop.f32.mrb[248].mxu1 }
 0x4de   :  { %v5566_v23 = vpop.f32.mrb[249].mxu0  ;;  %v5630_v16 = vpop.f32.mrb[249].mxu1 }
 0x4df   :  { %4663 = vst.msk [vmem:[%s10681_s2 + $0x50] sm:$0xff] %vm964_vm0, %v4642_v20  ;;  %v4644_v34 = vmul.f32 %v6376_v47, %v4602_v28  ;;  %v5567_v27 = vadd.f32 %v5566_v23, %v5565_v31  ;;  %v5631_v0 = vadd.f32 %v5630_v16, %v5629_v30  ;;  %v5568_v63 = vpop.f32.mrb[250].mxu0  ;;  %v5632_v24 = vpop.f32.mrb[250].mxu1 }
 0x4e0   :  { %v5569_v61 = vpop.f32.mrb[251].mxu0  ;;  %v5633_v55 = vpop.f32.mrb[251].mxu1 }
 0x4e1   :  { %4664 = vst.msk [vmem:[%s10681_s2 + $0x58] sm:$0xff] %vm964_vm0, %v4644_v34  ;;  %v4510_v39 = vadd.f32 %v5567_v27, %v10588_v17  ;;  %v5570_v52 = vadd.f32 %v5569_v61, %v5568_v63  ;;  %v5634_v32 = vadd.f32 %v5633_v55, %v5632_v24  ;;  %v6382_v41 = vpop.eup %6381 }
 0x4e3   :  { %v4607_v56 = vadd.f32 %v5631_v0, %v4510_v39  ;;  %v4513_v35 = vadd.f32 %v5570_v52, %v10591_v51 }
 0x4e4   :  { %v6384_v1 = vpop.eup %6383 }
 0x4e5   :  { %v4646_v45 = vmul.f32 %v6378_v8, %v4607_v56  ;;  %v4610_v49 = vadd.f32 %v5634_v32, %v4513_v35  ;;  %v5571_v37 = vpop.f32.mrb[252].mxu0  ;;  %v5635_v33 = vpop.f32.mrb[252].mxu1 }
 0x4e6   :  { %v5572_v13 = vpop.f32.mrb[253].mxu0  ;;  %v5636_v11 = vpop.f32.mrb[253].mxu1 }
 0x4e7   :  { %4665 = vst.msk [vmem:[%s10681_s2 + $0x60] sm:$0xff] %vm964_vm0, %v4646_v45  ;;  %v4648_v17 = vmul.f32 %v6380_v60, %v4610_v49  ;;  %v5573_v14 = vadd.f32 %v5572_v13, %v5571_v37  ;;  %v5637_v46 = vadd.f32 %v5636_v11, %v5635_v33  ;;  %v5574_v62 = vpop.f32.mrb[254].mxu0  ;;  %v5638_v58 = vpop.f32.mrb[254].mxu1 }
 0x4e8   :  { %v5575_v51 = vpop.f32.mrb[255].mxu0  ;;  %v5639_v18 = vpop.f32.mrb[255].mxu1 }
 0x4e9   :  { %4666 = vst.msk [vmem:[%s10681_s2 + $0x68] sm:$0xff] %vm964_vm0, %v4648_v17  ;;  %v4518_v53 = vadd.f32 %v5573_v14, %v10594_v59  ;;  %v5576_v21 = vadd.f32 %v5575_v51, %v5574_v62  ;;  %v5640_v25 = vadd.f32 %v5639_v18, %v5638_v58 }
 0x4eb   :  { %v4615_v29 = vadd.f32 %v5637_v46, %v4518_v53  ;;  %v4521_v36 = vadd.f32 %v5576_v21, %v10597_v50 }
 0x4ed   :  { %v4650_v54 = vmul.f32 %v6382_v41, %v4615_v29  ;;  %v4618_v7 = vadd.f32 %v5640_v25, %v4521_v36 }
 0x4ef   :  { %4667 = vst.msk [vmem:[%s10681_s2 + $0x70] sm:$0xff] %vm964_vm0, %v4650_v54  ;;  %v4652_v40 = vmul.f32 %v6384_v1, %v4618_v7 }
 0x4f1   :  { %4668 = vst.msk [vmem:[%s10681_s2 + $0x78] sm:$0xff] %vm964_vm0, %v4652_v40 }

</bundles_post_ra>
